<compile_context>
chip_gen: v5e
topology: v5e:2x2
jax: 0.10.0
libtpu: 0.0.40
codegen_flags: <defaults>
</compile_context>

<pallas_src>
import functools

import jax
import jax.numpy as jnp
from jax import lax
from jax.experimental import pallas as pl
from jax.experimental.pallas import tpu as pltpu

DT = 1e-6  # fixed dt used inside ConvPropagator.forward


# ----------------------------------------------------------------------------
# In-kernel helpers
# ----------------------------------------------------------------------------
def _shift_rows(x, dw, w_pos, W, L):
    """xs[c, h*W + w] = x[c, h*W + (w + dw) % W]  (periodic shift inside rows).

    Two flat lane rolls + a static lane-mask select keep the state in the
    lane-dense (C, L) layout."""
    if dw == 0:
        return x
    a = pltpu.roll(x, (-dw) % L, axis=1)            # a[j] = x[(j + dw) % L]
    if dw > 0:
        b = pltpu.roll(x, (W - dw) % L, axis=1)     # b[j] = x[j + dw - W]
        use_b = w_pos >= (W - dw)
    else:
        b = pltpu.roll(x, (-dw - W) % L, axis=1)    # b[j] = x[(j + dw + W) % L]
        use_b = w_pos < (-dw)
    return jnp.where(use_b, b, a)


def _conv_periodic(x, w_ref, b_ref, ksize, w_pos, W, L, prop_idx=None):
    """Periodic 2-D conv in (C, L) layout.

    x:      (cin, L) float32 value
    w_ref:  ([prop], k*k, cout, cin) bf16 ref  (tap-major, pre-transposed)
    b_ref:  ([prop], cout, 1) float32 ref
    returns (cout, L) float32
    """
    pad = (ksize - 1) // 2
    bias = b_ref[...] if prop_idx is None else b_ref[prop_idx]
    cout = bias.shape[0]
    acc = jnp.broadcast_to(bias, (cout, L))                      # bias folded in

    # within-row shifted variants (shared by every dh for a given dw)
    xw = {dw: _shift_rows(x, dw, w_pos, W, L) for dw in range(-pad, pad + 1)}

    for dh in range(-pad, pad + 1):
        for dw in range(-pad, pad + 1):
            tap = (dh + pad) * ksize + (dw + pad)                # == ki*k + kj
            src = xw[dw]
            if dh != 0:
                # flat roll by dh*W == periodic row shift in (h, w) space
                src = pltpu.roll(src, (-dh * W) % L, axis=1)
            wt = w_ref[tap] if prop_idx is None else w_ref[prop_idx, tap]
            acc = acc + jnp.dot(wt, src.astype(jnp.bfloat16),
                                preferred_element_type=jnp.float32)
    return acc


# ----------------------------------------------------------------------------
# Fused kernel: one timestep of the propagator per grid point (b, t)
# ----------------------------------------------------------------------------
def _conv_prop_kernel(cut_ref, y0_ref, wl_ref, bl_ref, wi_ref, bi_ref,
                      wo_ref, bo_ref, wp_ref, bp_ref, out_ref, y_state,
                      *, H, W, nk, lk, prop_layers):
    L = H * W
    t = pl.program_id(1)

    @pl.when(t == 0)
    def _():                                    # new batch sample: load y0
        y_state[...] = y0_ref[...]

    w_pos = lax.broadcasted_iota(jnp.int32, (1, L), 1) % W
    y = y_state[...]                            # (C, L) f32, carried across t

    # f(y) = conv_out(relu(prop(... relu(conv_in(y))))) + conv_linear(y)
    y_lin = _conv_periodic(y, wl_ref, bl_ref, lk, w_pos, W, L)
    h = jnp.maximum(_conv_periodic(y, wi_ref, bi_ref, nk, w_pos, W, L), 0.0)
    for j in range(prop_layers):
        h = jnp.maximum(
            _conv_periodic(h, wp_ref, bp_ref, nk, w_pos, W, L, prop_idx=j), 0.0)
    f = _conv_periodic(h, wo_ref, bo_ref, nk, w_pos, W, L) + y_lin

    c = cut_ref[0]                              # SMEM scalar
    y_new = y + c * jnp.tanh((DT / c) * f)      # single scalar divide
    y_state[...] = y_new
    out_ref[...] = y_new.astype(out_ref.dtype)


# ----------------------------------------------------------------------------
# Wrapper (boundary_cond='periodic', eval mode: noise = 0)
# ----------------------------------------------------------------------------
def conv_propagator_forward(y0, linear_weight, linear_bias, in_weight, in_bias,
                            out_weight, out_bias, prop_weight, prop_bias,
                            cutoff, *, depth, hidden_channels, data_channels,
                            linear_kernel_size, nonlin_kernel_size, prop_layers):
    # TODO(synk): only boundary_cond='periodic' is implemented; 'crop'/'dirichlet0'
    # padding, linear_kernel_size==0 (conv_linear=None), prop_layers==0 and
    # training-mode prop_noise are not wired.
    B, C, H, W = y0.shape
    assert C == data_channels and prop_layers >= 1 and linear_kernel_size >= 1
    L = H * W
    nk, lk = nonlin_kernel_size, linear_kernel_size
    hid = hidden_channels

    def reorder(w, cin, k, cout):
        # (B, cin*k*k, cout) -> (B, k*k, cout, cin), bf16 for the MXU
        return jnp.transpose(w.reshape(B, cin, k * k, cout),
                             (0, 2, 3, 1)).astype(jnp.bfloat16)

    wl = reorder(linear_weight, C, lk, C)
    wi = reorder(in_weight, C, nk, hid)
    wo = reorder(out_weight, hid, nk, C)
    wp = jnp.transpose(prop_weight.reshape(B, prop_layers, hid, nk * nk, hid),
                       (0, 1, 3, 4, 2)).astype(jnp.bfloat16)

    bl = linear_bias.reshape(B, C, 1).astype(jnp.float32)
    bi = in_bias.reshape(B, hid, 1).astype(jnp.float32)
    bo = out_bias.reshape(B, C, 1).astype(jnp.float32)
    bp = prop_bias.reshape(B, prop_layers, hid, 1).astype(jnp.float32)

    y0_flat = y0.reshape(B, C, L).astype(jnp.float32)
    cutoff = cutoff.reshape(1).astype(jnp.float32)

    kernel = functools.partial(_conv_prop_kernel, H=H, W=W, nk=nk, lk=lk,
                               prop_layers=prop_layers)

    flops = 2 * B * depth * L * (C * lk * lk * C + C * nk * nk * hid
                                 + prop_layers * hid * nk * nk * hid
                                 + hid * nk * nk * C)
    bytes_accessed = int(y0_flat.size * 4 + B * depth * C * L * 4
                         + (wl.size + wi.size + wo.size + wp.size) * 2
                         + (bl.size + bi.size + bo.size + bp.size) * 4 + 4)

    out = pl.pallas_call(
        kernel,
        out_shape=jax.ShapeDtypeStruct((B, depth, C, L), jnp.float32),
        grid=(B, depth),
        in_specs=[
            pl.BlockSpec(memory_space=pltpu.MemorySpace.SMEM),                 # cutoff (1,)
            pl.BlockSpec((None, C, L), lambda b, t: (b, 0, 0)),                # y0
            pl.BlockSpec((None, lk * lk, C, C), lambda b, t: (b, 0, 0, 0)),    # w_linear
            pl.BlockSpec((None, C, 1), lambda b, t: (b, 0, 0)),                # b_linear
            pl.BlockSpec((None, nk * nk, hid, C), lambda b, t: (b, 0, 0, 0)),  # w_in
            pl.BlockSpec((None, hid, 1), lambda b, t: (b, 0, 0)),              # b_in
            pl.BlockSpec((None, nk * nk, C, hid), lambda b, t: (b, 0, 0, 0)),  # w_out
            pl.BlockSpec((None, C, 1), lambda b, t: (b, 0, 0)),                # b_out
            pl.BlockSpec((None, prop_layers, nk * nk, hid, hid),
                         lambda b, t: (b, 0, 0, 0, 0)),                        # w_prop
            pl.BlockSpec((None, prop_layers, hid, 1),
                         lambda b, t: (b, 0, 0, 0)),                           # b_prop
        ],
        out_specs=pl.BlockSpec((None, None, C, L), lambda b, t: (b, t, 0, 0)),
        scratch_shapes=[pltpu.VMEM((C, L), jnp.float32)],
        compiler_params=pltpu.CompilerParams(
            dimension_semantics=("parallel", "arbitrary")),
        cost_estimate=pl.CostEstimate(flops=flops,
                                      transcendentals=B * depth * C * L,
                                      bytes_accessed=bytes_accessed),
    )(cutoff, y0_flat, wl, bl, wi, bi, wo, bo, wp, bp)

    out = out.reshape(B, depth, C, H, W)
    return jnp.transpose(out, (0, 2, 1, 3, 4))       # (B, C, depth, H, W)


# ----------------------------------------------------------------------------
# Pure-JAX (XLA) reference mirroring the PyTorch module — used as numerics check
# ----------------------------------------------------------------------------
def _periodic_pad(y, p):
    if p > 0:
        y = jnp.concatenate([y[..., -p:], y, y[..., :p]], axis=-1)
        y = jnp.concatenate([y[..., -p:, :], y, y[..., :p, :]], axis=-2)
    return y


def _unfold(y_pad, k, H, W):
    B, C = y_pad.shape[:2]
    pats = [y_pad[:, :, ki:ki + H, kj:kj + W] for ki in range(k) for kj in range(k)]
    p = jnp.stack(pats, axis=2).reshape(B, C * k * k, H * W)
    return jnp.transpose(p, (0, 2, 1))               # (B, L, C*k*k) like F.unfold


def reference_forward(y0, linear_weight, linear_bias, in_weight, in_bias,
                      out_weight, out_bias, prop_weight, prop_bias, cutoff,
                      *, depth, hidden_channels, data_channels,
                      linear_kernel_size, nonlin_kernel_size, prop_layers):
    B, C, H, W = y0.shape
    nk, lk = nonlin_kernel_size, linear_kernel_size

    def dynconv(x, weight, bias, k):
        pad = (k - 1) // 2
        p = _unfold(_periodic_pad(x, pad), k, H, W)
        z = jnp.einsum('blk,bko->blo', p, weight) + bias[:, None, :]
        cout = weight.shape[-1]
        return jnp.transpose(z, (0, 2, 1)).reshape(B, cout, H, W)

    c = cutoff.reshape(())
    y = y0
    outs = []
    for _ in range(depth):
        y_lin = dynconv(y, linear_weight, linear_bias, lk)
        h = jax.nn.relu(dynconv(y, in_weight, in_bias, nk))
        for j in range(prop_layers):
            h = jax.nn.relu(dynconv(h, prop_weight[:, j], prop_bias[:, j], nk))
        f = dynconv(h, out_weight, out_bias, nk) + y_lin
        y = y + c * jnp.tanh(DT * f / c)
        outs.append(y)
    return jnp.stack(outs, axis=2)                   # (B, C, depth, H, W)


# ----------------------------------------------------------------------------
if __name__ == "__main__":
    key = jax.random.PRNGKey(0)
    B, C, H, W = 2, 2, 16, 16
    hidden = 16
    nk, lk = 5, 3            # nonlin_kernel_size, linear_kernel_size
    prop_layers = 1
    depth = 3

    ks = jax.random.split(key, 9)
    y0 = jax.random.normal(ks[0], (B, C, H, W), jnp.float32)
    linear_weight = 0.1 * jax.random.normal(ks[1], (B, C * lk * lk, C), jnp.float32)
    linear_bias = 0.1 * jax.random.normal(ks[2], (B, C), jnp.float32)
    in_weight = 0.1 * jax.random.normal(ks[3], (B, C * nk * nk, hidden), jnp.float32)
    in_bias = 0.1 * jax.random.normal(ks[4], (B, hidden), jnp.float32)
    out_weight = 0.1 * jax.random.normal(ks[5], (B, hidden * nk * nk, C), jnp.float32)
    out_bias = 0.1 * jax.random.normal(ks[6], (B, C), jnp.float32)
    prop_weight = 0.1 * jax.random.normal(
        ks[7], (B, prop_layers, hidden * nk * nk, hidden), jnp.float32)
    prop_bias = 0.1 * jax.random.normal(ks[8], (B, prop_layers, hidden), jnp.float32)
    cutoff = jnp.array([1.0], jnp.float32)           # Parameter(torch.Tensor([1]))

    statics = dict(depth=depth, hidden_channels=hidden, data_channels=C,
                   linear_kernel_size=lk, nonlin_kernel_size=nk,
                   prop_layers=prop_layers)
    static_names = tuple(statics.keys())
    args = (y0, linear_weight, linear_bias, in_weight, in_bias,
            out_weight, out_bias, prop_weight, prop_bias, cutoff)

    fwd = jax.jit(conv_propagator_forward, static_argnames=static_names)
    out = jax.block_until_ready(fwd(*args, **statics))

    assert out.shape == (B, C, depth, H, W), out.shape
    assert bool(jnp.all(jnp.isfinite(out)))

    # Numerics check against the plain-XLA mirror of the module.  bf16 MXU
    # operands only perturb the dt-scaled increments by ~1e-3 relative, so we
    # compare the accumulated increments with a 5% budget.
    ref_fwd = jax.jit(reference_forward, static_argnames=static_names)
    ref = jax.block_until_ready(ref_fwd(*args, **statics))
    inc = float(jnp.max(jnp.abs(ref - y0[:, :, None])))
    err = float(jnp.max(jnp.abs(out - ref)))
    assert err <= 0.05 * inc + 1e-8, (err, inc)

    print("KERNEL_OK")
</pallas_src>

<mosaic_0001>
module attributes {stable_mosaic.version = 11 : i64} {
  func.func @_conv_prop_kernel(%arg0: i32, %arg1: i32, %arg2: memref<1xf32, #tpu.memory_space<smem>>, %arg3: memref<1x2x256xf32, #tpu.memory_space<vmem>>, %arg4: memref<1x9x2x2xbf16, #tpu.memory_space<vmem>>, %arg5: memref<1x2x1xf32, #tpu.memory_space<vmem>>, %arg6: memref<1x25x16x2xbf16, #tpu.memory_space<vmem>>, %arg7: memref<1x16x1xf32, #tpu.memory_space<vmem>>, %arg8: memref<1x25x2x16xbf16, #tpu.memory_space<vmem>>, %arg9: memref<1x2x1xf32, #tpu.memory_space<vmem>>, %arg10: memref<1x1x25x16x16xbf16, #tpu.memory_space<vmem>>, %arg11: memref<1x1x16x1xf32, #tpu.memory_space<vmem>>, %arg12: memref<1x1x2x256xf32, #tpu.memory_space<vmem>>, %arg13: memref<2x256xf32, #tpu.memory_space<vmem>>) attributes {dimension_semantics = [#tpu.dimension_semantics<parallel>, #tpu.dimension_semantics<arbitrary>], iteration_bounds = array<i64: 2, 3>, scalar_prefetch = 0 : i64, scratch_operands = 1 : i64, tpu.core_type = #tpu.core_type<tc>, window_params = [{transform_indices = @transform_0, window_bounds = array<i64: 1>}, {transform_indices = @transform_1, window_bounds = array<i64: 1, 2, 256>}, {transform_indices = @transform_2, window_bounds = array<i64: 1, 9, 2, 2>}, {transform_indices = @transform_3, window_bounds = array<i64: 1, 2, 1>}, {transform_indices = @transform_4, window_bounds = array<i64: 1, 25, 16, 2>}, {transform_indices = @transform_5, window_bounds = array<i64: 1, 16, 1>}, {transform_indices = @transform_6, window_bounds = array<i64: 1, 25, 2, 16>}, {transform_indices = @transform_7, window_bounds = array<i64: 1, 2, 1>}, {transform_indices = @transform_8, window_bounds = array<i64: 1, 1, 25, 16, 16>}, {transform_indices = @transform_9, window_bounds = array<i64: 1, 1, 16, 1>}, {transform_indices = @transform_10, window_bounds = array<i64: 1, 1, 2, 256>}]} {
    %c0_i32 = arith.constant 0 : i32
    %0 = arith.cmpi eq, %arg1, %c0_i32 : i32
    %1 = arith.extui %0 : i1 to i32
    %c0_i32_0 = arith.constant 0 : i32
    %2 = arith.cmpi ne, %1, %c0_i32_0 : i32
    scf.if %2 {
      %c0_547 = arith.constant 0 : index
      %c0_548 = arith.constant 0 : index
      %c0_549 = arith.constant 0 : index
      %638 = vector.load %arg3[%c0_547, %c0_548, %c0_549] : memref<1x2x256xf32, #tpu.memory_space<vmem>>, vector<1x2x256xf32>
      %639 = vector.shape_cast %638 : vector<1x2x256xf32> to vector<2x256xf32>
      %c0_550 = arith.constant 0 : index
      %c0_551 = arith.constant 0 : index
      %640 = vector.load %arg13[%c0_550, %c0_551] : memref<2x256xf32, #tpu.memory_space<vmem>>, vector<2x256xf32>
      tpu.vector_store %arg13[%c0_550, %c0_551], %639 {strides = array<i32>} : memref<2x256xf32, #tpu.memory_space<vmem>>, vector<2x256xf32>,
    } else {
    }
    %3 = tpu.iota {dimensions = array<i32: 1>} : vector<1x256xi32>
    %c16_i32 = arith.constant 16 : i32
    %c0_i32_1 = arith.constant 0 : i32
    %4 = arith.cmpi eq, %c16_i32, %c0_i32_1 : i32
    %c1_i32 = arith.constant 1 : i32
    %5 = arith.select %4, %c1_i32, %c16_i32 : i32
    %6 = vector.broadcast %5 : i32 to vector<1x256xi32>
    %7 = arith.remsi %3, %6 : vector<1x256xi32>
    %c0_i32_2 = arith.constant 0 : i32
    %8 = vector.broadcast %c0_i32_2 : i32 to vector<1x256xi32>
    %9 = arith.cmpi ne, %7, %8 : vector<1x256xi32>
    %c0_i32_3 = arith.constant 0 : i32
    %10 = vector.broadcast %c0_i32_3 : i32 to vector<1x256xi32>
    %11 = arith.cmpi slt, %7, %10 : vector<1x256xi32>
    %c0_i32_4 = arith.constant 0 : i32
    %12 = arith.cmpi slt, %5, %c0_i32_4 : i32
    %13 = vector.broadcast %12 : i1 to vector<1x256xi1>
    %14 = vector.broadcast %13 : vector<1x256xi1> to vector<1x256xi1>
    %15 = arith.xori %11, %14 : vector<1x256xi1>
    %16 = arith.andi %15, %9 : vector<1x256xi1>
    %17 = vector.broadcast %5 : i32 to vector<1x256xi32>
    %18 = arith.addi %7, %17 : vector<1x256xi32>
    %19 = arith.select %16, %18, %7 : vector<1x256xi1>, vector<1x256xi32>
    %c0 = arith.constant 0 : index
    %c0_5 = arith.constant 0 : index
    %20 = vector.load %arg13[%c0, %c0_5] : memref<2x256xf32, #tpu.memory_space<vmem>>, vector<2x256xf32>
    %c0_6 = arith.constant 0 : index
    %c0_7 = arith.constant 0 : index
    %c0_8 = arith.constant 0 : index
    %21 = vector.load %arg5[%c0_6, %c0_7, %c0_8] : memref<1x2x1xf32, #tpu.memory_space<vmem>>, vector<1x2x1xf32>
    %22 = vector.shape_cast %21 : vector<1x2x1xf32> to vector<2x1xf32>
    %23 = vector.shape_cast %22 : vector<2x1xf32> to vector<2x1xf32>
    %24 = vector.broadcast %23 : vector<2x1xf32> to vector<2x256xf32>
    %c1_i32_9 = arith.constant 1 : i32
    %25 = tpu.dynamic_rotate %20 by %c1_i32_9 dim 1 : vector<2x256xf32>, i32 -> vector<2x256xf32>
    %c241_i32 = arith.constant 241 : i32
    %26 = tpu.dynamic_rotate %20 by %c241_i32 dim 1 : vector<2x256xf32>, i32 -> vector<2x256xf32>
    %c1_i32_10 = arith.constant 1 : i32
    %27 = vector.broadcast %c1_i32_10 : i32 to vector<1x256xi32>
    %28 = arith.cmpi slt, %19, %27 : vector<1x256xi32>
    %29 = vector.shape_cast %28 : vector<1x256xi1> to vector<1x256xi1>
    %30 = vector.broadcast %29 : vector<1x256xi1> to vector<2x256xi1>
    %31 = arith.select %30, %26, %25 : vector<2x256xi1>, vector<2x256xf32>
    %c255_i32 = arith.constant 255 : i32
    %32 = tpu.dynamic_rotate %20 by %c255_i32 dim 1 : vector<2x256xf32>, i32 -> vector<2x256xf32>
    %c15_i32 = arith.constant 15 : i32
    %33 = tpu.dynamic_rotate %20 by %c15_i32 dim 1 : vector<2x256xf32>, i32 -> vector<2x256xf32>
    %c15_i32_11 = arith.constant 15 : i32
    %34 = vector.broadcast %c15_i32_11 : i32 to vector<1x256xi32>
    %35 = arith.cmpi sge, %19, %34 : vector<1x256xi32>
    %36 = vector.shape_cast %35 : vector<1x256xi1> to vector<1x256xi1>
    %37 = vector.broadcast %36 : vector<1x256xi1> to vector<2x256xi1>
    %38 = arith.select %37, %33, %32 : vector<2x256xi1>, vector<2x256xf32>
    %c16_i32_12 = arith.constant 16 : i32
    %39 = tpu.dynamic_rotate %31 by %c16_i32_12 dim 1 : vector<2x256xf32>, i32 -> vector<2x256xf32>
    %c0_13 = arith.constant 0 : index
    %c0_14 = arith.constant 0 : index
    %c0_15 = arith.constant 0 : index
    %c0_16 = arith.constant 0 : index
    %40 = vector.load %arg4[%c0_13, %c0_14, %c0_15, %c0_16] : memref<1x9x2x2xbf16, #tpu.memory_space<vmem>>, vector<1x1x2x2xbf16>
    %41 = vector.shape_cast %40 : vector<1x1x2x2xbf16> to vector<2x2xbf16>
    %42 = arith.truncf %39 : vector<2x256xf32> to vector<2x256xbf16>
    %cst = arith.constant dense<0.000000e+00> : vector<2x256xf32>
    %43 = tpu.matmul %41, %42, %cst {dimension_numbers = #tpu.dot_dimension_numbers<[1], [0], [0], [1], [0, 0, 1, 1], [], []>} : vector<2x2xbf16>, vector<2x256xbf16>, vector<2x256xf32> -> vector<2x256xf32>
    %44 = arith.addf %24, %43 : vector<2x256xf32>
    %c16_i32_17 = arith.constant 16 : i32
    %45 = tpu.dynamic_rotate %20 by %c16_i32_17 dim 1 : vector<2x256xf32>, i32 -> vector<2x256xf32>
    %c0_18 = arith.constant 0 : index
    %c1 = arith.constant 1 : index
    %c0_19 = arith.constant 0 : index
    %c0_20 = arith.constant 0 : index
    %46 = vector.load %arg4[%c0_18, %c1, %c0_19, %c0_20] : memref<1x9x2x2xbf16, #tpu.memory_space<vmem>>, vector<1x1x2x2xbf16>
    %47 = vector.shape_cast %46 : vector<1x1x2x2xbf16> to vector<2x2xbf16>
    %48 = arith.truncf %45 : vector<2x256xf32> to vector<2x256xbf16>
    %cst_21 = arith.constant dense<0.000000e+00> : vector<2x256xf32>
    %49 = tpu.matmul %47, %48, %cst_21 {dimension_numbers = #tpu.dot_dimension_numbers<[1], [0], [0], [1], [0, 0, 1, 1], [], []>} : vector<2x2xbf16>, vector<2x256xbf16>, vector<2x256xf32> -> vector<2x256xf32>
    %50 = arith.addf %44, %49 : vector<2x256xf32>
    %c16_i32_22 = arith.constant 16 : i32
    %51 = tpu.dynamic_rotate %38 by %c16_i32_22 dim 1 : vector<2x256xf32>, i32 -> vector<2x256xf32>
    %c0_23 = arith.constant 0 : index
    %c2 = arith.constant 2 : index
    %c0_24 = arith.constant 0 : index
    %c0_25 = arith.constant 0 : index
    %52 = vector.load %arg4[%c0_23, %c2, %c0_24, %c0_25] : memref<1x9x2x2xbf16, #tpu.memory_space<vmem>>, vector<1x1x2x2xbf16>
    %53 = vector.shape_cast %52 : vector<1x1x2x2xbf16> to vector<2x2xbf16>
    %54 = arith.truncf %51 : vector<2x256xf32> to vector<2x256xbf16>
    %cst_26 = arith.constant dense<0.000000e+00> : vector<2x256xf32>
    %55 = tpu.matmul %53, %54, %cst_26 {dimension_numbers = #tpu.dot_dimension_numbers<[1], [0], [0], [1], [0, 0, 1, 1], [], []>} : vector<2x2xbf16>, vector<2x256xbf16>, vector<2x256xf32> -> vector<2x256xf32>
    %56 = arith.addf %50, %55 : vector<2x256xf32>
    %c0_27 = arith.constant 0 : index
    %c3 = arith.constant 3 : index
    %c0_28 = arith.constant 0 : index
    %c0_29 = arith.constant 0 : index
    %57 = vector.load %arg4[%c0_27, %c3, %c0_28, %c0_29] : memref<1x9x2x2xbf16, #tpu.memory_space<vmem>>, vector<1x1x2x2xbf16>
    %58 = vector.shape_cast %57 : vector<1x1x2x2xbf16> to vector<2x2xbf16>
    %59 = arith.truncf %31 : vector<2x256xf32> to vector<2x256xbf16>
    %cst_30 = arith.constant dense<0.000000e+00> : vector<2x256xf32>
    %60 = tpu.matmul %58, %59, %cst_30 {dimension_numbers = #tpu.dot_dimension_numbers<[1], [0], [0], [1], [0, 0, 1, 1], [], []>} : vector<2x2xbf16>, vector<2x256xbf16>, vector<2x256xf32> -> vector<2x256xf32>
    %61 = arith.addf %56, %60 : vector<2x256xf32>
    %c0_31 = arith.constant 0 : index
    %c4 = arith.constant 4 : index
    %c0_32 = arith.constant 0 : index
    %c0_33 = arith.constant 0 : index
    %62 = vector.load %arg4[%c0_31, %c4, %c0_32, %c0_33] : memref<1x9x2x2xbf16, #tpu.memory_space<vmem>>, vector<1x1x2x2xbf16>
    %63 = vector.shape_cast %62 : vector<1x1x2x2xbf16> to vector<2x2xbf16>
    %64 = arith.truncf %20 : vector<2x256xf32> to vector<2x256xbf16>
    %cst_34 = arith.constant dense<0.000000e+00> : vector<2x256xf32>
    %65 = tpu.matmul %63, %64, %cst_34 {dimension_numbers = #tpu.dot_dimension_numbers<[1], [0], [0], [1], [0, 0, 1, 1], [], []>} : vector<2x2xbf16>, vector<2x256xbf16>, vector<2x256xf32> -> vector<2x256xf32>
    %66 = arith.addf %61, %65 : vector<2x256xf32>
    %c0_35 = arith.constant 0 : index
    %c5 = arith.constant 5 : index
    %c0_36 = arith.constant 0 : index
    %c0_37 = arith.constant 0 : index
    %67 = vector.load %arg4[%c0_35, %c5, %c0_36, %c0_37] : memref<1x9x2x2xbf16, #tpu.memory_space<vmem>>, vector<1x1x2x2xbf16>
    %68 = vector.shape_cast %67 : vector<1x1x2x2xbf16> to vector<2x2xbf16>
    %69 = arith.truncf %38 : vector<2x256xf32> to vector<2x256xbf16>
    %cst_38 = arith.constant dense<0.000000e+00> : vector<2x256xf32>
    %70 = tpu.matmul %68, %69, %cst_38 {dimension_numbers = #tpu.dot_dimension_numbers<[1], [0], [0], [1], [0, 0, 1, 1], [], []>} : vector<2x2xbf16>, vector<2x256xbf16>, vector<2x256xf32> -> vector<2x256xf32>
    %71 = arith.addf %66, %70 : vector<2x256xf32>
    %c240_i32 = arith.constant 240 : i32
    %72 = tpu.dynamic_rotate %31 by %c240_i32 dim 1 : vector<2x256xf32>, i32 -> vector<2x256xf32>
    %c0_39 = arith.constant 0 : index
    %c6 = arith.constant 6 : index
    %c0_40 = arith.constant 0 : index
    %c0_41 = arith.constant 0 : index
    %73 = vector.load %arg4[%c0_39, %c6, %c0_40, %c0_41] : memref<1x9x2x2xbf16, #tpu.memory_space<vmem>>, vector<1x1x2x2xbf16>
    %74 = vector.shape_cast %73 : vector<1x1x2x2xbf16> to vector<2x2xbf16>
    %75 = arith.truncf %72 : vector<2x256xf32> to vector<2x256xbf16>
    %cst_42 = arith.constant dense<0.000000e+00> : vector<2x256xf32>
    %76 = tpu.matmul %74, %75, %cst_42 {dimension_numbers = #tpu.dot_dimension_numbers<[1], [0], [0], [1], [0, 0, 1, 1], [], []>} : vector<2x2xbf16>, vector<2x256xbf16>, vector<2x256xf32> -> vector<2x256xf32>
    %77 = arith.addf %71, %76 : vector<2x256xf32>
    %c240_i32_43 = arith.constant 240 : i32
    %78 = tpu.dynamic_rotate %20 by %c240_i32_43 dim 1 : vector<2x256xf32>, i32 -> vector<2x256xf32>
    %c0_44 = arith.constant 0 : index
    %c7 = arith.constant 7 : index
    %c0_45 = arith.constant 0 : index
    %c0_46 = arith.constant 0 : index
    %79 = vector.load %arg4[%c0_44, %c7, %c0_45, %c0_46] : memref<1x9x2x2xbf16, #tpu.memory_space<vmem>>, vector<1x1x2x2xbf16>
    %80 = vector.shape_cast %79 : vector<1x1x2x2xbf16> to vector<2x2xbf16>
    %81 = arith.truncf %78 : vector<2x256xf32> to vector<2x256xbf16>
    %cst_47 = arith.constant dense<0.000000e+00> : vector<2x256xf32>
    %82 = tpu.matmul %80, %81, %cst_47 {dimension_numbers = #tpu.dot_dimension_numbers<[1], [0], [0], [1], [0, 0, 1, 1], [], []>} : vector<2x2xbf16>, vector<2x256xbf16>, vector<2x256xf32> -> vector<2x256xf32>
    %83 = arith.addf %77, %82 : vector<2x256xf32>
    %c240_i32_48 = arith.constant 240 : i32
    %84 = tpu.dynamic_rotate %38 by %c240_i32_48 dim 1 : vector<2x256xf32>, i32 -> vector<2x256xf32>
    %c0_49 = arith.constant 0 : index
    %c8 = arith.constant 8 : index
    %c0_50 = arith.constant 0 : index
    %c0_51 = arith.constant 0 : index
    %85 = vector.load %arg4[%c0_49, %c8, %c0_50, %c0_51] : memref<1x9x2x2xbf16, #tpu.memory_space<vmem>>, vector<1x1x2x2xbf16>
    %86 = vector.shape_cast %85 : vector<1x1x2x2xbf16> to vector<2x2xbf16>
    %87 = arith.truncf %84 : vector<2x256xf32> to vector<2x256xbf16>
    %cst_52 = arith.constant dense<0.000000e+00> : vector<2x256xf32>
    %88 = tpu.matmul %86, %87, %cst_52 {dimension_numbers = #tpu.dot_dimension_numbers<[1], [0], [0], [1], [0, 0, 1, 1], [], []>} : vector<2x2xbf16>, vector<2x256xbf16>, vector<2x256xf32> -> vector<2x256xf32>
    %89 = arith.addf %83, %88 : vector<2x256xf32>
    %c0_53 = arith.constant 0 : index
    %c0_54 = arith.constant 0 : index
    %c0_55 = arith.constant 0 : index
    %90 = vector.load %arg7[%c0_53, %c0_54, %c0_55] : memref<1x16x1xf32, #tpu.memory_space<vmem>>, vector<1x16x1xf32>
    %91 = vector.shape_cast %90 : vector<1x16x1xf32> to vector<16x1xf32>
    %92 = vector.shape_cast %91 : vector<16x1xf32> to vector<16x1xf32>
    %93 = vector.broadcast %92 : vector<16x1xf32> to vector<16x256xf32>
    %c2_i32 = arith.constant 2 : i32
    %94 = tpu.dynamic_rotate %20 by %c2_i32 dim 1 : vector<2x256xf32>, i32 -> vector<2x256xf32>
    %c242_i32 = arith.constant 242 : i32
    %95 = tpu.dynamic_rotate %20 by %c242_i32 dim 1 : vector<2x256xf32>, i32 -> vector<2x256xf32>
    %c2_i32_56 = arith.constant 2 : i32
    %96 = vector.broadcast %c2_i32_56 : i32 to vector<1x256xi32>
    %97 = arith.cmpi slt, %19, %96 : vector<1x256xi32>
    %98 = vector.shape_cast %97 : vector<1x256xi1> to vector<1x256xi1>
    %99 = vector.broadcast %98 : vector<1x256xi1> to vector<2x256xi1>
    %100 = arith.select %99, %95, %94 : vector<2x256xi1>, vector<2x256xf32>
    %c1_i32_57 = arith.constant 1 : i32
    %101 = tpu.dynamic_rotate %20 by %c1_i32_57 dim 1 : vector<2x256xf32>, i32 -> vector<2x256xf32>
    %c241_i32_58 = arith.constant 241 : i32
    %102 = tpu.dynamic_rotate %20 by %c241_i32_58 dim 1 : vector<2x256xf32>, i32 -> vector<2x256xf32>
    %c1_i32_59 = arith.constant 1 : i32
    %103 = vector.broadcast %c1_i32_59 : i32 to vector<1x256xi32>
    %104 = arith.cmpi slt, %19, %103 : vector<1x256xi32>
    %105 = vector.shape_cast %104 : vector<1x256xi1> to vector<1x256xi1>
    %106 = vector.broadcast %105 : vector<1x256xi1> to vector<2x256xi1>
    %107 = arith.select %106, %102, %101 : vector<2x256xi1>, vector<2x256xf32>
    %c255_i32_60 = arith.constant 255 : i32
    %108 = tpu.dynamic_rotate %20 by %c255_i32_60 dim 1 : vector<2x256xf32>, i32 -> vector<2x256xf32>
    %c15_i32_61 = arith.constant 15 : i32
    %109 = tpu.dynamic_rotate %20 by %c15_i32_61 dim 1 : vector<2x256xf32>, i32 -> vector<2x256xf32>
    %c15_i32_62 = arith.constant 15 : i32
    %110 = vector.broadcast %c15_i32_62 : i32 to vector<1x256xi32>
    %111 = arith.cmpi sge, %19, %110 : vector<1x256xi32>
    %112 = vector.shape_cast %111 : vector<1x256xi1> to vector<1x256xi1>
    %113 = vector.broadcast %112 : vector<1x256xi1> to vector<2x256xi1>
    %114 = arith.select %113, %109, %108 : vector<2x256xi1>, vector<2x256xf32>
    %c254_i32 = arith.constant 254 : i32
    %115 = tpu.dynamic_rotate %20 by %c254_i32 dim 1 : vector<2x256xf32>, i32 -> vector<2x256xf32>
    %c14_i32 = arith.constant 14 : i32
    %116 = tpu.dynamic_rotate %20 by %c14_i32 dim 1 : vector<2x256xf32>, i32 -> vector<2x256xf32>
    %c14_i32_63 = arith.constant 14 : i32
    %117 = vector.broadcast %c14_i32_63 : i32 to vector<1x256xi32>
    %118 = arith.cmpi sge, %19, %117 : vector<1x256xi32>
    %119 = vector.shape_cast %118 : vector<1x256xi1> to vector<1x256xi1>
    %120 = vector.broadcast %119 : vector<1x256xi1> to vector<2x256xi1>
    %121 = arith.select %120, %116, %115 : vector<2x256xi1>, vector<2x256xf32>
    %c32_i32 = arith.constant 32 : i32
    %122 = tpu.dynamic_rotate %100 by %c32_i32 dim 1 : vector<2x256xf32>, i32 -> vector<2x256xf32>
    %c0_64 = arith.constant 0 : index
    %c0_65 = arith.constant 0 : index
    %c0_66 = arith.constant 0 : index
    %c0_67 = arith.constant 0 : index
    %123 = vector.load %arg6[%c0_64, %c0_65, %c0_66, %c0_67] : memref<1x25x16x2xbf16, #tpu.memory_space<vmem>>, vector<1x1x16x2xbf16>
    %124 = vector.shape_cast %123 : vector<1x1x16x2xbf16> to vector<16x2xbf16>
    %125 = arith.truncf %122 : vector<2x256xf32> to vector<2x256xbf16>
    %cst_68 = arith.constant dense<0.000000e+00> : vector<16x256xf32>
    %126 = tpu.matmul %124, %125, %cst_68 {dimension_numbers = #tpu.dot_dimension_numbers<[1], [0], [0], [1], [0, 0, 1, 1], [], []>} : vector<16x2xbf16>, vector<2x256xbf16>, vector<16x256xf32> -> vector<16x256xf32>
    %127 = arith.addf %93, %126 : vector<16x256xf32>
    %c32_i32_69 = arith.constant 32 : i32
    %128 = tpu.dynamic_rotate %107 by %c32_i32_69 dim 1 : vector<2x256xf32>, i32 -> vector<2x256xf32>
    %c0_70 = arith.constant 0 : index
    %c1_71 = arith.constant 1 : index
    %c0_72 = arith.constant 0 : index
    %c0_73 = arith.constant 0 : index
    %129 = vector.load %arg6[%c0_70, %c1_71, %c0_72, %c0_73] : memref<1x25x16x2xbf16, #tpu.memory_space<vmem>>, vector<1x1x16x2xbf16>
    %130 = vector.shape_cast %129 : vector<1x1x16x2xbf16> to vector<16x2xbf16>
    %131 = arith.truncf %128 : vector<2x256xf32> to vector<2x256xbf16>
    %cst_74 = arith.constant dense<0.000000e+00> : vector<16x256xf32>
    %132 = tpu.matmul %130, %131, %cst_74 {dimension_numbers = #tpu.dot_dimension_numbers<[1], [0], [0], [1], [0, 0, 1, 1], [], []>} : vector<16x2xbf16>, vector<2x256xbf16>, vector<16x256xf32> -> vector<16x256xf32>
    %133 = arith.addf %127, %132 : vector<16x256xf32>
    %c32_i32_75 = arith.constant 32 : i32
    %134 = tpu.dynamic_rotate %20 by %c32_i32_75 dim 1 : vector<2x256xf32>, i32 -> vector<2x256xf32>
    %c0_76 = arith.constant 0 : index
    %c2_77 = arith.constant 2 : index
    %c0_78 = arith.constant 0 : index
    %c0_79 = arith.constant 0 : index
    %135 = vector.load %arg6[%c0_76, %c2_77, %c0_78, %c0_79] : memref<1x25x16x2xbf16, #tpu.memory_space<vmem>>, vector<1x1x16x2xbf16>
    %136 = vector.shape_cast %135 : vector<1x1x16x2xbf16> to vector<16x2xbf16>
    %137 = arith.truncf %134 : vector<2x256xf32> to vector<2x256xbf16>
    %cst_80 = arith.constant dense<0.000000e+00> : vector<16x256xf32>
    %138 = tpu.matmul %136, %137, %cst_80 {dimension_numbers = #tpu.dot_dimension_numbers<[1], [0], [0], [1], [0, 0, 1, 1], [], []>} : vector<16x2xbf16>, vector<2x256xbf16>, vector<16x256xf32> -> vector<16x256xf32>
    %139 = arith.addf %133, %138 : vector<16x256xf32>
    %c32_i32_81 = arith.constant 32 : i32
    %140 = tpu.dynamic_rotate %114 by %c32_i32_81 dim 1 : vector<2x256xf32>, i32 -> vector<2x256xf32>
    %c0_82 = arith.constant 0 : index
    %c3_83 = arith.constant 3 : index
    %c0_84 = arith.constant 0 : index
    %c0_85 = arith.constant 0 : index
    %141 = vector.load %arg6[%c0_82, %c3_83, %c0_84, %c0_85] : memref<1x25x16x2xbf16, #tpu.memory_space<vmem>>, vector<1x1x16x2xbf16>
    %142 = vector.shape_cast %141 : vector<1x1x16x2xbf16> to vector<16x2xbf16>
    %143 = arith.truncf %140 : vector<2x256xf32> to vector<2x256xbf16>
    %cst_86 = arith.constant dense<0.000000e+00> : vector<16x256xf32>
    %144 = tpu.matmul %142, %143, %cst_86 {dimension_numbers = #tpu.dot_dimension_numbers<[1], [0], [0], [1], [0, 0, 1, 1], [], []>} : vector<16x2xbf16>, vector<2x256xbf16>, vector<16x256xf32> -> vector<16x256xf32>
    %145 = arith.addf %139, %144 : vector<16x256xf32>
    %c32_i32_87 = arith.constant 32 : i32
    %146 = tpu.dynamic_rotate %121 by %c32_i32_87 dim 1 : vector<2x256xf32>, i32 -> vector<2x256xf32>
    %c0_88 = arith.constant 0 : index
    %c4_89 = arith.constant 4 : index
    %c0_90 = arith.constant 0 : index
    %c0_91 = arith.constant 0 : index
    %147 = vector.load %arg6[%c0_88, %c4_89, %c0_90, %c0_91] : memref<1x25x16x2xbf16, #tpu.memory_space<vmem>>, vector<1x1x16x2xbf16>
    %148 = vector.shape_cast %147 : vector<1x1x16x2xbf16> to vector<16x2xbf16>
    %149 = arith.truncf %146 : vector<2x256xf32> to vector<2x256xbf16>
    %cst_92 = arith.constant dense<0.000000e+00> : vector<16x256xf32>
    %150 = tpu.matmul %148, %149, %cst_92 {dimension_numbers = #tpu.dot_dimension_numbers<[1], [0], [0], [1], [0, 0, 1, 1], [], []>} : vector<16x2xbf16>, vector<2x256xbf16>, vector<16x256xf32> -> vector<16x256xf32>
    %151 = arith.addf %145, %150 : vector<16x256xf32>
    %c16_i32_93 = arith.constant 16 : i32
    %152 = tpu.dynamic_rotate %100 by %c16_i32_93 dim 1 : vector<2x256xf32>, i32 -> vector<2x256xf32>
    %c0_94 = arith.constant 0 : index
    %c5_95 = arith.constant 5 : index
    %c0_96 = arith.constant 0 : index
    %c0_97 = arith.constant 0 : index
    %153 = vector.load %arg6[%c0_94, %c5_95, %c0_96, %c0_97] : memref<1x25x16x2xbf16, #tpu.memory_space<vmem>>, vector<1x1x16x2xbf16>
    %154 = vector.shape_cast %153 : vector<1x1x16x2xbf16> to vector<16x2xbf16>
    %155 = arith.truncf %152 : vector<2x256xf32> to vector<2x256xbf16>
    %cst_98 = arith.constant dense<0.000000e+00> : vector<16x256xf32>
    %156 = tpu.matmul %154, %155, %cst_98 {dimension_numbers = #tpu.dot_dimension_numbers<[1], [0], [0], [1], [0, 0, 1, 1], [], []>} : vector<16x2xbf16>, vector<2x256xbf16>, vector<16x256xf32> -> vector<16x256xf32>
    %157 = arith.addf %151, %156 : vector<16x256xf32>
    %c16_i32_99 = arith.constant 16 : i32
    %158 = tpu.dynamic_rotate %107 by %c16_i32_99 dim 1 : vector<2x256xf32>, i32 -> vector<2x256xf32>
    %c0_100 = arith.constant 0 : index
    %c6_101 = arith.constant 6 : index
    %c0_102 = arith.constant 0 : index
    %c0_103 = arith.constant 0 : index
    %159 = vector.load %arg6[%c0_100, %c6_101, %c0_102, %c0_103] : memref<1x25x16x2xbf16, #tpu.memory_space<vmem>>, vector<1x1x16x2xbf16>
    %160 = vector.shape_cast %159 : vector<1x1x16x2xbf16> to vector<16x2xbf16>
    %161 = arith.truncf %158 : vector<2x256xf32> to vector<2x256xbf16>
    %cst_104 = arith.constant dense<0.000000e+00> : vector<16x256xf32>
    %162 = tpu.matmul %160, %161, %cst_104 {dimension_numbers = #tpu.dot_dimension_numbers<[1], [0], [0], [1], [0, 0, 1, 1], [], []>} : vector<16x2xbf16>, vector<2x256xbf16>, vector<16x256xf32> -> vector<16x256xf32>
    %163 = arith.addf %157, %162 : vector<16x256xf32>
    %c16_i32_105 = arith.constant 16 : i32
    %164 = tpu.dynamic_rotate %20 by %c16_i32_105 dim 1 : vector<2x256xf32>, i32 -> vector<2x256xf32>
    %c0_106 = arith.constant 0 : index
    %c7_107 = arith.constant 7 : index
    %c0_108 = arith.constant 0 : index
    %c0_109 = arith.constant 0 : index
    %165 = vector.load %arg6[%c0_106, %c7_107, %c0_108, %c0_109] : memref<1x25x16x2xbf16, #tpu.memory_space<vmem>>, vector<1x1x16x2xbf16>
    %166 = vector.shape_cast %165 : vector<1x1x16x2xbf16> to vector<16x2xbf16>
    %167 = arith.truncf %164 : vector<2x256xf32> to vector<2x256xbf16>
    %cst_110 = arith.constant dense<0.000000e+00> : vector<16x256xf32>
    %168 = tpu.matmul %166, %167, %cst_110 {dimension_numbers = #tpu.dot_dimension_numbers<[1], [0], [0], [1], [0, 0, 1, 1], [], []>} : vector<16x2xbf16>, vector<2x256xbf16>, vector<16x256xf32> -> vector<16x256xf32>
    %169 = arith.addf %163, %168 : vector<16x256xf32>
    %c16_i32_111 = arith.constant 16 : i32
    %170 = tpu.dynamic_rotate %114 by %c16_i32_111 dim 1 : vector<2x256xf32>, i32 -> vector<2x256xf32>
    %c0_112 = arith.constant 0 : index
    %c8_113 = arith.constant 8 : index
    %c0_114 = arith.constant 0 : index
    %c0_115 = arith.constant 0 : index
    %171 = vector.load %arg6[%c0_112, %c8_113, %c0_114, %c0_115] : memref<1x25x16x2xbf16, #tpu.memory_space<vmem>>, vector<1x1x16x2xbf16>
    %172 = vector.shape_cast %171 : vector<1x1x16x2xbf16> to vector<16x2xbf16>
    %173 = arith.truncf %170 : vector<2x256xf32> to vector<2x256xbf16>
    %cst_116 = arith.constant dense<0.000000e+00> : vector<16x256xf32>
    %174 = tpu.matmul %172, %173, %cst_116 {dimension_numbers = #tpu.dot_dimension_numbers<[1], [0], [0], [1], [0, 0, 1, 1], [], []>} : vector<16x2xbf16>, vector<2x256xbf16>, vector<16x256xf32> -> vector<16x256xf32>
    %175 = arith.addf %169, %174 : vector<16x256xf32>
    %c16_i32_117 = arith.constant 16 : i32
    %176 = tpu.dynamic_rotate %121 by %c16_i32_117 dim 1 : vector<2x256xf32>, i32 -> vector<2x256xf32>
    %c0_118 = arith.constant 0 : index
    %c9 = arith.constant 9 : index
    %c0_119 = arith.constant 0 : index
    %c0_120 = arith.constant 0 : index
    %177 = vector.load %arg6[%c0_118, %c9, %c0_119, %c0_120] : memref<1x25x16x2xbf16, #tpu.memory_space<vmem>>, vector<1x1x16x2xbf16>
    %178 = vector.shape_cast %177 : vector<1x1x16x2xbf16> to vector<16x2xbf16>
    %179 = arith.truncf %176 : vector<2x256xf32> to vector<2x256xbf16>
    %cst_121 = arith.constant dense<0.000000e+00> : vector<16x256xf32>
    %180 = tpu.matmul %178, %179, %cst_121 {dimension_numbers = #tpu.dot_dimension_numbers<[1], [0], [0], [1], [0, 0, 1, 1], [], []>} : vector<16x2xbf16>, vector<2x256xbf16>, vector<16x256xf32> -> vector<16x256xf32>
    %181 = arith.addf %175, %180 : vector<16x256xf32>
    %c0_122 = arith.constant 0 : index
    %c10 = arith.constant 10 : index
    %c0_123 = arith.constant 0 : index
    %c0_124 = arith.constant 0 : index
    %182 = vector.load %arg6[%c0_122, %c10, %c0_123, %c0_124] : memref<1x25x16x2xbf16, #tpu.memory_space<vmem>>, vector<1x1x16x2xbf16>
    %183 = vector.shape_cast %182 : vector<1x1x16x2xbf16> to vector<16x2xbf16>
    %184 = arith.truncf %100 : vector<2x256xf32> to vector<2x256xbf16>
    %cst_125 = arith.constant dense<0.000000e+00> : vector<16x256xf32>
    %185 = tpu.matmul %183, %184, %cst_125 {dimension_numbers = #tpu.dot_dimension_numbers<[1], [0], [0], [1], [0, 0, 1, 1], [], []>} : vector<16x2xbf16>, vector<2x256xbf16>, vector<16x256xf32> -> vector<16x256xf32>
    %186 = arith.addf %181, %185 : vector<16x256xf32>
    %c0_126 = arith.constant 0 : index
    %c11 = arith.constant 11 : index
    %c0_127 = arith.constant 0 : index
    %c0_128 = arith.constant 0 : index
    %187 = vector.load %arg6[%c0_126, %c11, %c0_127, %c0_128] : memref<1x25x16x2xbf16, #tpu.memory_space<vmem>>, vector<1x1x16x2xbf16>
    %188 = vector.shape_cast %187 : vector<1x1x16x2xbf16> to vector<16x2xbf16>
    %189 = arith.truncf %107 : vector<2x256xf32> to vector<2x256xbf16>
    %cst_129 = arith.constant dense<0.000000e+00> : vector<16x256xf32>
    %190 = tpu.matmul %188, %189, %cst_129 {dimension_numbers = #tpu.dot_dimension_numbers<[1], [0], [0], [1], [0, 0, 1, 1], [], []>} : vector<16x2xbf16>, vector<2x256xbf16>, vector<16x256xf32> -> vector<16x256xf32>
    %191 = arith.addf %186, %190 : vector<16x256xf32>
    %c0_130 = arith.constant 0 : index
    %c12 = arith.constant 12 : index
    %c0_131 = arith.constant 0 : index
    %c0_132 = arith.constant 0 : index
    %192 = vector.load %arg6[%c0_130, %c12, %c0_131, %c0_132] : memref<1x25x16x2xbf16, #tpu.memory_space<vmem>>, vector<1x1x16x2xbf16>
    %193 = vector.shape_cast %192 : vector<1x1x16x2xbf16> to vector<16x2xbf16>
    %194 = arith.truncf %20 : vector<2x256xf32> to vector<2x256xbf16>
    %cst_133 = arith.constant dense<0.000000e+00> : vector<16x256xf32>
    %195 = tpu.matmul %193, %194, %cst_133 {dimension_numbers = #tpu.dot_dimension_numbers<[1], [0], [0], [1], [0, 0, 1, 1], [], []>} : vector<16x2xbf16>, vector<2x256xbf16>, vector<16x256xf32> -> vector<16x256xf32>
    %196 = arith.addf %191, %195 : vector<16x256xf32>
    %c0_134 = arith.constant 0 : index
    %c13 = arith.constant 13 : index
    %c0_135 = arith.constant 0 : index
    %c0_136 = arith.constant 0 : index
    %197 = vector.load %arg6[%c0_134, %c13, %c0_135, %c0_136] : memref<1x25x16x2xbf16, #tpu.memory_space<vmem>>, vector<1x1x16x2xbf16>
    %198 = vector.shape_cast %197 : vector<1x1x16x2xbf16> to vector<16x2xbf16>
    %199 = arith.truncf %114 : vector<2x256xf32> to vector<2x256xbf16>
    %cst_137 = arith.constant dense<0.000000e+00> : vector<16x256xf32>
    %200 = tpu.matmul %198, %199, %cst_137 {dimension_numbers = #tpu.dot_dimension_numbers<[1], [0], [0], [1], [0, 0, 1, 1], [], []>} : vector<16x2xbf16>, vector<2x256xbf16>, vector<16x256xf32> -> vector<16x256xf32>
    %201 = arith.addf %196, %200 : vector<16x256xf32>
    %c0_138 = arith.constant 0 : index
    %c14 = arith.constant 14 : index
    %c0_139 = arith.constant 0 : index
    %c0_140 = arith.constant 0 : index
    %202 = vector.load %arg6[%c0_138, %c14, %c0_139, %c0_140] : memref<1x25x16x2xbf16, #tpu.memory_space<vmem>>, vector<1x1x16x2xbf16>
    %203 = vector.shape_cast %202 : vector<1x1x16x2xbf16> to vector<16x2xbf16>
    %204 = arith.truncf %121 : vector<2x256xf32> to vector<2x256xbf16>
    %cst_141 = arith.constant dense<0.000000e+00> : vector<16x256xf32>
    %205 = tpu.matmul %203, %204, %cst_141 {dimension_numbers = #tpu.dot_dimension_numbers<[1], [0], [0], [1], [0, 0, 1, 1], [], []>} : vector<16x2xbf16>, vector<2x256xbf16>, vector<16x256xf32> -> vector<16x256xf32>
    %206 = arith.addf %201, %205 : vector<16x256xf32>
    %c240_i32_142 = arith.constant 240 : i32
    %207 = tpu.dynamic_rotate %100 by %c240_i32_142 dim 1 : vector<2x256xf32>, i32 -> vector<2x256xf32>
    %c0_143 = arith.constant 0 : index
    %c15 = arith.constant 15 : index
    %c0_144 = arith.constant 0 : index
    %c0_145 = arith.constant 0 : index
    %208 = vector.load %arg6[%c0_143, %c15, %c0_144, %c0_145] : memref<1x25x16x2xbf16, #tpu.memory_space<vmem>>, vector<1x1x16x2xbf16>
    %209 = vector.shape_cast %208 : vector<1x1x16x2xbf16> to vector<16x2xbf16>
    %210 = arith.truncf %207 : vector<2x256xf32> to vector<2x256xbf16>
    %cst_146 = arith.constant dense<0.000000e+00> : vector<16x256xf32>
    %211 = tpu.matmul %209, %210, %cst_146 {dimension_numbers = #tpu.dot_dimension_numbers<[1], [0], [0], [1], [0, 0, 1, 1], [], []>} : vector<16x2xbf16>, vector<2x256xbf16>, vector<16x256xf32> -> vector<16x256xf32>
    %212 = arith.addf %206, %211 : vector<16x256xf32>
    %c240_i32_147 = arith.constant 240 : i32
    %213 = tpu.dynamic_rotate %107 by %c240_i32_147 dim 1 : vector<2x256xf32>, i32 -> vector<2x256xf32>
    %c0_148 = arith.constant 0 : index
    %c16 = arith.constant 16 : index
    %c0_149 = arith.constant 0 : index
    %c0_150 = arith.constant 0 : index
    %214 = vector.load %arg6[%c0_148, %c16, %c0_149, %c0_150] : memref<1x25x16x2xbf16, #tpu.memory_space<vmem>>, vector<1x1x16x2xbf16>
    %215 = vector.shape_cast %214 : vector<1x1x16x2xbf16> to vector<16x2xbf16>
    %216 = arith.truncf %213 : vector<2x256xf32> to vector<2x256xbf16>
    %cst_151 = arith.constant dense<0.000000e+00> : vector<16x256xf32>
    %217 = tpu.matmul %215, %216, %cst_151 {dimension_numbers = #tpu.dot_dimension_numbers<[1], [0], [0], [1], [0, 0, 1, 1], [], []>} : vector<16x2xbf16>, vector<2x256xbf16>, vector<16x256xf32> -> vector<16x256xf32>
    %218 = arith.addf %212, %217 : vector<16x256xf32>
    %c240_i32_152 = arith.constant 240 : i32
    %219 = tpu.dynamic_rotate %20 by %c240_i32_152 dim 1 : vector<2x256xf32>, i32 -> vector<2x256xf32>
    %c0_153 = arith.constant 0 : index
    %c17 = arith.constant 17 : index
    %c0_154 = arith.constant 0 : index
    %c0_155 = arith.constant 0 : index
    %220 = vector.load %arg6[%c0_153, %c17, %c0_154, %c0_155] : memref<1x25x16x2xbf16, #tpu.memory_space<vmem>>, vector<1x1x16x2xbf16>
    %221 = vector.shape_cast %220 : vector<1x1x16x2xbf16> to vector<16x2xbf16>
    %222 = arith.truncf %219 : vector<2x256xf32> to vector<2x256xbf16>
    %cst_156 = arith.constant dense<0.000000e+00> : vector<16x256xf32>
    %223 = tpu.matmul %221, %222, %cst_156 {dimension_numbers = #tpu.dot_dimension_numbers<[1], [0], [0], [1], [0, 0, 1, 1], [], []>} : vector<16x2xbf16>, vector<2x256xbf16>, vector<16x256xf32> -> vector<16x256xf32>
    %224 = arith.addf %218, %223 : vector<16x256xf32>
    %c240_i32_157 = arith.constant 240 : i32
    %225 = tpu.dynamic_rotate %114 by %c240_i32_157 dim 1 : vector<2x256xf32>, i32 -> vector<2x256xf32>
    %c0_158 = arith.constant 0 : index
    %c18 = arith.constant 18 : index
    %c0_159 = arith.constant 0 : index
    %c0_160 = arith.constant 0 : index
    %226 = vector.load %arg6[%c0_158, %c18, %c0_159, %c0_160] : memref<1x25x16x2xbf16, #tpu.memory_space<vmem>>, vector<1x1x16x2xbf16>
    %227 = vector.shape_cast %226 : vector<1x1x16x2xbf16> to vector<16x2xbf16>
    %228 = arith.truncf %225 : vector<2x256xf32> to vector<2x256xbf16>
    %cst_161 = arith.constant dense<0.000000e+00> : vector<16x256xf32>
    %229 = tpu.matmul %227, %228, %cst_161 {dimension_numbers = #tpu.dot_dimension_numbers<[1], [0], [0], [1], [0, 0, 1, 1], [], []>} : vector<16x2xbf16>, vector<2x256xbf16>, vector<16x256xf32> -> vector<16x256xf32>
    %230 = arith.addf %224, %229 : vector<16x256xf32>
    %c240_i32_162 = arith.constant 240 : i32
    %231 = tpu.dynamic_rotate %121 by %c240_i32_162 dim 1 : vector<2x256xf32>, i32 -> vector<2x256xf32>
    %c0_163 = arith.constant 0 : index
    %c19 = arith.constant 19 : index
    %c0_164 = arith.constant 0 : index
    %c0_165 = arith.constant 0 : index
    %232 = vector.load %arg6[%c0_163, %c19, %c0_164, %c0_165] : memref<1x25x16x2xbf16, #tpu.memory_space<vmem>>, vector<1x1x16x2xbf16>
    %233 = vector.shape_cast %232 : vector<1x1x16x2xbf16> to vector<16x2xbf16>
    %234 = arith.truncf %231 : vector<2x256xf32> to vector<2x256xbf16>
    %cst_166 = arith.constant dense<0.000000e+00> : vector<16x256xf32>
    %235 = tpu.matmul %233, %234, %cst_166 {dimension_numbers = #tpu.dot_dimension_numbers<[1], [0], [0], [1], [0, 0, 1, 1], [], []>} : vector<16x2xbf16>, vector<2x256xbf16>, vector<16x256xf32> -> vector<16x256xf32>
    %236 = arith.addf %230, %235 : vector<16x256xf32>
    %c224_i32 = arith.constant 224 : i32
    %237 = tpu.dynamic_rotate %100 by %c224_i32 dim 1 : vector<2x256xf32>, i32 -> vector<2x256xf32>
    %c0_167 = arith.constant 0 : index
    %c20 = arith.constant 20 : index
    %c0_168 = arith.constant 0 : index
    %c0_169 = arith.constant 0 : index
    %238 = vector.load %arg6[%c0_167, %c20, %c0_168, %c0_169] : memref<1x25x16x2xbf16, #tpu.memory_space<vmem>>, vector<1x1x16x2xbf16>
    %239 = vector.shape_cast %238 : vector<1x1x16x2xbf16> to vector<16x2xbf16>
    %240 = arith.truncf %237 : vector<2x256xf32> to vector<2x256xbf16>
    %cst_170 = arith.constant dense<0.000000e+00> : vector<16x256xf32>
    %241 = tpu.matmul %239, %240, %cst_170 {dimension_numbers = #tpu.dot_dimension_numbers<[1], [0], [0], [1], [0, 0, 1, 1], [], []>} : vector<16x2xbf16>, vector<2x256xbf16>, vector<16x256xf32> -> vector<16x256xf32>
    %242 = arith.addf %236, %241 : vector<16x256xf32>
    %c224_i32_171 = arith.constant 224 : i32
    %243 = tpu.dynamic_rotate %107 by %c224_i32_171 dim 1 : vector<2x256xf32>, i32 -> vector<2x256xf32>
    %c0_172 = arith.constant 0 : index
    %c21 = arith.constant 21 : index
    %c0_173 = arith.constant 0 : index
    %c0_174 = arith.constant 0 : index
    %244 = vector.load %arg6[%c0_172, %c21, %c0_173, %c0_174] : memref<1x25x16x2xbf16, #tpu.memory_space<vmem>>, vector<1x1x16x2xbf16>
    %245 = vector.shape_cast %244 : vector<1x1x16x2xbf16> to vector<16x2xbf16>
    %246 = arith.truncf %243 : vector<2x256xf32> to vector<2x256xbf16>
    %cst_175 = arith.constant dense<0.000000e+00> : vector<16x256xf32>
    %247 = tpu.matmul %245, %246, %cst_175 {dimension_numbers = #tpu.dot_dimension_numbers<[1], [0], [0], [1], [0, 0, 1, 1], [], []>} : vector<16x2xbf16>, vector<2x256xbf16>, vector<16x256xf32> -> vector<16x256xf32>
    %248 = arith.addf %242, %247 : vector<16x256xf32>
    %c224_i32_176 = arith.constant 224 : i32
    %249 = tpu.dynamic_rotate %20 by %c224_i32_176 dim 1 : vector<2x256xf32>, i32 -> vector<2x256xf32>
    %c0_177 = arith.constant 0 : index
    %c22 = arith.constant 22 : index
    %c0_178 = arith.constant 0 : index
    %c0_179 = arith.constant 0 : index
    %250 = vector.load %arg6[%c0_177, %c22, %c0_178, %c0_179] : memref<1x25x16x2xbf16, #tpu.memory_space<vmem>>, vector<1x1x16x2xbf16>
    %251 = vector.shape_cast %250 : vector<1x1x16x2xbf16> to vector<16x2xbf16>
    %252 = arith.truncf %249 : vector<2x256xf32> to vector<2x256xbf16>
    %cst_180 = arith.constant dense<0.000000e+00> : vector<16x256xf32>
    %253 = tpu.matmul %251, %252, %cst_180 {dimension_numbers = #tpu.dot_dimension_numbers<[1], [0], [0], [1], [0, 0, 1, 1], [], []>} : vector<16x2xbf16>, vector<2x256xbf16>, vector<16x256xf32> -> vector<16x256xf32>
    %254 = arith.addf %248, %253 : vector<16x256xf32>
    %c224_i32_181 = arith.constant 224 : i32
    %255 = tpu.dynamic_rotate %114 by %c224_i32_181 dim 1 : vector<2x256xf32>, i32 -> vector<2x256xf32>
    %c0_182 = arith.constant 0 : index
    %c23 = arith.constant 23 : index
    %c0_183 = arith.constant 0 : index
    %c0_184 = arith.constant 0 : index
    %256 = vector.load %arg6[%c0_182, %c23, %c0_183, %c0_184] : memref<1x25x16x2xbf16, #tpu.memory_space<vmem>>, vector<1x1x16x2xbf16>
    %257 = vector.shape_cast %256 : vector<1x1x16x2xbf16> to vector<16x2xbf16>
    %258 = arith.truncf %255 : vector<2x256xf32> to vector<2x256xbf16>
    %cst_185 = arith.constant dense<0.000000e+00> : vector<16x256xf32>
    %259 = tpu.matmul %257, %258, %cst_185 {dimension_numbers = #tpu.dot_dimension_numbers<[1], [0], [0], [1], [0, 0, 1, 1], [], []>} : vector<16x2xbf16>, vector<2x256xbf16>, vector<16x256xf32> -> vector<16x256xf32>
    %260 = arith.addf %254, %259 : vector<16x256xf32>
    %c224_i32_186 = arith.constant 224 : i32
    %261 = tpu.dynamic_rotate %121 by %c224_i32_186 dim 1 : vector<2x256xf32>, i32 -> vector<2x256xf32>
    %c0_187 = arith.constant 0 : index
    %c24 = arith.constant 24 : index
    %c0_188 = arith.constant 0 : index
    %c0_189 = arith.constant 0 : index
    %262 = vector.load %arg6[%c0_187, %c24, %c0_188, %c0_189] : memref<1x25x16x2xbf16, #tpu.memory_space<vmem>>, vector<1x1x16x2xbf16>
    %263 = vector.shape_cast %262 : vector<1x1x16x2xbf16> to vector<16x2xbf16>
    %264 = arith.truncf %261 : vector<2x256xf32> to vector<2x256xbf16>
    %cst_190 = arith.constant dense<0.000000e+00> : vector<16x256xf32>
    %265 = tpu.matmul %263, %264, %cst_190 {dimension_numbers = #tpu.dot_dimension_numbers<[1], [0], [0], [1], [0, 0, 1, 1], [], []>} : vector<16x2xbf16>, vector<2x256xbf16>, vector<16x256xf32> -> vector<16x256xf32>
    %266 = arith.addf %260, %265 : vector<16x256xf32>
    %cst_191 = arith.constant 0.000000e+00 : f32
    %267 = vector.broadcast %cst_191 : f32 to vector<16x256xf32>
    %268 = arith.maximumf %266, %267 : vector<16x256xf32>
    %c0_192 = arith.constant 0 : index
    %c0_193 = arith.constant 0 : index
    %c0_194 = arith.constant 0 : index
    %c0_195 = arith.constant 0 : index
    %269 = vector.load %arg11[%c0_192, %c0_193, %c0_194, %c0_195] : memref<1x1x16x1xf32, #tpu.memory_space<vmem>>, vector<1x1x16x1xf32>
    %270 = vector.shape_cast %269 : vector<1x1x16x1xf32> to vector<16x1xf32>
    %271 = vector.shape_cast %270 : vector<16x1xf32> to vector<16x1xf32>
    %272 = vector.broadcast %271 : vector<16x1xf32> to vector<16x256xf32>
    %c2_i32_196 = arith.constant 2 : i32
    %273 = tpu.dynamic_rotate %268 by %c2_i32_196 dim 1 : vector<16x256xf32>, i32 -> vector<16x256xf32>
    %c242_i32_197 = arith.constant 242 : i32
    %274 = tpu.dynamic_rotate %268 by %c242_i32_197 dim 1 : vector<16x256xf32>, i32 -> vector<16x256xf32>
    %c2_i32_198 = arith.constant 2 : i32
    %275 = vector.broadcast %c2_i32_198 : i32 to vector<1x256xi32>
    %276 = arith.cmpi slt, %19, %275 : vector<1x256xi32>
    %277 = vector.shape_cast %276 : vector<1x256xi1> to vector<1x256xi1>
    %278 = vector.broadcast %277 : vector<1x256xi1> to vector<16x256xi1>
    %279 = arith.select %278, %274, %273 : vector<16x256xi1>, vector<16x256xf32>
    %c1_i32_199 = arith.constant 1 : i32
    %280 = tpu.dynamic_rotate %268 by %c1_i32_199 dim 1 : vector<16x256xf32>, i32 -> vector<16x256xf32>
    %c241_i32_200 = arith.constant 241 : i32
    %281 = tpu.dynamic_rotate %268 by %c241_i32_200 dim 1 : vector<16x256xf32>, i32 -> vector<16x256xf32>
    %c1_i32_201 = arith.constant 1 : i32
    %282 = vector.broadcast %c1_i32_201 : i32 to vector<1x256xi32>
    %283 = arith.cmpi slt, %19, %282 : vector<1x256xi32>
    %284 = vector.shape_cast %283 : vector<1x256xi1> to vector<1x256xi1>
    %285 = vector.broadcast %284 : vector<1x256xi1> to vector<16x256xi1>
    %286 = arith.select %285, %281, %280 : vector<16x256xi1>, vector<16x256xf32>
    %c255_i32_202 = arith.constant 255 : i32
    %287 = tpu.dynamic_rotate %268 by %c255_i32_202 dim 1 : vector<16x256xf32>, i32 -> vector<16x256xf32>
    %c15_i32_203 = arith.constant 15 : i32
    %288 = tpu.dynamic_rotate %268 by %c15_i32_203 dim 1 : vector<16x256xf32>, i32 -> vector<16x256xf32>
    %c15_i32_204 = arith.constant 15 : i32
    %289 = vector.broadcast %c15_i32_204 : i32 to vector<1x256xi32>
    %290 = arith.cmpi sge, %19, %289 : vector<1x256xi32>
    %291 = vector.shape_cast %290 : vector<1x256xi1> to vector<1x256xi1>
    %292 = vector.broadcast %291 : vector<1x256xi1> to vector<16x256xi1>
    %293 = arith.select %292, %288, %287 : vector<16x256xi1>, vector<16x256xf32>
    %c254_i32_205 = arith.constant 254 : i32
    %294 = tpu.dynamic_rotate %268 by %c254_i32_205 dim 1 : vector<16x256xf32>, i32 -> vector<16x256xf32>
    %c14_i32_206 = arith.constant 14 : i32
    %295 = tpu.dynamic_rotate %268 by %c14_i32_206 dim 1 : vector<16x256xf32>, i32 -> vector<16x256xf32>
    %c14_i32_207 = arith.constant 14 : i32
    %296 = vector.broadcast %c14_i32_207 : i32 to vector<1x256xi32>
    %297 = arith.cmpi sge, %19, %296 : vector<1x256xi32>
    %298 = vector.shape_cast %297 : vector<1x256xi1> to vector<1x256xi1>
    %299 = vector.broadcast %298 : vector<1x256xi1> to vector<16x256xi1>
    %300 = arith.select %299, %295, %294 : vector<16x256xi1>, vector<16x256xf32>
    %c32_i32_208 = arith.constant 32 : i32
    %301 = tpu.dynamic_rotate %279 by %c32_i32_208 dim 1 : vector<16x256xf32>, i32 -> vector<16x256xf32>
    %c0_209 = arith.constant 0 : index
    %c0_210 = arith.constant 0 : index
    %c0_211 = arith.constant 0 : index
    %c0_212 = arith.constant 0 : index
    %c0_213 = arith.constant 0 : index
    %302 = vector.load %arg10[%c0_209, %c0_210, %c0_211, %c0_212, %c0_213] : memref<1x1x25x16x16xbf16, #tpu.memory_space<vmem>>, vector<1x1x1x16x16xbf16>
    %303 = vector.shape_cast %302 : vector<1x1x1x16x16xbf16> to vector<16x16xbf16>
    %304 = arith.truncf %301 : vector<16x256xf32> to vector<16x256xbf16>
    %cst_214 = arith.constant dense<0.000000e+00> : vector<16x256xf32>
    %305 = tpu.matmul %303, %304, %cst_214 {dimension_numbers = #tpu.dot_dimension_numbers<[1], [0], [0], [1], [0, 0, 1, 1], [], []>} : vector<16x16xbf16>, vector<16x256xbf16>, vector<16x256xf32> -> vector<16x256xf32>
    %306 = arith.addf %272, %305 : vector<16x256xf32>
    %c32_i32_215 = arith.constant 32 : i32
    %307 = tpu.dynamic_rotate %286 by %c32_i32_215 dim 1 : vector<16x256xf32>, i32 -> vector<16x256xf32>
    %c0_216 = arith.constant 0 : index
    %c0_217 = arith.constant 0 : index
    %c1_218 = arith.constant 1 : index
    %c0_219 = arith.constant 0 : index
    %c0_220 = arith.constant 0 : index
    %308 = vector.load %arg10[%c0_216, %c0_217, %c1_218, %c0_219, %c0_220] : memref<1x1x25x16x16xbf16, #tpu.memory_space<vmem>>, vector<1x1x1x16x16xbf16>
    %309 = vector.shape_cast %308 : vector<1x1x1x16x16xbf16> to vector<16x16xbf16>
    %310 = arith.truncf %307 : vector<16x256xf32> to vector<16x256xbf16>
    %cst_221 = arith.constant dense<0.000000e+00> : vector<16x256xf32>
    %311 = tpu.matmul %309, %310, %cst_221 {dimension_numbers = #tpu.dot_dimension_numbers<[1], [0], [0], [1], [0, 0, 1, 1], [], []>} : vector<16x16xbf16>, vector<16x256xbf16>, vector<16x256xf32> -> vector<16x256xf32>
    %312 = arith.addf %306, %311 : vector<16x256xf32>
    %c32_i32_222 = arith.constant 32 : i32
    %313 = tpu.dynamic_rotate %268 by %c32_i32_222 dim 1 : vector<16x256xf32>, i32 -> vector<16x256xf32>
    %c0_223 = arith.constant 0 : index
    %c0_224 = arith.constant 0 : index
    %c2_225 = arith.constant 2 : index
    %c0_226 = arith.constant 0 : index
    %c0_227 = arith.constant 0 : index
    %314 = vector.load %arg10[%c0_223, %c0_224, %c2_225, %c0_226, %c0_227] : memref<1x1x25x16x16xbf16, #tpu.memory_space<vmem>>, vector<1x1x1x16x16xbf16>
    %315 = vector.shape_cast %314 : vector<1x1x1x16x16xbf16> to vector<16x16xbf16>
    %316 = arith.truncf %313 : vector<16x256xf32> to vector<16x256xbf16>
    %cst_228 = arith.constant dense<0.000000e+00> : vector<16x256xf32>
    %317 = tpu.matmul %315, %316, %cst_228 {dimension_numbers = #tpu.dot_dimension_numbers<[1], [0], [0], [1], [0, 0, 1, 1], [], []>} : vector<16x16xbf16>, vector<16x256xbf16>, vector<16x256xf32> -> vector<16x256xf32>
    %318 = arith.addf %312, %317 : vector<16x256xf32>
    %c32_i32_229 = arith.constant 32 : i32
    %319 = tpu.dynamic_rotate %293 by %c32_i32_229 dim 1 : vector<16x256xf32>, i32 -> vector<16x256xf32>
    %c0_230 = arith.constant 0 : index
    %c0_231 = arith.constant 0 : index
    %c3_232 = arith.constant 3 : index
    %c0_233 = arith.constant 0 : index
    %c0_234 = arith.constant 0 : index
    %320 = vector.load %arg10[%c0_230, %c0_231, %c3_232, %c0_233, %c0_234] : memref<1x1x25x16x16xbf16, #tpu.memory_space<vmem>>, vector<1x1x1x16x16xbf16>
    %321 = vector.shape_cast %320 : vector<1x1x1x16x16xbf16> to vector<16x16xbf16>
    %322 = arith.truncf %319 : vector<16x256xf32> to vector<16x256xbf16>
    %cst_235 = arith.constant dense<0.000000e+00> : vector<16x256xf32>
    %323 = tpu.matmul %321, %322, %cst_235 {dimension_numbers = #tpu.dot_dimension_numbers<[1], [0], [0], [1], [0, 0, 1, 1], [], []>} : vector<16x16xbf16>, vector<16x256xbf16>, vector<16x256xf32> -> vector<16x256xf32>
    %324 = arith.addf %318, %323 : vector<16x256xf32>
    %c32_i32_236 = arith.constant 32 : i32
    %325 = tpu.dynamic_rotate %300 by %c32_i32_236 dim 1 : vector<16x256xf32>, i32 -> vector<16x256xf32>
    %c0_237 = arith.constant 0 : index
    %c0_238 = arith.constant 0 : index
    %c4_239 = arith.constant 4 : index
    %c0_240 = arith.constant 0 : index
    %c0_241 = arith.constant 0 : index
    %326 = vector.load %arg10[%c0_237, %c0_238, %c4_239, %c0_240, %c0_241] : memref<1x1x25x16x16xbf16, #tpu.memory_space<vmem>>, vector<1x1x1x16x16xbf16>
    %327 = vector.shape_cast %326 : vector<1x1x1x16x16xbf16> to vector<16x16xbf16>
    %328 = arith.truncf %325 : vector<16x256xf32> to vector<16x256xbf16>
    %cst_242 = arith.constant dense<0.000000e+00> : vector<16x256xf32>
    %329 = tpu.matmul %327, %328, %cst_242 {dimension_numbers = #tpu.dot_dimension_numbers<[1], [0], [0], [1], [0, 0, 1, 1], [], []>} : vector<16x16xbf16>, vector<16x256xbf16>, vector<16x256xf32> -> vector<16x256xf32>
    %330 = arith.addf %324, %329 : vector<16x256xf32>
    %c16_i32_243 = arith.constant 16 : i32
    %331 = tpu.dynamic_rotate %279 by %c16_i32_243 dim 1 : vector<16x256xf32>, i32 -> vector<16x256xf32>
    %c0_244 = arith.constant 0 : index
    %c0_245 = arith.constant 0 : index
    %c5_246 = arith.constant 5 : index
    %c0_247 = arith.constant 0 : index
    %c0_248 = arith.constant 0 : index
    %332 = vector.load %arg10[%c0_244, %c0_245, %c5_246, %c0_247, %c0_248] : memref<1x1x25x16x16xbf16, #tpu.memory_space<vmem>>, vector<1x1x1x16x16xbf16>
    %333 = vector.shape_cast %332 : vector<1x1x1x16x16xbf16> to vector<16x16xbf16>
    %334 = arith.truncf %331 : vector<16x256xf32> to vector<16x256xbf16>
    %cst_249 = arith.constant dense<0.000000e+00> : vector<16x256xf32>
    %335 = tpu.matmul %333, %334, %cst_249 {dimension_numbers = #tpu.dot_dimension_numbers<[1], [0], [0], [1], [0, 0, 1, 1], [], []>} : vector<16x16xbf16>, vector<16x256xbf16>, vector<16x256xf32> -> vector<16x256xf32>
    %336 = arith.addf %330, %335 : vector<16x256xf32>
    %c16_i32_250 = arith.constant 16 : i32
    %337 = tpu.dynamic_rotate %286 by %c16_i32_250 dim 1 : vector<16x256xf32>, i32 -> vector<16x256xf32>
    %c0_251 = arith.constant 0 : index
    %c0_252 = arith.constant 0 : index
    %c6_253 = arith.constant 6 : index
    %c0_254 = arith.constant 0 : index
    %c0_255 = arith.constant 0 : index
    %338 = vector.load %arg10[%c0_251, %c0_252, %c6_253, %c0_254, %c0_255] : memref<1x1x25x16x16xbf16, #tpu.memory_space<vmem>>, vector<1x1x1x16x16xbf16>
    %339 = vector.shape_cast %338 : vector<1x1x1x16x16xbf16> to vector<16x16xbf16>
    %340 = arith.truncf %337 : vector<16x256xf32> to vector<16x256xbf16>
    %cst_256 = arith.constant dense<0.000000e+00> : vector<16x256xf32>
    %341 = tpu.matmul %339, %340, %cst_256 {dimension_numbers = #tpu.dot_dimension_numbers<[1], [0], [0], [1], [0, 0, 1, 1], [], []>} : vector<16x16xbf16>, vector<16x256xbf16>, vector<16x256xf32> -> vector<16x256xf32>
    %342 = arith.addf %336, %341 : vector<16x256xf32>
    %c16_i32_257 = arith.constant 16 : i32
    %343 = tpu.dynamic_rotate %268 by %c16_i32_257 dim 1 : vector<16x256xf32>, i32 -> vector<16x256xf32>
    %c0_258 = arith.constant 0 : index
    %c0_259 = arith.constant 0 : index
    %c7_260 = arith.constant 7 : index
    %c0_261 = arith.constant 0 : index
    %c0_262 = arith.constant 0 : index
    %344 = vector.load %arg10[%c0_258, %c0_259, %c7_260, %c0_261, %c0_262] : memref<1x1x25x16x16xbf16, #tpu.memory_space<vmem>>, vector<1x1x1x16x16xbf16>
    %345 = vector.shape_cast %344 : vector<1x1x1x16x16xbf16> to vector<16x16xbf16>
    %346 = arith.truncf %343 : vector<16x256xf32> to vector<16x256xbf16>
    %cst_263 = arith.constant dense<0.000000e+00> : vector<16x256xf32>
    %347 = tpu.matmul %345, %346, %cst_263 {dimension_numbers = #tpu.dot_dimension_numbers<[1], [0], [0], [1], [0, 0, 1, 1], [], []>} : vector<16x16xbf16>, vector<16x256xbf16>, vector<16x256xf32> -> vector<16x256xf32>
    %348 = arith.addf %342, %347 : vector<16x256xf32>
    %c16_i32_264 = arith.constant 16 : i32
    %349 = tpu.dynamic_rotate %293 by %c16_i32_264 dim 1 : vector<16x256xf32>, i32 -> vector<16x256xf32>
    %c0_265 = arith.constant 0 : index
    %c0_266 = arith.constant 0 : index
    %c8_267 = arith.constant 8 : index
    %c0_268 = arith.constant 0 : index
    %c0_269 = arith.constant 0 : index
    %350 = vector.load %arg10[%c0_265, %c0_266, %c8_267, %c0_268, %c0_269] : memref<1x1x25x16x16xbf16, #tpu.memory_space<vmem>>, vector<1x1x1x16x16xbf16>
    %351 = vector.shape_cast %350 : vector<1x1x1x16x16xbf16> to vector<16x16xbf16>
    %352 = arith.truncf %349 : vector<16x256xf32> to vector<16x256xbf16>
    %cst_270 = arith.constant dense<0.000000e+00> : vector<16x256xf32>
    %353 = tpu.matmul %351, %352, %cst_270 {dimension_numbers = #tpu.dot_dimension_numbers<[1], [0], [0], [1], [0, 0, 1, 1], [], []>} : vector<16x16xbf16>, vector<16x256xbf16>, vector<16x256xf32> -> vector<16x256xf32>
    %354 = arith.addf %348, %353 : vector<16x256xf32>
    %c16_i32_271 = arith.constant 16 : i32
    %355 = tpu.dynamic_rotate %300 by %c16_i32_271 dim 1 : vector<16x256xf32>, i32 -> vector<16x256xf32>
    %c0_272 = arith.constant 0 : index
    %c0_273 = arith.constant 0 : index
    %c9_274 = arith.constant 9 : index
    %c0_275 = arith.constant 0 : index
    %c0_276 = arith.constant 0 : index
    %356 = vector.load %arg10[%c0_272, %c0_273, %c9_274, %c0_275, %c0_276] : memref<1x1x25x16x16xbf16, #tpu.memory_space<vmem>>, vector<1x1x1x16x16xbf16>
    %357 = vector.shape_cast %356 : vector<1x1x1x16x16xbf16> to vector<16x16xbf16>
    %358 = arith.truncf %355 : vector<16x256xf32> to vector<16x256xbf16>
    %cst_277 = arith.constant dense<0.000000e+00> : vector<16x256xf32>
    %359 = tpu.matmul %357, %358, %cst_277 {dimension_numbers = #tpu.dot_dimension_numbers<[1], [0], [0], [1], [0, 0, 1, 1], [], []>} : vector<16x16xbf16>, vector<16x256xbf16>, vector<16x256xf32> -> vector<16x256xf32>
    %360 = arith.addf %354, %359 : vector<16x256xf32>
    %c0_278 = arith.constant 0 : index
    %c0_279 = arith.constant 0 : index
    %c10_280 = arith.constant 10 : index
    %c0_281 = arith.constant 0 : index
    %c0_282 = arith.constant 0 : index
    %361 = vector.load %arg10[%c0_278, %c0_279, %c10_280, %c0_281, %c0_282] : memref<1x1x25x16x16xbf16, #tpu.memory_space<vmem>>, vector<1x1x1x16x16xbf16>
    %362 = vector.shape_cast %361 : vector<1x1x1x16x16xbf16> to vector<16x16xbf16>
    %363 = arith.truncf %279 : vector<16x256xf32> to vector<16x256xbf16>
    %cst_283 = arith.constant dense<0.000000e+00> : vector<16x256xf32>
    %364 = tpu.matmul %362, %363, %cst_283 {dimension_numbers = #tpu.dot_dimension_numbers<[1], [0], [0], [1], [0, 0, 1, 1], [], []>} : vector<16x16xbf16>, vector<16x256xbf16>, vector<16x256xf32> -> vector<16x256xf32>
    %365 = arith.addf %360, %364 : vector<16x256xf32>
    %c0_284 = arith.constant 0 : index
    %c0_285 = arith.constant 0 : index
    %c11_286 = arith.constant 11 : index
    %c0_287 = arith.constant 0 : index
    %c0_288 = arith.constant 0 : index
    %366 = vector.load %arg10[%c0_284, %c0_285, %c11_286, %c0_287, %c0_288] : memref<1x1x25x16x16xbf16, #tpu.memory_space<vmem>>, vector<1x1x1x16x16xbf16>
    %367 = vector.shape_cast %366 : vector<1x1x1x16x16xbf16> to vector<16x16xbf16>
    %368 = arith.truncf %286 : vector<16x256xf32> to vector<16x256xbf16>
    %cst_289 = arith.constant dense<0.000000e+00> : vector<16x256xf32>
    %369 = tpu.matmul %367, %368, %cst_289 {dimension_numbers = #tpu.dot_dimension_numbers<[1], [0], [0], [1], [0, 0, 1, 1], [], []>} : vector<16x16xbf16>, vector<16x256xbf16>, vector<16x256xf32> -> vector<16x256xf32>
    %370 = arith.addf %365, %369 : vector<16x256xf32>
    %c0_290 = arith.constant 0 : index
    %c0_291 = arith.constant 0 : index
    %c12_292 = arith.constant 12 : index
    %c0_293 = arith.constant 0 : index
    %c0_294 = arith.constant 0 : index
    %371 = vector.load %arg10[%c0_290, %c0_291, %c12_292, %c0_293, %c0_294] : memref<1x1x25x16x16xbf16, #tpu.memory_space<vmem>>, vector<1x1x1x16x16xbf16>
    %372 = vector.shape_cast %371 : vector<1x1x1x16x16xbf16> to vector<16x16xbf16>
    %373 = arith.truncf %268 : vector<16x256xf32> to vector<16x256xbf16>
    %cst_295 = arith.constant dense<0.000000e+00> : vector<16x256xf32>
    %374 = tpu.matmul %372, %373, %cst_295 {dimension_numbers = #tpu.dot_dimension_numbers<[1], [0], [0], [1], [0, 0, 1, 1], [], []>} : vector<16x16xbf16>, vector<16x256xbf16>, vector<16x256xf32> -> vector<16x256xf32>
    %375 = arith.addf %370, %374 : vector<16x256xf32>
    %c0_296 = arith.constant 0 : index
    %c0_297 = arith.constant 0 : index
    %c13_298 = arith.constant 13 : index
    %c0_299 = arith.constant 0 : index
    %c0_300 = arith.constant 0 : index
    %376 = vector.load %arg10[%c0_296, %c0_297, %c13_298, %c0_299, %c0_300] : memref<1x1x25x16x16xbf16, #tpu.memory_space<vmem>>, vector<1x1x1x16x16xbf16>
    %377 = vector.shape_cast %376 : vector<1x1x1x16x16xbf16> to vector<16x16xbf16>
    %378 = arith.truncf %293 : vector<16x256xf32> to vector<16x256xbf16>
    %cst_301 = arith.constant dense<0.000000e+00> : vector<16x256xf32>
    %379 = tpu.matmul %377, %378, %cst_301 {dimension_numbers = #tpu.dot_dimension_numbers<[1], [0], [0], [1], [0, 0, 1, 1], [], []>} : vector<16x16xbf16>, vector<16x256xbf16>, vector<16x256xf32> -> vector<16x256xf32>
    %380 = arith.addf %375, %379 : vector<16x256xf32>
    %c0_302 = arith.constant 0 : index
    %c0_303 = arith.constant 0 : index
    %c14_304 = arith.constant 14 : index
    %c0_305 = arith.constant 0 : index
    %c0_306 = arith.constant 0 : index
    %381 = vector.load %arg10[%c0_302, %c0_303, %c14_304, %c0_305, %c0_306] : memref<1x1x25x16x16xbf16, #tpu.memory_space<vmem>>, vector<1x1x1x16x16xbf16>
    %382 = vector.shape_cast %381 : vector<1x1x1x16x16xbf16> to vector<16x16xbf16>
    %383 = arith.truncf %300 : vector<16x256xf32> to vector<16x256xbf16>
    %cst_307 = arith.constant dense<0.000000e+00> : vector<16x256xf32>
    %384 = tpu.matmul %382, %383, %cst_307 {dimension_numbers = #tpu.dot_dimension_numbers<[1], [0], [0], [1], [0, 0, 1, 1], [], []>} : vector<16x16xbf16>, vector<16x256xbf16>, vector<16x256xf32> -> vector<16x256xf32>
    %385 = arith.addf %380, %384 : vector<16x256xf32>
    %c240_i32_308 = arith.constant 240 : i32
    %386 = tpu.dynamic_rotate %279 by %c240_i32_308 dim 1 : vector<16x256xf32>, i32 -> vector<16x256xf32>
    %c0_309 = arith.constant 0 : index
    %c0_310 = arith.constant 0 : index
    %c15_311 = arith.constant 15 : index
    %c0_312 = arith.constant 0 : index
    %c0_313 = arith.constant 0 : index
    %387 = vector.load %arg10[%c0_309, %c0_310, %c15_311, %c0_312, %c0_313] : memref<1x1x25x16x16xbf16, #tpu.memory_space<vmem>>, vector<1x1x1x16x16xbf16>
    %388 = vector.shape_cast %387 : vector<1x1x1x16x16xbf16> to vector<16x16xbf16>
    %389 = arith.truncf %386 : vector<16x256xf32> to vector<16x256xbf16>
    %cst_314 = arith.constant dense<0.000000e+00> : vector<16x256xf32>
    %390 = tpu.matmul %388, %389, %cst_314 {dimension_numbers = #tpu.dot_dimension_numbers<[1], [0], [0], [1], [0, 0, 1, 1], [], []>} : vector<16x16xbf16>, vector<16x256xbf16>, vector<16x256xf32> -> vector<16x256xf32>
    %391 = arith.addf %385, %390 : vector<16x256xf32>
    %c240_i32_315 = arith.constant 240 : i32
    %392 = tpu.dynamic_rotate %286 by %c240_i32_315 dim 1 : vector<16x256xf32>, i32 -> vector<16x256xf32>
    %c0_316 = arith.constant 0 : index
    %c0_317 = arith.constant 0 : index
    %c16_318 = arith.constant 16 : index
    %c0_319 = arith.constant 0 : index
    %c0_320 = arith.constant 0 : index
    %393 = vector.load %arg10[%c0_316, %c0_317, %c16_318, %c0_319, %c0_320] : memref<1x1x25x16x16xbf16, #tpu.memory_space<vmem>>, vector<1x1x1x16x16xbf16>
    %394 = vector.shape_cast %393 : vector<1x1x1x16x16xbf16> to vector<16x16xbf16>
    %395 = arith.truncf %392 : vector<16x256xf32> to vector<16x256xbf16>
    %cst_321 = arith.constant dense<0.000000e+00> : vector<16x256xf32>
    %396 = tpu.matmul %394, %395, %cst_321 {dimension_numbers = #tpu.dot_dimension_numbers<[1], [0], [0], [1], [0, 0, 1, 1], [], []>} : vector<16x16xbf16>, vector<16x256xbf16>, vector<16x256xf32> -> vector<16x256xf32>
    %397 = arith.addf %391, %396 : vector<16x256xf32>
    %c240_i32_322 = arith.constant 240 : i32
    %398 = tpu.dynamic_rotate %268 by %c240_i32_322 dim 1 : vector<16x256xf32>, i32 -> vector<16x256xf32>
    %c0_323 = arith.constant 0 : index
    %c0_324 = arith.constant 0 : index
    %c17_325 = arith.constant 17 : index
    %c0_326 = arith.constant 0 : index
    %c0_327 = arith.constant 0 : index
    %399 = vector.load %arg10[%c0_323, %c0_324, %c17_325, %c0_326, %c0_327] : memref<1x1x25x16x16xbf16, #tpu.memory_space<vmem>>, vector<1x1x1x16x16xbf16>
    %400 = vector.shape_cast %399 : vector<1x1x1x16x16xbf16> to vector<16x16xbf16>
    %401 = arith.truncf %398 : vector<16x256xf32> to vector<16x256xbf16>
    %cst_328 = arith.constant dense<0.000000e+00> : vector<16x256xf32>
    %402 = tpu.matmul %400, %401, %cst_328 {dimension_numbers = #tpu.dot_dimension_numbers<[1], [0], [0], [1], [0, 0, 1, 1], [], []>} : vector<16x16xbf16>, vector<16x256xbf16>, vector<16x256xf32> -> vector<16x256xf32>
    %403 = arith.addf %397, %402 : vector<16x256xf32>
    %c240_i32_329 = arith.constant 240 : i32
    %404 = tpu.dynamic_rotate %293 by %c240_i32_329 dim 1 : vector<16x256xf32>, i32 -> vector<16x256xf32>
    %c0_330 = arith.constant 0 : index
    %c0_331 = arith.constant 0 : index
    %c18_332 = arith.constant 18 : index
    %c0_333 = arith.constant 0 : index
    %c0_334 = arith.constant 0 : index
    %405 = vector.load %arg10[%c0_330, %c0_331, %c18_332, %c0_333, %c0_334] : memref<1x1x25x16x16xbf16, #tpu.memory_space<vmem>>, vector<1x1x1x16x16xbf16>
    %406 = vector.shape_cast %405 : vector<1x1x1x16x16xbf16> to vector<16x16xbf16>
    %407 = arith.truncf %404 : vector<16x256xf32> to vector<16x256xbf16>
    %cst_335 = arith.constant dense<0.000000e+00> : vector<16x256xf32>
    %408 = tpu.matmul %406, %407, %cst_335 {dimension_numbers = #tpu.dot_dimension_numbers<[1], [0], [0], [1], [0, 0, 1, 1], [], []>} : vector<16x16xbf16>, vector<16x256xbf16>, vector<16x256xf32> -> vector<16x256xf32>
    %409 = arith.addf %403, %408 : vector<16x256xf32>
    %c240_i32_336 = arith.constant 240 : i32
    %410 = tpu.dynamic_rotate %300 by %c240_i32_336 dim 1 : vector<16x256xf32>, i32 -> vector<16x256xf32>
    %c0_337 = arith.constant 0 : index
    %c0_338 = arith.constant 0 : index
    %c19_339 = arith.constant 19 : index
    %c0_340 = arith.constant 0 : index
    %c0_341 = arith.constant 0 : index
    %411 = vector.load %arg10[%c0_337, %c0_338, %c19_339, %c0_340, %c0_341] : memref<1x1x25x16x16xbf16, #tpu.memory_space<vmem>>, vector<1x1x1x16x16xbf16>
    %412 = vector.shape_cast %411 : vector<1x1x1x16x16xbf16> to vector<16x16xbf16>
    %413 = arith.truncf %410 : vector<16x256xf32> to vector<16x256xbf16>
    %cst_342 = arith.constant dense<0.000000e+00> : vector<16x256xf32>
    %414 = tpu.matmul %412, %413, %cst_342 {dimension_numbers = #tpu.dot_dimension_numbers<[1], [0], [0], [1], [0, 0, 1, 1], [], []>} : vector<16x16xbf16>, vector<16x256xbf16>, vector<16x256xf32> -> vector<16x256xf32>
    %415 = arith.addf %409, %414 : vector<16x256xf32>
    %c224_i32_343 = arith.constant 224 : i32
    %416 = tpu.dynamic_rotate %279 by %c224_i32_343 dim 1 : vector<16x256xf32>, i32 -> vector<16x256xf32>
    %c0_344 = arith.constant 0 : index
    %c0_345 = arith.constant 0 : index
    %c20_346 = arith.constant 20 : index
    %c0_347 = arith.constant 0 : index
    %c0_348 = arith.constant 0 : index
    %417 = vector.load %arg10[%c0_344, %c0_345, %c20_346, %c0_347, %c0_348] : memref<1x1x25x16x16xbf16, #tpu.memory_space<vmem>>, vector<1x1x1x16x16xbf16>
    %418 = vector.shape_cast %417 : vector<1x1x1x16x16xbf16> to vector<16x16xbf16>
    %419 = arith.truncf %416 : vector<16x256xf32> to vector<16x256xbf16>
    %cst_349 = arith.constant dense<0.000000e+00> : vector<16x256xf32>
    %420 = tpu.matmul %418, %419, %cst_349 {dimension_numbers = #tpu.dot_dimension_numbers<[1], [0], [0], [1], [0, 0, 1, 1], [], []>} : vector<16x16xbf16>, vector<16x256xbf16>, vector<16x256xf32> -> vector<16x256xf32>
    %421 = arith.addf %415, %420 : vector<16x256xf32>
    %c224_i32_350 = arith.constant 224 : i32
    %422 = tpu.dynamic_rotate %286 by %c224_i32_350 dim 1 : vector<16x256xf32>, i32 -> vector<16x256xf32>
    %c0_351 = arith.constant 0 : index
    %c0_352 = arith.constant 0 : index
    %c21_353 = arith.constant 21 : index
    %c0_354 = arith.constant 0 : index
    %c0_355 = arith.constant 0 : index
    %423 = vector.load %arg10[%c0_351, %c0_352, %c21_353, %c0_354, %c0_355] : memref<1x1x25x16x16xbf16, #tpu.memory_space<vmem>>, vector<1x1x1x16x16xbf16>
    %424 = vector.shape_cast %423 : vector<1x1x1x16x16xbf16> to vector<16x16xbf16>
    %425 = arith.truncf %422 : vector<16x256xf32> to vector<16x256xbf16>
    %cst_356 = arith.constant dense<0.000000e+00> : vector<16x256xf32>
    %426 = tpu.matmul %424, %425, %cst_356 {dimension_numbers = #tpu.dot_dimension_numbers<[1], [0], [0], [1], [0, 0, 1, 1], [], []>} : vector<16x16xbf16>, vector<16x256xbf16>, vector<16x256xf32> -> vector<16x256xf32>
    %427 = arith.addf %421, %426 : vector<16x256xf32>
    %c224_i32_357 = arith.constant 224 : i32
    %428 = tpu.dynamic_rotate %268 by %c224_i32_357 dim 1 : vector<16x256xf32>, i32 -> vector<16x256xf32>
    %c0_358 = arith.constant 0 : index
    %c0_359 = arith.constant 0 : index
    %c22_360 = arith.constant 22 : index
    %c0_361 = arith.constant 0 : index
    %c0_362 = arith.constant 0 : index
    %429 = vector.load %arg10[%c0_358, %c0_359, %c22_360, %c0_361, %c0_362] : memref<1x1x25x16x16xbf16, #tpu.memory_space<vmem>>, vector<1x1x1x16x16xbf16>
    %430 = vector.shape_cast %429 : vector<1x1x1x16x16xbf16> to vector<16x16xbf16>
    %431 = arith.truncf %428 : vector<16x256xf32> to vector<16x256xbf16>
    %cst_363 = arith.constant dense<0.000000e+00> : vector<16x256xf32>
    %432 = tpu.matmul %430, %431, %cst_363 {dimension_numbers = #tpu.dot_dimension_numbers<[1], [0], [0], [1], [0, 0, 1, 1], [], []>} : vector<16x16xbf16>, vector<16x256xbf16>, vector<16x256xf32> -> vector<16x256xf32>
    %433 = arith.addf %427, %432 : vector<16x256xf32>
    %c224_i32_364 = arith.constant 224 : i32
    %434 = tpu.dynamic_rotate %293 by %c224_i32_364 dim 1 : vector<16x256xf32>, i32 -> vector<16x256xf32>
    %c0_365 = arith.constant 0 : index
    %c0_366 = arith.constant 0 : index
    %c23_367 = arith.constant 23 : index
    %c0_368 = arith.constant 0 : index
    %c0_369 = arith.constant 0 : index
    %435 = vector.load %arg10[%c0_365, %c0_366, %c23_367, %c0_368, %c0_369] : memref<1x1x25x16x16xbf16, #tpu.memory_space<vmem>>, vector<1x1x1x16x16xbf16>
    %436 = vector.shape_cast %435 : vector<1x1x1x16x16xbf16> to vector<16x16xbf16>
    %437 = arith.truncf %434 : vector<16x256xf32> to vector<16x256xbf16>
    %cst_370 = arith.constant dense<0.000000e+00> : vector<16x256xf32>
    %438 = tpu.matmul %436, %437, %cst_370 {dimension_numbers = #tpu.dot_dimension_numbers<[1], [0], [0], [1], [0, 0, 1, 1], [], []>} : vector<16x16xbf16>, vector<16x256xbf16>, vector<16x256xf32> -> vector<16x256xf32>
    %439 = arith.addf %433, %438 : vector<16x256xf32>
    %c224_i32_371 = arith.constant 224 : i32
    %440 = tpu.dynamic_rotate %300 by %c224_i32_371 dim 1 : vector<16x256xf32>, i32 -> vector<16x256xf32>
    %c0_372 = arith.constant 0 : index
    %c0_373 = arith.constant 0 : index
    %c24_374 = arith.constant 24 : index
    %c0_375 = arith.constant 0 : index
    %c0_376 = arith.constant 0 : index
    %441 = vector.load %arg10[%c0_372, %c0_373, %c24_374, %c0_375, %c0_376] : memref<1x1x25x16x16xbf16, #tpu.memory_space<vmem>>, vector<1x1x1x16x16xbf16>
    %442 = vector.shape_cast %441 : vector<1x1x1x16x16xbf16> to vector<16x16xbf16>
    %443 = arith.truncf %440 : vector<16x256xf32> to vector<16x256xbf16>
    %cst_377 = arith.constant dense<0.000000e+00> : vector<16x256xf32>
    %444 = tpu.matmul %442, %443, %cst_377 {dimension_numbers = #tpu.dot_dimension_numbers<[1], [0], [0], [1], [0, 0, 1, 1], [], []>} : vector<16x16xbf16>, vector<16x256xbf16>, vector<16x256xf32> -> vector<16x256xf32>
    %445 = arith.addf %439, %444 : vector<16x256xf32>
    %cst_378 = arith.constant 0.000000e+00 : f32
    %446 = vector.broadcast %cst_378 : f32 to vector<16x256xf32>
    %447 = arith.maximumf %445, %446 : vector<16x256xf32>
    %c0_379 = arith.constant 0 : index
    %c0_380 = arith.constant 0 : index
    %c0_381 = arith.constant 0 : index
    %448 = vector.load %arg9[%c0_379, %c0_380, %c0_381] : memref<1x2x1xf32, #tpu.memory_space<vmem>>, vector<1x2x1xf32>
    %449 = vector.shape_cast %448 : vector<1x2x1xf32> to vector<2x1xf32>
    %450 = vector.shape_cast %449 : vector<2x1xf32> to vector<2x1xf32>
    %451 = vector.broadcast %450 : vector<2x1xf32> to vector<2x256xf32>
    %c2_i32_382 = arith.constant 2 : i32
    %452 = tpu.dynamic_rotate %447 by %c2_i32_382 dim 1 : vector<16x256xf32>, i32 -> vector<16x256xf32>
    %c242_i32_383 = arith.constant 242 : i32
    %453 = tpu.dynamic_rotate %447 by %c242_i32_383 dim 1 : vector<16x256xf32>, i32 -> vector<16x256xf32>
    %c2_i32_384 = arith.constant 2 : i32
    %454 = vector.broadcast %c2_i32_384 : i32 to vector<1x256xi32>
    %455 = arith.cmpi slt, %19, %454 : vector<1x256xi32>
    %456 = vector.shape_cast %455 : vector<1x256xi1> to vector<1x256xi1>
    %457 = vector.broadcast %456 : vector<1x256xi1> to vector<16x256xi1>
    %458 = arith.select %457, %453, %452 : vector<16x256xi1>, vector<16x256xf32>
    %c1_i32_385 = arith.constant 1 : i32
    %459 = tpu.dynamic_rotate %447 by %c1_i32_385 dim 1 : vector<16x256xf32>, i32 -> vector<16x256xf32>
    %c241_i32_386 = arith.constant 241 : i32
    %460 = tpu.dynamic_rotate %447 by %c241_i32_386 dim 1 : vector<16x256xf32>, i32 -> vector<16x256xf32>
    %c1_i32_387 = arith.constant 1 : i32
    %461 = vector.broadcast %c1_i32_387 : i32 to vector<1x256xi32>
    %462 = arith.cmpi slt, %19, %461 : vector<1x256xi32>
    %463 = vector.shape_cast %462 : vector<1x256xi1> to vector<1x256xi1>
    %464 = vector.broadcast %463 : vector<1x256xi1> to vector<16x256xi1>
    %465 = arith.select %464, %460, %459 : vector<16x256xi1>, vector<16x256xf32>
    %c255_i32_388 = arith.constant 255 : i32
    %466 = tpu.dynamic_rotate %447 by %c255_i32_388 dim 1 : vector<16x256xf32>, i32 -> vector<16x256xf32>
    %c15_i32_389 = arith.constant 15 : i32
    %467 = tpu.dynamic_rotate %447 by %c15_i32_389 dim 1 : vector<16x256xf32>, i32 -> vector<16x256xf32>
    %c15_i32_390 = arith.constant 15 : i32
    %468 = vector.broadcast %c15_i32_390 : i32 to vector<1x256xi32>
    %469 = arith.cmpi sge, %19, %468 : vector<1x256xi32>
    %470 = vector.shape_cast %469 : vector<1x256xi1> to vector<1x256xi1>
    %471 = vector.broadcast %470 : vector<1x256xi1> to vector<16x256xi1>
    %472 = arith.select %471, %467, %466 : vector<16x256xi1>, vector<16x256xf32>
    %c254_i32_391 = arith.constant 254 : i32
    %473 = tpu.dynamic_rotate %447 by %c254_i32_391 dim 1 : vector<16x256xf32>, i32 -> vector<16x256xf32>
    %c14_i32_392 = arith.constant 14 : i32
    %474 = tpu.dynamic_rotate %447 by %c14_i32_392 dim 1 : vector<16x256xf32>, i32 -> vector<16x256xf32>
    %c14_i32_393 = arith.constant 14 : i32
    %475 = vector.broadcast %c14_i32_393 : i32 to vector<1x256xi32>
    %476 = arith.cmpi sge, %19, %475 : vector<1x256xi32>
    %477 = vector.shape_cast %476 : vector<1x256xi1> to vector<1x256xi1>
    %478 = vector.broadcast %477 : vector<1x256xi1> to vector<16x256xi1>
    %479 = arith.select %478, %474, %473 : vector<16x256xi1>, vector<16x256xf32>
    %c32_i32_394 = arith.constant 32 : i32
    %480 = tpu.dynamic_rotate %458 by %c32_i32_394 dim 1 : vector<16x256xf32>, i32 -> vector<16x256xf32>
    %c0_395 = arith.constant 0 : index
    %c0_396 = arith.constant 0 : index
    %c0_397 = arith.constant 0 : index
    %c0_398 = arith.constant 0 : index
    %481 = vector.load %arg8[%c0_395, %c0_396, %c0_397, %c0_398] : memref<1x25x2x16xbf16, #tpu.memory_space<vmem>>, vector<1x1x2x16xbf16>
    %482 = vector.shape_cast %481 : vector<1x1x2x16xbf16> to vector<2x16xbf16>
    %483 = arith.truncf %480 : vector<16x256xf32> to vector<16x256xbf16>
    %cst_399 = arith.constant dense<0.000000e+00> : vector<2x256xf32>
    %484 = tpu.matmul %482, %483, %cst_399 {dimension_numbers = #tpu.dot_dimension_numbers<[1], [0], [0], [1], [0, 0, 1, 1], [], []>} : vector<2x16xbf16>, vector<16x256xbf16>, vector<2x256xf32> -> vector<2x256xf32>
    %485 = arith.addf %451, %484 : vector<2x256xf32>
    %c32_i32_400 = arith.constant 32 : i32
    %486 = tpu.dynamic_rotate %465 by %c32_i32_400 dim 1 : vector<16x256xf32>, i32 -> vector<16x256xf32>
    %c0_401 = arith.constant 0 : index
    %c1_402 = arith.constant 1 : index
    %c0_403 = arith.constant 0 : index
    %c0_404 = arith.constant 0 : index
    %487 = vector.load %arg8[%c0_401, %c1_402, %c0_403, %c0_404] : memref<1x25x2x16xbf16, #tpu.memory_space<vmem>>, vector<1x1x2x16xbf16>
    %488 = vector.shape_cast %487 : vector<1x1x2x16xbf16> to vector<2x16xbf16>
    %489 = arith.truncf %486 : vector<16x256xf32> to vector<16x256xbf16>
    %cst_405 = arith.constant dense<0.000000e+00> : vector<2x256xf32>
    %490 = tpu.matmul %488, %489, %cst_405 {dimension_numbers = #tpu.dot_dimension_numbers<[1], [0], [0], [1], [0, 0, 1, 1], [], []>} : vector<2x16xbf16>, vector<16x256xbf16>, vector<2x256xf32> -> vector<2x256xf32>
    %491 = arith.addf %485, %490 : vector<2x256xf32>
    %c32_i32_406 = arith.constant 32 : i32
    %492 = tpu.dynamic_rotate %447 by %c32_i32_406 dim 1 : vector<16x256xf32>, i32 -> vector<16x256xf32>
    %c0_407 = arith.constant 0 : index
    %c2_408 = arith.constant 2 : index
    %c0_409 = arith.constant 0 : index
    %c0_410 = arith.constant 0 : index
    %493 = vector.load %arg8[%c0_407, %c2_408, %c0_409, %c0_410] : memref<1x25x2x16xbf16, #tpu.memory_space<vmem>>, vector<1x1x2x16xbf16>
    %494 = vector.shape_cast %493 : vector<1x1x2x16xbf16> to vector<2x16xbf16>
    %495 = arith.truncf %492 : vector<16x256xf32> to vector<16x256xbf16>
    %cst_411 = arith.constant dense<0.000000e+00> : vector<2x256xf32>
    %496 = tpu.matmul %494, %495, %cst_411 {dimension_numbers = #tpu.dot_dimension_numbers<[1], [0], [0], [1], [0, 0, 1, 1], [], []>} : vector<2x16xbf16>, vector<16x256xbf16>, vector<2x256xf32> -> vector<2x256xf32>
    %497 = arith.addf %491, %496 : vector<2x256xf32>
    %c32_i32_412 = arith.constant 32 : i32
    %498 = tpu.dynamic_rotate %472 by %c32_i32_412 dim 1 : vector<16x256xf32>, i32 -> vector<16x256xf32>
    %c0_413 = arith.constant 0 : index
    %c3_414 = arith.constant 3 : index
    %c0_415 = arith.constant 0 : index
    %c0_416 = arith.constant 0 : index
    %499 = vector.load %arg8[%c0_413, %c3_414, %c0_415, %c0_416] : memref<1x25x2x16xbf16, #tpu.memory_space<vmem>>, vector<1x1x2x16xbf16>
    %500 = vector.shape_cast %499 : vector<1x1x2x16xbf16> to vector<2x16xbf16>
    %501 = arith.truncf %498 : vector<16x256xf32> to vector<16x256xbf16>
    %cst_417 = arith.constant dense<0.000000e+00> : vector<2x256xf32>
    %502 = tpu.matmul %500, %501, %cst_417 {dimension_numbers = #tpu.dot_dimension_numbers<[1], [0], [0], [1], [0, 0, 1, 1], [], []>} : vector<2x16xbf16>, vector<16x256xbf16>, vector<2x256xf32> -> vector<2x256xf32>
    %503 = arith.addf %497, %502 : vector<2x256xf32>
    %c32_i32_418 = arith.constant 32 : i32
    %504 = tpu.dynamic_rotate %479 by %c32_i32_418 dim 1 : vector<16x256xf32>, i32 -> vector<16x256xf32>
    %c0_419 = arith.constant 0 : index
    %c4_420 = arith.constant 4 : index
    %c0_421 = arith.constant 0 : index
    %c0_422 = arith.constant 0 : index
    %505 = vector.load %arg8[%c0_419, %c4_420, %c0_421, %c0_422] : memref<1x25x2x16xbf16, #tpu.memory_space<vmem>>, vector<1x1x2x16xbf16>
    %506 = vector.shape_cast %505 : vector<1x1x2x16xbf16> to vector<2x16xbf16>
    %507 = arith.truncf %504 : vector<16x256xf32> to vector<16x256xbf16>
    %cst_423 = arith.constant dense<0.000000e+00> : vector<2x256xf32>
    %508 = tpu.matmul %506, %507, %cst_423 {dimension_numbers = #tpu.dot_dimension_numbers<[1], [0], [0], [1], [0, 0, 1, 1], [], []>} : vector<2x16xbf16>, vector<16x256xbf16>, vector<2x256xf32> -> vector<2x256xf32>
    %509 = arith.addf %503, %508 : vector<2x256xf32>
    %c16_i32_424 = arith.constant 16 : i32
    %510 = tpu.dynamic_rotate %458 by %c16_i32_424 dim 1 : vector<16x256xf32>, i32 -> vector<16x256xf32>
    %c0_425 = arith.constant 0 : index
    %c5_426 = arith.constant 5 : index
    %c0_427 = arith.constant 0 : index
    %c0_428 = arith.constant 0 : index
    %511 = vector.load %arg8[%c0_425, %c5_426, %c0_427, %c0_428] : memref<1x25x2x16xbf16, #tpu.memory_space<vmem>>, vector<1x1x2x16xbf16>
    %512 = vector.shape_cast %511 : vector<1x1x2x16xbf16> to vector<2x16xbf16>
    %513 = arith.truncf %510 : vector<16x256xf32> to vector<16x256xbf16>
    %cst_429 = arith.constant dense<0.000000e+00> : vector<2x256xf32>
    %514 = tpu.matmul %512, %513, %cst_429 {dimension_numbers = #tpu.dot_dimension_numbers<[1], [0], [0], [1], [0, 0, 1, 1], [], []>} : vector<2x16xbf16>, vector<16x256xbf16>, vector<2x256xf32> -> vector<2x256xf32>
    %515 = arith.addf %509, %514 : vector<2x256xf32>
    %c16_i32_430 = arith.constant 16 : i32
    %516 = tpu.dynamic_rotate %465 by %c16_i32_430 dim 1 : vector<16x256xf32>, i32 -> vector<16x256xf32>
    %c0_431 = arith.constant 0 : index
    %c6_432 = arith.constant 6 : index
    %c0_433 = arith.constant 0 : index
    %c0_434 = arith.constant 0 : index
    %517 = vector.load %arg8[%c0_431, %c6_432, %c0_433, %c0_434] : memref<1x25x2x16xbf16, #tpu.memory_space<vmem>>, vector<1x1x2x16xbf16>
    %518 = vector.shape_cast %517 : vector<1x1x2x16xbf16> to vector<2x16xbf16>
    %519 = arith.truncf %516 : vector<16x256xf32> to vector<16x256xbf16>
    %cst_435 = arith.constant dense<0.000000e+00> : vector<2x256xf32>
    %520 = tpu.matmul %518, %519, %cst_435 {dimension_numbers = #tpu.dot_dimension_numbers<[1], [0], [0], [1], [0, 0, 1, 1], [], []>} : vector<2x16xbf16>, vector<16x256xbf16>, vector<2x256xf32> -> vector<2x256xf32>
    %521 = arith.addf %515, %520 : vector<2x256xf32>
    %c16_i32_436 = arith.constant 16 : i32
    %522 = tpu.dynamic_rotate %447 by %c16_i32_436 dim 1 : vector<16x256xf32>, i32 -> vector<16x256xf32>
    %c0_437 = arith.constant 0 : index
    %c7_438 = arith.constant 7 : index
    %c0_439 = arith.constant 0 : index
    %c0_440 = arith.constant 0 : index
    %523 = vector.load %arg8[%c0_437, %c7_438, %c0_439, %c0_440] : memref<1x25x2x16xbf16, #tpu.memory_space<vmem>>, vector<1x1x2x16xbf16>
    %524 = vector.shape_cast %523 : vector<1x1x2x16xbf16> to vector<2x16xbf16>
    %525 = arith.truncf %522 : vector<16x256xf32> to vector<16x256xbf16>
    %cst_441 = arith.constant dense<0.000000e+00> : vector<2x256xf32>
    %526 = tpu.matmul %524, %525, %cst_441 {dimension_numbers = #tpu.dot_dimension_numbers<[1], [0], [0], [1], [0, 0, 1, 1], [], []>} : vector<2x16xbf16>, vector<16x256xbf16>, vector<2x256xf32> -> vector<2x256xf32>
    %527 = arith.addf %521, %526 : vector<2x256xf32>
    %c16_i32_442 = arith.constant 16 : i32
    %528 = tpu.dynamic_rotate %472 by %c16_i32_442 dim 1 : vector<16x256xf32>, i32 -> vector<16x256xf32>
    %c0_443 = arith.constant 0 : index
    %c8_444 = arith.constant 8 : index
    %c0_445 = arith.constant 0 : index
    %c0_446 = arith.constant 0 : index
    %529 = vector.load %arg8[%c0_443, %c8_444, %c0_445, %c0_446] : memref<1x25x2x16xbf16, #tpu.memory_space<vmem>>, vector<1x1x2x16xbf16>
    %530 = vector.shape_cast %529 : vector<1x1x2x16xbf16> to vector<2x16xbf16>
    %531 = arith.truncf %528 : vector<16x256xf32> to vector<16x256xbf16>
    %cst_447 = arith.constant dense<0.000000e+00> : vector<2x256xf32>
    %532 = tpu.matmul %530, %531, %cst_447 {dimension_numbers = #tpu.dot_dimension_numbers<[1], [0], [0], [1], [0, 0, 1, 1], [], []>} : vector<2x16xbf16>, vector<16x256xbf16>, vector<2x256xf32> -> vector<2x256xf32>
    %533 = arith.addf %527, %532 : vector<2x256xf32>
    %c16_i32_448 = arith.constant 16 : i32
    %534 = tpu.dynamic_rotate %479 by %c16_i32_448 dim 1 : vector<16x256xf32>, i32 -> vector<16x256xf32>
    %c0_449 = arith.constant 0 : index
    %c9_450 = arith.constant 9 : index
    %c0_451 = arith.constant 0 : index
    %c0_452 = arith.constant 0 : index
    %535 = vector.load %arg8[%c0_449, %c9_450, %c0_451, %c0_452] : memref<1x25x2x16xbf16, #tpu.memory_space<vmem>>, vector<1x1x2x16xbf16>
    %536 = vector.shape_cast %535 : vector<1x1x2x16xbf16> to vector<2x16xbf16>
    %537 = arith.truncf %534 : vector<16x256xf32> to vector<16x256xbf16>
    %cst_453 = arith.constant dense<0.000000e+00> : vector<2x256xf32>
    %538 = tpu.matmul %536, %537, %cst_453 {dimension_numbers = #tpu.dot_dimension_numbers<[1], [0], [0], [1], [0, 0, 1, 1], [], []>} : vector<2x16xbf16>, vector<16x256xbf16>, vector<2x256xf32> -> vector<2x256xf32>
    %539 = arith.addf %533, %538 : vector<2x256xf32>
    %c0_454 = arith.constant 0 : index
    %c10_455 = arith.constant 10 : index
    %c0_456 = arith.constant 0 : index
    %c0_457 = arith.constant 0 : index
    %540 = vector.load %arg8[%c0_454, %c10_455, %c0_456, %c0_457] : memref<1x25x2x16xbf16, #tpu.memory_space<vmem>>, vector<1x1x2x16xbf16>
    %541 = vector.shape_cast %540 : vector<1x1x2x16xbf16> to vector<2x16xbf16>
    %542 = arith.truncf %458 : vector<16x256xf32> to vector<16x256xbf16>
    %cst_458 = arith.constant dense<0.000000e+00> : vector<2x256xf32>
    %543 = tpu.matmul %541, %542, %cst_458 {dimension_numbers = #tpu.dot_dimension_numbers<[1], [0], [0], [1], [0, 0, 1, 1], [], []>} : vector<2x16xbf16>, vector<16x256xbf16>, vector<2x256xf32> -> vector<2x256xf32>
    %544 = arith.addf %539, %543 : vector<2x256xf32>
    %c0_459 = arith.constant 0 : index
    %c11_460 = arith.constant 11 : index
    %c0_461 = arith.constant 0 : index
    %c0_462 = arith.constant 0 : index
    %545 = vector.load %arg8[%c0_459, %c11_460, %c0_461, %c0_462] : memref<1x25x2x16xbf16, #tpu.memory_space<vmem>>, vector<1x1x2x16xbf16>
    %546 = vector.shape_cast %545 : vector<1x1x2x16xbf16> to vector<2x16xbf16>
    %547 = arith.truncf %465 : vector<16x256xf32> to vector<16x256xbf16>
    %cst_463 = arith.constant dense<0.000000e+00> : vector<2x256xf32>
    %548 = tpu.matmul %546, %547, %cst_463 {dimension_numbers = #tpu.dot_dimension_numbers<[1], [0], [0], [1], [0, 0, 1, 1], [], []>} : vector<2x16xbf16>, vector<16x256xbf16>, vector<2x256xf32> -> vector<2x256xf32>
    %549 = arith.addf %544, %548 : vector<2x256xf32>
    %c0_464 = arith.constant 0 : index
    %c12_465 = arith.constant 12 : index
    %c0_466 = arith.constant 0 : index
    %c0_467 = arith.constant 0 : index
    %550 = vector.load %arg8[%c0_464, %c12_465, %c0_466, %c0_467] : memref<1x25x2x16xbf16, #tpu.memory_space<vmem>>, vector<1x1x2x16xbf16>
    %551 = vector.shape_cast %550 : vector<1x1x2x16xbf16> to vector<2x16xbf16>
    %552 = arith.truncf %447 : vector<16x256xf32> to vector<16x256xbf16>
    %cst_468 = arith.constant dense<0.000000e+00> : vector<2x256xf32>
    %553 = tpu.matmul %551, %552, %cst_468 {dimension_numbers = #tpu.dot_dimension_numbers<[1], [0], [0], [1], [0, 0, 1, 1], [], []>} : vector<2x16xbf16>, vector<16x256xbf16>, vector<2x256xf32> -> vector<2x256xf32>
    %554 = arith.addf %549, %553 : vector<2x256xf32>
    %c0_469 = arith.constant 0 : index
    %c13_470 = arith.constant 13 : index
    %c0_471 = arith.constant 0 : index
    %c0_472 = arith.constant 0 : index
    %555 = vector.load %arg8[%c0_469, %c13_470, %c0_471, %c0_472] : memref<1x25x2x16xbf16, #tpu.memory_space<vmem>>, vector<1x1x2x16xbf16>
    %556 = vector.shape_cast %555 : vector<1x1x2x16xbf16> to vector<2x16xbf16>
    %557 = arith.truncf %472 : vector<16x256xf32> to vector<16x256xbf16>
    %cst_473 = arith.constant dense<0.000000e+00> : vector<2x256xf32>
    %558 = tpu.matmul %556, %557, %cst_473 {dimension_numbers = #tpu.dot_dimension_numbers<[1], [0], [0], [1], [0, 0, 1, 1], [], []>} : vector<2x16xbf16>, vector<16x256xbf16>, vector<2x256xf32> -> vector<2x256xf32>
    %559 = arith.addf %554, %558 : vector<2x256xf32>
    %c0_474 = arith.constant 0 : index
    %c14_475 = arith.constant 14 : index
    %c0_476 = arith.constant 0 : index
    %c0_477 = arith.constant 0 : index
    %560 = vector.load %arg8[%c0_474, %c14_475, %c0_476, %c0_477] : memref<1x25x2x16xbf16, #tpu.memory_space<vmem>>, vector<1x1x2x16xbf16>
    %561 = vector.shape_cast %560 : vector<1x1x2x16xbf16> to vector<2x16xbf16>
    %562 = arith.truncf %479 : vector<16x256xf32> to vector<16x256xbf16>
    %cst_478 = arith.constant dense<0.000000e+00> : vector<2x256xf32>
    %563 = tpu.matmul %561, %562, %cst_478 {dimension_numbers = #tpu.dot_dimension_numbers<[1], [0], [0], [1], [0, 0, 1, 1], [], []>} : vector<2x16xbf16>, vector<16x256xbf16>, vector<2x256xf32> -> vector<2x256xf32>
    %564 = arith.addf %559, %563 : vector<2x256xf32>
    %c240_i32_479 = arith.constant 240 : i32
    %565 = tpu.dynamic_rotate %458 by %c240_i32_479 dim 1 : vector<16x256xf32>, i32 -> vector<16x256xf32>
    %c0_480 = arith.constant 0 : index
    %c15_481 = arith.constant 15 : index
    %c0_482 = arith.constant 0 : index
    %c0_483 = arith.constant 0 : index
    %566 = vector.load %arg8[%c0_480, %c15_481, %c0_482, %c0_483] : memref<1x25x2x16xbf16, #tpu.memory_space<vmem>>, vector<1x1x2x16xbf16>
    %567 = vector.shape_cast %566 : vector<1x1x2x16xbf16> to vector<2x16xbf16>
    %568 = arith.truncf %565 : vector<16x256xf32> to vector<16x256xbf16>
    %cst_484 = arith.constant dense<0.000000e+00> : vector<2x256xf32>
    %569 = tpu.matmul %567, %568, %cst_484 {dimension_numbers = #tpu.dot_dimension_numbers<[1], [0], [0], [1], [0, 0, 1, 1], [], []>} : vector<2x16xbf16>, vector<16x256xbf16>, vector<2x256xf32> -> vector<2x256xf32>
    %570 = arith.addf %564, %569 : vector<2x256xf32>
    %c240_i32_485 = arith.constant 240 : i32
    %571 = tpu.dynamic_rotate %465 by %c240_i32_485 dim 1 : vector<16x256xf32>, i32 -> vector<16x256xf32>
    %c0_486 = arith.constant 0 : index
    %c16_487 = arith.constant 16 : index
    %c0_488 = arith.constant 0 : index
    %c0_489 = arith.constant 0 : index
    %572 = vector.load %arg8[%c0_486, %c16_487, %c0_488, %c0_489] : memref<1x25x2x16xbf16, #tpu.memory_space<vmem>>, vector<1x1x2x16xbf16>
    %573 = vector.shape_cast %572 : vector<1x1x2x16xbf16> to vector<2x16xbf16>
    %574 = arith.truncf %571 : vector<16x256xf32> to vector<16x256xbf16>
    %cst_490 = arith.constant dense<0.000000e+00> : vector<2x256xf32>
    %575 = tpu.matmul %573, %574, %cst_490 {dimension_numbers = #tpu.dot_dimension_numbers<[1], [0], [0], [1], [0, 0, 1, 1], [], []>} : vector<2x16xbf16>, vector<16x256xbf16>, vector<2x256xf32> -> vector<2x256xf32>
    %576 = arith.addf %570, %575 : vector<2x256xf32>
    %c240_i32_491 = arith.constant 240 : i32
    %577 = tpu.dynamic_rotate %447 by %c240_i32_491 dim 1 : vector<16x256xf32>, i32 -> vector<16x256xf32>
    %c0_492 = arith.constant 0 : index
    %c17_493 = arith.constant 17 : index
    %c0_494 = arith.constant 0 : index
    %c0_495 = arith.constant 0 : index
    %578 = vector.load %arg8[%c0_492, %c17_493, %c0_494, %c0_495] : memref<1x25x2x16xbf16, #tpu.memory_space<vmem>>, vector<1x1x2x16xbf16>
    %579 = vector.shape_cast %578 : vector<1x1x2x16xbf16> to vector<2x16xbf16>
    %580 = arith.truncf %577 : vector<16x256xf32> to vector<16x256xbf16>
    %cst_496 = arith.constant dense<0.000000e+00> : vector<2x256xf32>
    %581 = tpu.matmul %579, %580, %cst_496 {dimension_numbers = #tpu.dot_dimension_numbers<[1], [0], [0], [1], [0, 0, 1, 1], [], []>} : vector<2x16xbf16>, vector<16x256xbf16>, vector<2x256xf32> -> vector<2x256xf32>
    %582 = arith.addf %576, %581 : vector<2x256xf32>
    %c240_i32_497 = arith.constant 240 : i32
    %583 = tpu.dynamic_rotate %472 by %c240_i32_497 dim 1 : vector<16x256xf32>, i32 -> vector<16x256xf32>
    %c0_498 = arith.constant 0 : index
    %c18_499 = arith.constant 18 : index
    %c0_500 = arith.constant 0 : index
    %c0_501 = arith.constant 0 : index
    %584 = vector.load %arg8[%c0_498, %c18_499, %c0_500, %c0_501] : memref<1x25x2x16xbf16, #tpu.memory_space<vmem>>, vector<1x1x2x16xbf16>
    %585 = vector.shape_cast %584 : vector<1x1x2x16xbf16> to vector<2x16xbf16>
    %586 = arith.truncf %583 : vector<16x256xf32> to vector<16x256xbf16>
    %cst_502 = arith.constant dense<0.000000e+00> : vector<2x256xf32>
    %587 = tpu.matmul %585, %586, %cst_502 {dimension_numbers = #tpu.dot_dimension_numbers<[1], [0], [0], [1], [0, 0, 1, 1], [], []>} : vector<2x16xbf16>, vector<16x256xbf16>, vector<2x256xf32> -> vector<2x256xf32>
    %588 = arith.addf %582, %587 : vector<2x256xf32>
    %c240_i32_503 = arith.constant 240 : i32
    %589 = tpu.dynamic_rotate %479 by %c240_i32_503 dim 1 : vector<16x256xf32>, i32 -> vector<16x256xf32>
    %c0_504 = arith.constant 0 : index
    %c19_505 = arith.constant 19 : index
    %c0_506 = arith.constant 0 : index
    %c0_507 = arith.constant 0 : index
    %590 = vector.load %arg8[%c0_504, %c19_505, %c0_506, %c0_507] : memref<1x25x2x16xbf16, #tpu.memory_space<vmem>>, vector<1x1x2x16xbf16>
    %591 = vector.shape_cast %590 : vector<1x1x2x16xbf16> to vector<2x16xbf16>
    %592 = arith.truncf %589 : vector<16x256xf32> to vector<16x256xbf16>
    %cst_508 = arith.constant dense<0.000000e+00> : vector<2x256xf32>
    %593 = tpu.matmul %591, %592, %cst_508 {dimension_numbers = #tpu.dot_dimension_numbers<[1], [0], [0], [1], [0, 0, 1, 1], [], []>} : vector<2x16xbf16>, vector<16x256xbf16>, vector<2x256xf32> -> vector<2x256xf32>
    %594 = arith.addf %588, %593 : vector<2x256xf32>
    %c224_i32_509 = arith.constant 224 : i32
    %595 = tpu.dynamic_rotate %458 by %c224_i32_509 dim 1 : vector<16x256xf32>, i32 -> vector<16x256xf32>
    %c0_510 = arith.constant 0 : index
    %c20_511 = arith.constant 20 : index
    %c0_512 = arith.constant 0 : index
    %c0_513 = arith.constant 0 : index
    %596 = vector.load %arg8[%c0_510, %c20_511, %c0_512, %c0_513] : memref<1x25x2x16xbf16, #tpu.memory_space<vmem>>, vector<1x1x2x16xbf16>
    %597 = vector.shape_cast %596 : vector<1x1x2x16xbf16> to vector<2x16xbf16>
    %598 = arith.truncf %595 : vector<16x256xf32> to vector<16x256xbf16>
    %cst_514 = arith.constant dense<0.000000e+00> : vector<2x256xf32>
    %599 = tpu.matmul %597, %598, %cst_514 {dimension_numbers = #tpu.dot_dimension_numbers<[1], [0], [0], [1], [0, 0, 1, 1], [], []>} : vector<2x16xbf16>, vector<16x256xbf16>, vector<2x256xf32> -> vector<2x256xf32>
    %600 = arith.addf %594, %599 : vector<2x256xf32>
    %c224_i32_515 = arith.constant 224 : i32
    %601 = tpu.dynamic_rotate %465 by %c224_i32_515 dim 1 : vector<16x256xf32>, i32 -> vector<16x256xf32>
    %c0_516 = arith.constant 0 : index
    %c21_517 = arith.constant 21 : index
    %c0_518 = arith.constant 0 : index
    %c0_519 = arith.constant 0 : index
    %602 = vector.load %arg8[%c0_516, %c21_517, %c0_518, %c0_519] : memref<1x25x2x16xbf16, #tpu.memory_space<vmem>>, vector<1x1x2x16xbf16>
    %603 = vector.shape_cast %602 : vector<1x1x2x16xbf16> to vector<2x16xbf16>
    %604 = arith.truncf %601 : vector<16x256xf32> to vector<16x256xbf16>
    %cst_520 = arith.constant dense<0.000000e+00> : vector<2x256xf32>
    %605 = tpu.matmul %603, %604, %cst_520 {dimension_numbers = #tpu.dot_dimension_numbers<[1], [0], [0], [1], [0, 0, 1, 1], [], []>} : vector<2x16xbf16>, vector<16x256xbf16>, vector<2x256xf32> -> vector<2x256xf32>
    %606 = arith.addf %600, %605 : vector<2x256xf32>
    %c224_i32_521 = arith.constant 224 : i32
    %607 = tpu.dynamic_rotate %447 by %c224_i32_521 dim 1 : vector<16x256xf32>, i32 -> vector<16x256xf32>
    %c0_522 = arith.constant 0 : index
    %c22_523 = arith.constant 22 : index
    %c0_524 = arith.constant 0 : index
    %c0_525 = arith.constant 0 : index
    %608 = vector.load %arg8[%c0_522, %c22_523, %c0_524, %c0_525] : memref<1x25x2x16xbf16, #tpu.memory_space<vmem>>, vector<1x1x2x16xbf16>
    %609 = vector.shape_cast %608 : vector<1x1x2x16xbf16> to vector<2x16xbf16>
    %610 = arith.truncf %607 : vector<16x256xf32> to vector<16x256xbf16>
    %cst_526 = arith.constant dense<0.000000e+00> : vector<2x256xf32>
    %611 = tpu.matmul %609, %610, %cst_526 {dimension_numbers = #tpu.dot_dimension_numbers<[1], [0], [0], [1], [0, 0, 1, 1], [], []>} : vector<2x16xbf16>, vector<16x256xbf16>, vector<2x256xf32> -> vector<2x256xf32>
    %612 = arith.addf %606, %611 : vector<2x256xf32>
    %c224_i32_527 = arith.constant 224 : i32
    %613 = tpu.dynamic_rotate %472 by %c224_i32_527 dim 1 : vector<16x256xf32>, i32 -> vector<16x256xf32>
    %c0_528 = arith.constant 0 : index
    %c23_529 = arith.constant 23 : index
    %c0_530 = arith.constant 0 : index
    %c0_531 = arith.constant 0 : index
    %614 = vector.load %arg8[%c0_528, %c23_529, %c0_530, %c0_531] : memref<1x25x2x16xbf16, #tpu.memory_space<vmem>>, vector<1x1x2x16xbf16>
    %615 = vector.shape_cast %614 : vector<1x1x2x16xbf16> to vector<2x16xbf16>
    %616 = arith.truncf %613 : vector<16x256xf32> to vector<16x256xbf16>
    %cst_532 = arith.constant dense<0.000000e+00> : vector<2x256xf32>
    %617 = tpu.matmul %615, %616, %cst_532 {dimension_numbers = #tpu.dot_dimension_numbers<[1], [0], [0], [1], [0, 0, 1, 1], [], []>} : vector<2x16xbf16>, vector<16x256xbf16>, vector<2x256xf32> -> vector<2x256xf32>
    %618 = arith.addf %612, %617 : vector<2x256xf32>
    %c224_i32_533 = arith.constant 224 : i32
    %619 = tpu.dynamic_rotate %479 by %c224_i32_533 dim 1 : vector<16x256xf32>, i32 -> vector<16x256xf32>
    %c0_534 = arith.constant 0 : index
    %c24_535 = arith.constant 24 : index
    %c0_536 = arith.constant 0 : index
    %c0_537 = arith.constant 0 : index
    %620 = vector.load %arg8[%c0_534, %c24_535, %c0_536, %c0_537] : memref<1x25x2x16xbf16, #tpu.memory_space<vmem>>, vector<1x1x2x16xbf16>
    %621 = vector.shape_cast %620 : vector<1x1x2x16xbf16> to vector<2x16xbf16>
    %622 = arith.truncf %619 : vector<16x256xf32> to vector<16x256xbf16>
    %cst_538 = arith.constant dense<0.000000e+00> : vector<2x256xf32>
    %623 = tpu.matmul %621, %622, %cst_538 {dimension_numbers = #tpu.dot_dimension_numbers<[1], [0], [0], [1], [0, 0, 1, 1], [], []>} : vector<2x16xbf16>, vector<16x256xbf16>, vector<2x256xf32> -> vector<2x256xf32>
    %624 = arith.addf %618, %623 : vector<2x256xf32>
    %625 = arith.addf %624, %89 : vector<2x256xf32>
    %c0_539 = arith.constant 0 : index
    %626 = memref.load %arg2[%c0_539] : memref<1xf32, #tpu.memory_space<smem>>
    %cst_540 = arith.constant 9.99999997E-7 : f32
    %627 = arith.divf %cst_540, %626 : f32
    %628 = vector.broadcast %627 : f32 to vector<2x256xf32>
    %629 = arith.mulf %628, %625 : vector<2x256xf32>
    %630 = math.tanh %629 : vector<2x256xf32>
    %631 = vector.broadcast %626 : f32 to vector<2x256xf32>
    %632 = arith.mulf %631, %630 : vector<2x256xf32>
    %633 = arith.addf %20, %632 : vector<2x256xf32>
    %c0_541 = arith.constant 0 : index
    %c0_542 = arith.constant 0 : index
    %634 = vector.load %arg13[%c0_541, %c0_542] : memref<2x256xf32, #tpu.memory_space<vmem>>, vector<2x256xf32>
    tpu.vector_store %arg13[%c0_541, %c0_542], %633 {strides = array<i32>} : memref<2x256xf32, #tpu.memory_space<vmem>>, vector<2x256xf32>,
    %c0_543 = arith.constant 0 : index
    %c0_544 = arith.constant 0 : index
    %c0_545 = arith.constant 0 : index
    %c0_546 = arith.constant 0 : index
    %635 = vector.load %arg12[%c0_543, %c0_544, %c0_545, %c0_546] : memref<1x1x2x256xf32, #tpu.memory_space<vmem>>, vector<1x1x2x256xf32>
    %636 = vector.shape_cast %635 : vector<1x1x2x256xf32> to vector<2x256xf32>
    %637 = vector.shape_cast %633 : vector<2x256xf32> to vector<1x1x2x256xf32>
    tpu.vector_store %arg12[%c0_543, %c0_544, %c0_545, %c0_546], %637 {strides = array<i32>} : memref<1x1x2x256xf32, #tpu.memory_space<vmem>>, vector<1x1x2x256xf32>,
    return
  }
  func.func @transform_0(%arg0: i32, %arg1: i32) -> i32 {
    %c0_i32 = arith.constant 0 : i32
    %c0_i32_0 = arith.constant 0 : i32
    return %c0_i32 : i32
  }
  func.func @transform_1(%arg0: i32, %arg1: i32) -> (i32, i32, i32) {
    %c0_i32 = arith.constant 0 : i32
    %c0_i32_0 = arith.constant 0 : i32
    %c0_i32_1 = arith.constant 0 : i32
    return %arg0, %c0_i32, %c0_i32_0 : i32, i32, i32
  }
  func.func @transform_2(%arg0: i32, %arg1: i32) -> (i32, i32, i32, i32) {
    %c0_i32 = arith.constant 0 : i32
    %c0_i32_0 = arith.constant 0 : i32
    %c0_i32_1 = arith.constant 0 : i32
    %c0_i32_2 = arith.constant 0 : i32
    return %arg0, %c0_i32, %c0_i32_0, %c0_i32_1 : i32, i32, i32, i32
  }
  func.func @transform_3(%arg0: i32, %arg1: i32) -> (i32, i32, i32) {
    %c0_i32 = arith.constant 0 : i32
    %c0_i32_0 = arith.constant 0 : i32
    %c0_i32_1 = arith.constant 0 : i32
    return %arg0, %c0_i32, %c0_i32_0 : i32, i32, i32
  }
  func.func @transform_4(%arg0: i32, %arg1: i32) -> (i32, i32, i32, i32) {
    %c0_i32 = arith.constant 0 : i32
    %c0_i32_0 = arith.constant 0 : i32
    %c0_i32_1 = arith.constant 0 : i32
    %c0_i32_2 = arith.constant 0 : i32
    return %arg0, %c0_i32, %c0_i32_0, %c0_i32_1 : i32, i32, i32, i32
  }
  func.func @transform_5(%arg0: i32, %arg1: i32) -> (i32, i32, i32) {
    %c0_i32 = arith.constant 0 : i32
    %c0_i32_0 = arith.constant 0 : i32
    %c0_i32_1 = arith.constant 0 : i32
    return %arg0, %c0_i32, %c0_i32_0 : i32, i32, i32
  }
  func.func @transform_6(%arg0: i32, %arg1: i32) -> (i32, i32, i32, i32) {
    %c0_i32 = arith.constant 0 : i32
    %c0_i32_0 = arith.constant 0 : i32
    %c0_i32_1 = arith.constant 0 : i32
    %c0_i32_2 = arith.constant 0 : i32
    return %arg0, %c0_i32, %c0_i32_0, %c0_i32_1 : i32, i32, i32, i32
  }
  func.func @transform_7(%arg0: i32, %arg1: i32) -> (i32, i32, i32) {
    %c0_i32 = arith.constant 0 : i32
    %c0_i32_0 = arith.constant 0 : i32
    %c0_i32_1 = arith.constant 0 : i32
    return %arg0, %c0_i32, %c0_i32_0 : i32, i32, i32
  }
  func.func @transform_8(%arg0: i32, %arg1: i32) -> (i32, i32, i32, i32, i32) {
    %c0_i32 = arith.constant 0 : i32
    %c0_i32_0 = arith.constant 0 : i32
    %c0_i32_1 = arith.constant 0 : i32
    %c0_i32_2 = arith.constant 0 : i32
    %c0_i32_3 = arith.constant 0 : i32
    return %arg0, %c0_i32, %c0_i32_0, %c0_i32_1, %c0_i32_2 : i32, i32, i32, i32, i32
  }
  func.func @transform_9(%arg0: i32, %arg1: i32) -> (i32, i32, i32, i32) {
    %c0_i32 = arith.constant 0 : i32
    %c0_i32_0 = arith.constant 0 : i32
    %c0_i32_1 = arith.constant 0 : i32
    %c0_i32_2 = arith.constant 0 : i32
    return %arg0, %c0_i32, %c0_i32_0, %c0_i32_1 : i32, i32, i32, i32
  }
  func.func @transform_10(%arg0: i32, %arg1: i32) -> (i32, i32, i32, i32) {
    %c0_i32 = arith.constant 0 : i32
    %c0_i32_0 = arith.constant 0 : i32
    %c0_i32_1 = arith.constant 0 : i32
    return %arg0, %arg1, %c0_i32, %c0_i32_0 : i32, i32, i32, i32
  }
}

</mosaic_0001>

<bundles_post_ra>
// kernel: conv_propagator_forward.1
= control target key start
LH: loop header
LB: loop body
LE: loop exit
PB: predicated region body
PF: predicated region fallthrough
CT: control target
= control target key end

     0   :  { %s6830_s15 = smov 0   ;;  %s6832_s16 = smov 0   ;;  %s8706_s0 = inlined_call_operand.<no memory space> [shape: f32[1], index: 0, kind: input, shape index: {}]   ;;  %s8707_s1 = inlined_call_operand.vmem [shape: f32[2,2,256], index: 1, kind: input, shape index: {}]   ;;  %s8708_s2 = inlined_call_operand.vmem [shape: bf16[2,9,2,2], index: 2, kind: input, shape index: {}]   ;;  %s8709_s3 = inlined_call_operand.vmem [shape: f32[2,2,1], index: 3, kind: input, shape index: {}]   ;;  %s8710_s4 = inlined_call_operand.vmem [shape: bf16[2,25,16,2], index: 4, kind: input, shape index: {}]   ;;  %s8711_s5 = inlined_call_operand.vmem [shape: f32[2,16,1], index: 5, kind: input, shape index: {}]   ;;  %s8712_s6 = inlined_call_operand.vmem [shape: bf16[2,25,2,16], index: 6, kind: input, shape index: {}]   ;;  %s8713_s7 = inlined_call_operand.vmem [shape: f32[2,2,1], index: 7, kind: input, shape index: {}]   ;;  %s8714_s8 = inlined_call_operand.vmem [shape: bf16[2,1,25,16,16], index: 8, kind: input, shape index: {}]   ;;  %s8715_s9 = inlined_call_operand.vmem [shape: f32[2,1,16,1], index: 9, kind: input, shape index: {}]   ;;  %s8716_s10 = inlined_call_operand.vmem [shape: f32[2,3,2,256], index: 10, kind: output, shape index: {}]  }
   0x1   :  { %8733 = sst [smem:[#allocation21_spill]] %s8707_s1  ;;  %s6834_s17 = smov 0  }
   0x2   :  { %8734 = sst [smem:[#allocation22_spill]] %s8708_s2  ;;  %s6836_s18 = smov 0  }
   0x3   :  { %8735 = sst [smem:[#allocation23_spill]] %s8709_s3  ;;  %s6838_s19 = smov 0  }
   0x4   :  { %8736 = sst [smem:[#allocation24_spill]] %s8710_s4 }
   0x5   :  { %8737 = sst [smem:[#allocation25_spill]] %s8711_s5 }
   0x6   :  { %8738 = sst [smem:[#allocation26_spill]] %s8713_s7 }
   0x7   :  { %15 = sst [smem:[#allocation3]] %s8706_s0 }
   0x8 LB: > { %8739 = sst [smem:[#allocation4_spill]] %s6749_s17  ;;  %s30_s0 = sadd.s32 1, %s6749_s17  ;;  %s6757_s19 = sphi %s6838_s19, %s21_s19   ;;  %s6753_s18 = sphi %s6836_s18, %s8877_s18   ;;  %s6749_s17 = sphi %s6834_s17, %s8876_s17   ;;  %s6745_s16 = sphi %s6832_s16, %s8875_s16   ;;  %s6741_s15 = sphi %s6830_s15, %s8874_s15  }
   0x9   : > { %8740 = sst [smem:[#allocation5_spill]] %s6753_s18  ;;  %s33_s20 = sadd.s32 1, %s6753_s18 }
   0xa   : > { %8741 = sst [smem:[#allocation6_spill]] %s6757_s19  ;;  %p31_p0 = scmp.ge.s32.totalorder %s30_s0, 3 }
   0xb   : > { %p5386_p1 = scmp.ge.s32.totalorder %s6757_s19, 1  ;;  %p403_p2 = scmp.lt.s32.totalorder %s6757_s19, 7 }
   0xc   : > { %s8879_s0 = smov (%p31_p0, %s30_s0), 0  ;;  %s8881_s20 = smov (!%p31_p0, %s33_s20), %s6753_s18 }
   0xd   : > { %8742 = sst [smem:[#allocation7_spill]] %s8879_s0  ;;  %p404_p3 = pnand %p5386_p1, %p403_p2 }
   0xe   : > { %p35_p4 = scmp.ge.s32.totalorder %s8881_s20, 2 }
   0xf   : > { %407 = sbr.rel (%p404_p3) target bundleno = 1944 (0x798), region = 60 }
  0x10   : > { %s8883_s20 = smov (%p35_p4, %s8881_s20), 0 }
  0x11   : > { %8743 = sst [smem:[#allocation8_spill]] %s8883_s20 }
  0x14   : > { %p481_p5 = scmp.lt.s32.totalorder %s6745_s16, 1  ;;  %p524_p6 = scmp.lt.s32.totalorder %s6741_s15, 2 }
  0x15   : > { %s8744_s1 = sld [smem:[#allocation21_spill]]  ;;  %p5399_p7 = scmp.ne.s32.totalorder %s6741_s15, 0 }
  0x16   : > { %s8885_s16 = smov (!%p481_p5, %s6745_s16), 1  ;;  %s8745_s2 = sld [smem:[#allocation22_spill]] }
  0x17   : > { %s525_s21 = scalar_select %p524_p6, %s6741_s15, 2 }
  0x18   : > { %s5898_s22 = sshll.u32 %s8885_s16, 2  ;;  %s5951_s23 = smul.u32 9, %s8885_s16 }
  0x19   : > { %s5389_s27 = sshll.u32 %s8885_s16, 1  ;;  %s8746_s3 = sld [smem:[#allocation23_spill]] }
  0x1a   : > { %s5952_s14 = smul.u32 200, %s8885_s16  ;;  %s5899_s20 = sshll.u32 %s8885_s16, 4 }
  0x1b   : > { %s485_s26 = scalar_lea.vmem %s8744_s1, %s5898_s22  ;;  %s8747_s5 = sld [smem:[#allocation25_spill]] }
  0x1c   : > { %s6870_s30 = scalar_lea.vmem %s8745_s2, %s5951_s23  ;;  %s5953_s24 = smul.u32 25, %s8885_s16 }
  0x1d   : > { %s8748_s4 = sld [smem:[#allocation24_spill]]  ;;  %s6900_s0 = scalar_lea.vmem %s8714_s8, %s5952_s14 }
  0x1e   : > { %s8749_s7 = sld [smem:[#allocation26_spill]]  ;;  %s6895_s2 = scalar_lea.vmem %s8712_s6, %s5953_s24 }
  0x1f   : > { %s6875_s13 = scalar_lea.vmem %s8746_s3, %s5389_s27  ;;  %s6905_s22 = scalar_lea.vmem %s8715_s9, %s5899_s20 }
  0x20   : > { %s5397_s25 = sshll.u32 %s525_s21, 1 }
  0x21   : > { %s6880_s17 = scalar_lea.vmem %s8747_s5, %s5899_s20 }
  0x23   : > { %s6885_s1 = scalar_lea.vmem %s8748_s4, %s5952_s14  ;;  %s5954_s4 = smul.u32 6, %s8885_s16 }
  0x24   : > { %s6890_s29 = scalar_lea.vmem %s8749_s7, %s5389_s27  ;;  %535 = sbr.rel (%p5399_p7) target bundleno = 43 (0x2b), region = 64 }
  0x25   : > { %s528_s23 = sadd.s32 %s5954_s4, %s5397_s25 }
  0x26   : > { %s5398_s27 = sshll.u32 %s528_s23, 1 }
  0x27   : > { %s6910_s11 = scalar_lea.vmem %s8716_s10, %s5398_s27 }
  0x29   : > { %v536_v0 = vld [vmem:[%s485_s26] sm:$0xf] }
  0x2a   : > { %537 = vst [vmem:[#allocation2] sm:$0xf] %v536_v0 }
  0x2b PF: > { %s6759_s3 = smov 1   ;;  %s6760_s4 = smov 113   ;;  %v538_v26 = vlaneseq  ;;  %vm651_vm5 = vcmask 1040384   ;;  %vm647_vm6 = vcmask 15360   ;;  %v5402_v61 = vld [vmem:[%s6870_s30 + $0x1] sm:$0x1] }
  0x2c   : > { %s6761_s5 = smov 127   ;;  %s6762_s7 = smov 15  }
  0x2d   : > { %s6763_s15 = smov 16   ;;  %s6764_s16 = smov 2   ;;  %v6943_v27 = vand.u32 127, %v538_v26 }
  0x2e   : > { %s6765_s19 = smov 112   ;;  %s6766_s20 = smov 114  }
  0x2f   : > { %v540_v30 = vadd.s32 128, %v6943_v27  ;;  %v6952_v32 = vand.u32 15, %v6943_v27  ;;  %vm8729_vm0 = vcmp.lt.s32.totalorder %v6943_v27, 1  ;;  %vm8725_vm1 = vcmp.lt.s32.totalorder %v6943_v27, 16  ;;  %s6767_s21 = smov 126   ;;  %s6768_s26 = smov 14  }
  0x30   : > { %vm8730_vm2 = vcmp.lt.s32.totalorder %v6943_v27, 113  ;;  %vm8723_vm7 = vcmp.lt.s32.totalorder %v6943_v27, 127  ;;  %vm8722_vm8 = vcmp.lt.s32.totalorder %v6943_v27, 15  ;;  %s6769_s14 = smov 32   ;;  %vm1081_vm11 = vcmp.lt.s32.totalorder %v6943_v27, 2  ;;  %s6770_s24 = smov 96  }
  0x31   : > { %v6913_v1 = vld [vmem:[#allocation2] sm:$0xf]  ;;  %v6954_v33 = vand.u32 15, %v540_v30  ;;  %vm8728_vm3 = vcmp.lt.s32.totalorder %v6952_v32, 1  ;;  %vm8721_vm9 = vcmp.ge.s32.totalorder %v6952_v32, 15  ;;  %vm1093_vm12 = vcmp.lt.s32.totalorder %v6943_v27, 114 }
  0x32   : > { %8750 = vst [vmem:[#allocation9_spill] sm:$0xff] %v6913_v1  ;;  %vm1096_vm13 = vcmp.lt.s32.totalorder %v6952_v32, 2  ;;  %vm917_vm15 = vcmp.lt.s32.totalorder %v6943_v27, 112 }
  0x33   : > { %573 = vst [vmem:[#allocation1] ss:$4 sm:$0xff] %v6913_v1  ;;  %vm8727_vm4 = vcmp.lt.s32.totalorder %v6954_v33, 1  ;;  %vm8720_vm10 = vcmp.ge.s32.totalorder %v6954_v33, 15  ;;  %vm8731_vm14 = vcmp.lt.s32.totalorder %v6954_v33, 2 }
  0x3a   : > { %v574_v2 = vld.sshfl [vmem:[#allocation1] sm:$0xff pattern:$0x73625140]  ;;  %v575_v3 = vld.sshfl [vmem:[#allocation1 + $0x8] sm:$0xff pattern:$0x73625140] }
  0x3b   : > { %v6010_v4 = vpack.i.bf16 %v575_v3, %v574_v2  ;;  %585 = vst [vmem:[#allocation1] ss:$4 sm:$0xff] %v6913_v1 }
  0x3d   : > { %6011 = vrot.lane.b32.xlu0 %v6010_v4, %s6759_s3 }
  0x42   : > { %v586_v5 = vld.sshfl [vmem:[#allocation1] sm:$0xff pattern:$0x73625140]  ;;  %v587_v6 = vld.sshfl [vmem:[#allocation1 + $0x8] sm:$0xff pattern:$0x73625140] }
  0x43   : > { %v6015_v7 = vpack.i.bf16 %v587_v6, %v586_v5  ;;  %605 = vst [vmem:[#allocation1] ss:$4 sm:$0xff] %v6913_v1 }
  0x45   : > { %6016 = vrot.lane.b32.xlu0 %v6015_v7, %s6760_s4 }
  0x4a   : > { %v606_v8 = vld.sshfl [vmem:[#allocation1] sm:$0xff pattern:$0x73625140]  ;;  %v607_v9 = vld.sshfl [vmem:[#allocation1 + $0x8] sm:$0xff pattern:$0x73625140] }
  0x4b   : > { %v6020_v10 = vpack.i.bf16 %v607_v9, %v606_v8  ;;  %617 = vst [vmem:[#allocation1] ss:$4 sm:$0xff] %v6913_v1 }
  0x4d   : > { %6021 = vrot.lane.b32.xlu1 %v6020_v10, %s6761_s5 }
  0x52   : > { %v618_v11 = vld.sshfl [vmem:[#allocation1] sm:$0xff pattern:$0x73625140]  ;;  %v619_v12 = vld.sshfl [vmem:[#allocation1 + $0x8] sm:$0xff pattern:$0x73625140] }
  0x53   : > { %v6025_v13 = vpack.i.bf16 %v619_v12, %v618_v11  ;;  %686 = vst [vmem:[#allocation1] ss:$4 sm:$0xff] %v6913_v1 }
  0x55   : > { %6026 = vrot.lane.b32.xlu1 %v6025_v13, %s6762_s7 }
  0x5a   : > { %v687_v14 = vld.sshfl [vmem:[#allocation1] sm:$0xff pattern:$0x73625140]  ;;  %v688_v15 = vld.sshfl [vmem:[#allocation1 + $0x8] sm:$0xff pattern:$0x73625140] }
  0x5b   : > { %v6030_v16 = vpack.i.bf16 %v688_v15, %v687_v14  ;;  %828 = vst [vmem:[#allocation1] ss:$4 sm:$0xff] %v6913_v1 }
  0x5d   : > { %6031 = vrot.lane.b32.xlu2 %v6030_v16, %s6763_s15 }
  0x62   : > { %v6926_v17 = vld.sshfl [vmem:[#allocation1] sm:$0xff pattern:$0x73625140]  ;;  %v6928_v18 = vld.sshfl [vmem:[#allocation1 + $0x8] sm:$0xff pattern:$0x73625140] }
  0x63   : > { %961 = vst [vmem:[#allocation1] ss:$4 sm:$0xff] %v6913_v1 }
  0x6a   : > { %v6931_v19 = vld.sshfl [vmem:[#allocation1] sm:$0xff pattern:$0x73625140]  ;;  %v6933_v20 = vld.sshfl [vmem:[#allocation1 + $0x8] sm:$0xff pattern:$0x73625140] }
  0x6b   : > { %1072 = vst [vmem:[#allocation1] ss:$4 sm:$0xff] %v6913_v1 }
  0x72   : > { %v1073_v21 = vld.sshfl [vmem:[#allocation1] sm:$0xff pattern:$0x73625140]  ;;  %v1074_v22 = vld.sshfl [vmem:[#allocation1 + $0x8] sm:$0xff pattern:$0x73625140] }
  0x73   : > { %v6045_v23 = vpack.i.bf16 %v1074_v22, %v1073_v21  ;;  %1084 = vst [vmem:[#allocation1] ss:$4 sm:$0xff] %v6913_v1 }
  0x75   : > { %6046 = vrot.lane.b32.xlu1 %v6045_v23, %s6764_s16 }
  0x7a   : > { %v6938_v24 = vld.sshfl [vmem:[#allocation1] sm:$0xff pattern:$0x73625140]  ;;  %v6940_v25 = vld.sshfl [vmem:[#allocation1 + $0x8] sm:$0xff pattern:$0x73625140] }
  0x7b   : > { %1104 = vst [vmem:[#allocation1] ss:$4 sm:$0xff] %v6913_v1  ;;  %v6050_v2 = vpack.i.bf16 %v6940_v25, %v6938_v24  ;;  %v6055_v24 = vpack.i.bf16 %v6933_v20, %v6931_v19 }
  0x82   : > { %v6945_v28 = vld.sshfl [vmem:[#allocation1] sm:$0xff pattern:$0x73625140]  ;;  %v6947_v29 = vld.sshfl [vmem:[#allocation1 + $0x8] sm:$0xff pattern:$0x73625140] }
  0x83   : > { %1116 = vst [vmem:[#allocation1] ss:$4 sm:$0xff] %v6913_v1  ;;  %v6065_v14 = vpack.i.bf16 %v6947_v29, %v6945_v28 }
  0x8a   : > { %v6961_v38 = vld.sshfl [vmem:[#allocation1] sm:$0xff pattern:$0x73625140]  ;;  %v6963_v39 = vld.sshfl [vmem:[#allocation1 + $0x8] sm:$0xff pattern:$0x73625140] }
  0x8b   : > { %1250 = vst [vmem:[#allocation1] ss:$4 sm:$0xff] %v6913_v1  ;;  %v6070_v25 = vpack.i.bf16 %v6963_v39, %v6961_v38 }
  0x92   : > { %v1251_v63 = vld.sshfl [vmem:[#allocation1] sm:$0xff pattern:$0x73625140]  ;;  %v1252_v0 = vld.sshfl [vmem:[#allocation1 + $0x8] sm:$0xff pattern:$0x73625140] }
  0x93   : > { %2258 = vst [vmem:[#allocation1] ss:$4 sm:$0xff] %v6913_v1  ;;  %v6085_v26 = vpack.i.bf16 %v1252_v0, %v1251_v63 }
  0xaf   : > { %v6012_v31 = vpop.permute.xlu0 %6011 }
  0xb0   : > { %v6014_v34 = vunpack.i.h.bf16 %v6012_v31  ;;  %v6013_v35 = vunpack.i.l.bf16 %v6012_v31 }
  0xb2   : > { %v583_v44 = vsel %vm8729_vm0, %v6013_v35, %v6014_v34  ;;  %v584_v45 = vsel %vm8729_vm0, %v6014_v34, %v6013_v35 }
  0xb7   : > { %v6017_v36 = vpop.permute.xlu0 %6016  ;;  %v6032_v37 = vpop.permute.xlu2 %6031 }
  0xb8   : > { %v6019_v40 = vunpack.i.h.bf16 %v6017_v36  ;;  %v6018_v41 = vunpack.i.l.bf16 %v6017_v36  ;;  %v6034_v42 = vunpack.i.h.bf16 %v6032_v37  ;;  %v6033_v43 = vunpack.i.l.bf16 %v6032_v37 }
  0xba   : > { %v595_v46 = vsel %vm8730_vm2, %v6018_v41, %v6019_v40  ;;  %v596_v47 = vsel %vm8730_vm2, %v6019_v40, %v6018_v41  ;;  %v696_v48 = vsel %vm8725_vm1, %v6034_v42, %v6033_v43  ;;  %v695_v49 = vsel %vm8725_vm1, %v6033_v43, %v6034_v42  ;;  %v644_v40 = vld [vmem:[%s6870_s30] sm:$0x1] }
  0xbb   : > { %v603_v50 = vsel %vm8728_vm3, %v595_v46, %v584_v45  ;;  %v604_v51 = vsel %vm8727_vm4, %v596_v47, %v583_v44  ;;  %v699_v52 = vpack.c.bf16 %v696_v48, %v696_v48  ;;  %v700_v53 = vpack.c.bf16 %v695_v49, %v695_v49 }
  0xbc   : > { %v6982_v54 = vpack.i.bf16 %v604_v51, %v603_v50  ;;  %v787_v55 = vpack.c.bf16 %v603_v50, %v603_v50  ;;  %v788_v56 = vpack.c.bf16 %v604_v51, %v604_v51  ;;  %v2259_v51 = vld.sshfl [vmem:[#allocation1] sm:$0xff pattern:$0x73625140] }
  0xbd   : > { %v6985_v57 = vsel %vm651_vm5, %v699_v52, 0  ;;  %v6988_v58 = vsel %vm651_vm5, %v700_v53, 0  ;;  %v2260_v52 = vld.sshfl [vmem:[#allocation1 + $0x8] sm:$0xff pattern:$0x73625140] }
  0xbe   : > { %717 = vmatpush.bf16.msra.mxu2 %v6985_v57  ;;  %730 = vmatpush.bf16.msra.mxu3 %v6988_v58  ;;  %v6993_v59 = vsel %vm651_vm5, %v787_v55, 0  ;;  %v6996_v60 = vsel %vm651_vm5, %v788_v56, 0  ;;  %v6130_v53 = vpack.i.bf16 %v2260_v52, %v2259_v51  ;;  %v5408_v55 = vld [vmem:[%s6870_s30 + $0x3] sm:$0x1] }
  0xbf   : > { %6061 = vrot.lane.b32.xlu1 %v6982_v54, %s6765_s19  ;;  %6036 = vrot.lane.b32.xlu2 %v6982_v54, %s6763_s15  ;;  %v6022_v62 = vpop.permute.xlu1 %6021 }
  0xc0   : > { %v6024_v3 = vunpack.i.h.bf16 %v6022_v62  ;;  %v6023_v4 = vunpack.i.l.bf16 %v6022_v62 }
  0xc1   : > { %5403 = vmatmul.msk.bf16.vlgmr.msra.gmra.mxu2 %vm647_vm6, %v5402_v61  ;;  %5404 = vmatmul.msk.bf16.vlgmr.msra.gmra.mxu3 %vm647_vm6, %v5402_v61 }
  0xc2   : > { %805 = vmatpush.bf16.msrb.mxu2 %v6993_v59  ;;  %818 = vmatpush.bf16.msrb.mxu3 %v6996_v60  ;;  %v615_v6 = vsel %vm8723_vm7, %v6023_v4, %v6024_v3  ;;  %v616_v7 = vsel %vm8723_vm7, %v6024_v3, %v6023_v4  ;;  %v833_v3 = vpack.c.bf16 %v6926_v17, %v6926_v17  ;;  %vm8724_vm7 = vcmp.ge.s32.totalorder %v6954_v33, 14 }
  0xc3   : > { %v834_v4 = vpack.c.bf16 %v6928_v18, %v6928_v18 }
  0xc4   : > { %v7110_v17 = vsel %vm651_vm5, %v833_v3, 0  ;;  %v5420_v3 = vld [vmem:[%s6870_s30 + $0x7] sm:$0x1] }
  0xc5   : > { %v7113_v18 = vsel %vm651_vm5, %v834_v4, 0  ;;  %v5417_v4 = vld [vmem:[%s6870_s30 + $0x6] sm:$0x1] }
  0xc7   : > { %6051 = vrot.lane.b32.xlu2 %v6050_v2, %s6766_s20  ;;  %v6027_v5 = vpop.permute.xlu1 %6026 }
  0xc8   : > { %v6029_v8 = vunpack.i.h.bf16 %v6027_v5  ;;  %v6028_v9 = vunpack.i.l.bf16 %v6027_v5 }
  0xca   : > { %v627_v10 = vsel %vm8722_vm8, %v6028_v9, %v6029_v8  ;;  %v628_v11 = vsel %vm8722_vm8, %v6029_v8, %v6028_v9  ;;  %vm1128_vm8 = vcmp.ge.s32.totalorder %v6952_v32, 14 }
  0xcb   : > { %v635_v12 = vsel %vm8721_vm9, %v628_v11, %v615_v6  ;;  %v636_v13 = vsel %vm8720_vm10, %v627_v10, %v616_v7  ;;  %vm1113_vm10 = vcmp.lt.s32.totalorder %v6943_v27, 126  ;;  %vm1125_vm9 = vcmp.lt.s32.totalorder %v6943_v27, 14 }
  0xcc   : > { %v6040_v15 = vpack.i.bf16 %v636_v13, %v635_v12  ;;  %v874_v16 = vpack.c.bf16 %v635_v12, %v635_v12  ;;  %v875_v21 = vpack.c.bf16 %v636_v13, %v636_v13 }
  0xce   : > { %6041 = vrot.lane.b32.xlu0 %v6040_v15, %s6763_s15  ;;  %v7031_v22 = vsel %vm651_vm5, %v874_v16, 0  ;;  %v7034_v23 = vsel %vm651_vm5, %v875_v21, 0  ;;  %v5405_v16 = vld [vmem:[%s6870_s30 + $0x2] sm:$0x1] }
  0xcf   : > { %6066 = vrot.lane.b32.xlu2 %v6065_v14, %s6767_s21  ;;  %892 = vmatpush.bf16.msra.mxu2 %v7031_v22 }
  0xd0   : > { %905 = vmatpush.bf16.msra.mxu3 %v7034_v23 }
  0xd1   : > { %5409 = vmatmul.msk.bf16.vlgmr.msrb.gmra.mxu2 %vm647_vm6, %v5408_v55  ;;  %5410 = vmatmul.msk.bf16.vlgmr.msrb.gmra.mxu3 %vm647_vm6, %v5408_v55 }
  0xd6   : > { %6056 = vrot.lane.b32.xlu0 %v6055_v24, %s6765_s19 }
  0xd7   : > { %6081 = vrot.lane.b32.xlu2 %v6040_v15, %s6765_s19 }
  0xde   : > { %6071 = vrot.lane.b32.xlu0 %v6070_v25, %s6768_s26 }
  0xe6   : > { %6086 = vrot.lane.b32.xlu0 %v6085_v26, %s6769_s14 }
  0xe7   : > { %v6047_v20 = vpop.permute.xlu1 %6046 }
  0xe8   : > { %v6049_v36 = vunpack.i.h.bf16 %v6047_v20  ;;  %v6048_v37 = vunpack.i.l.bf16 %v6047_v20 }
  0xea   : > { %v1082_v42 = vsel %vm1081_vm11, %v6048_v37, %v6049_v36  ;;  %v1083_v43 = vsel %vm1081_vm11, %v6049_v36, %v6048_v37 }
  0xee   : > { %6101 = vrot.lane.b32.xlu0 %v6040_v15, %s6769_s14 }
 0x119   : > { %v6037_v28 = vpop.permute.xlu2 %6036 }
 0x11a   : > { %v6039_v29 = vunpack.i.h.bf16 %v6037_v28  ;;  %v6038_v19 = vunpack.i.l.bf16 %v6037_v28 }
 0x11c   : > { %v643_v30 = vsel %vm8725_vm1, %v6039_v29, %v6038_v19  ;;  %v642_v31 = vsel %vm8725_vm1, %v6038_v19, %v6039_v29 }
 0x11d   : > { %v645_v34 = vpack.c.bf16 %v643_v30, %v643_v30  ;;  %v646_v35 = vpack.c.bf16 %v642_v31, %v642_v31 }
 0x11f   : > { %v7053_v38 = vsel %vm651_vm5, %v645_v34, 0  ;;  %v7056_v39 = vsel %vm651_vm5, %v646_v35, 0 }
 0x120   : > { %665 = vmatpush.bf16.msra.mxu0 %v7053_v38  ;;  %678 = vmatpush.bf16.msra.mxu1 %v7056_v39 }
 0x121   : > { %v6052_v41 = vpop.permute.xlu2 %6051 }
 0x122   : > { %v6054_v44 = vunpack.i.h.bf16 %v6052_v41  ;;  %v6053_v45 = vunpack.i.l.bf16 %v6052_v41  ;;  %v5414_v41 = vld [vmem:[%s6870_s30 + $0x5] sm:$0x1] }
 0x123   : > { %5400 = vmatmul.msk.bf16.vlgmr.msra.gmra.mxu0 %vm647_vm6, %v644_v40  ;;  %5401 = vmatmul.msk.bf16.vlgmr.msra.gmra.mxu1 %vm647_vm6, %v644_v40 }
 0x124   : > { %v1094_v46 = vsel %vm1093_vm12, %v6053_v45, %v6054_v44  ;;  %v1095_v47 = vsel %vm1093_vm12, %v6054_v44, %v6053_v45  ;;  %5415 = vmatmul.msk.bf16.vlgmr.msra.gmra.mxu2 %vm647_vm6, %v5414_v41  ;;  %5416 = vmatmul.msk.bf16.vlgmr.msra.gmra.mxu3 %vm647_vm6, %v5414_v41 }
 0x125   : > { %v7077_v48 = vsel %vm1096_vm13, %v1094_v46, %v1083_v43  ;;  %v7081_v49 = vsel %vm8731_vm14, %v1095_v47, %v1082_v42 }
 0x126   : > { %v6115_v50 = vpack.i.bf16 %v7081_v49, %v7077_v48 }
 0x128   : > { %6116 = vrot.lane.b32.xlu0 %v6115_v50, %s6765_s19  ;;  %6076 = vrot.lane.b32.xlu1 %v6115_v50, %s6769_s14 }
 0x129   : > { %v6067_v5 = vpop.permute.xlu2 %6066 }
 0x12a   : > { %v6069_v31 = vunpack.i.h.bf16 %v6067_v5  ;;  %v6068_v34 = vunpack.i.l.bf16 %v6067_v5  ;;  %v5423_v5 = vld [vmem:[%s6870_s30 + $0x8] sm:$0x1] }
 0x12c   : > { %v1114_v43 = vsel %vm1113_vm10, %v6068_v34, %v6069_v31  ;;  %v1115_v44 = vsel %vm1113_vm10, %v6069_v31, %v6068_v34 }
 0x130   : > { %6131 = vrot.lane.b32.xlu0 %v6130_v53, %s6770_s24  ;;  %6091 = vrot.lane.b32.xlu1 %v6982_v54, %s6769_s14 }
 0x131   : > { %v6062_v56 = vpop.permute.xlu1 %6061  ;;  %v6082_v19 = vpop.permute.xlu2 %6081 }
 0x132   : > { %v6064_v61 = vunpack.i.h.bf16 %v6062_v56  ;;  %v6063_v62 = vunpack.i.l.bf16 %v6062_v56  ;;  %v6084_v37 = vunpack.i.h.bf16 %v6082_v19  ;;  %v6083_v40 = vunpack.i.l.bf16 %v6082_v19 }
 0x134   : > { %v918_v8 = vsel %vm917_vm15, %v6063_v62, %v6064_v61  ;;  %v919_v9 = vsel %vm917_vm15, %v6064_v61, %v6063_v62  ;;  %v1017_v51 = vsel %vm917_vm15, %v6083_v40, %v6084_v37  ;;  %v1018_v52 = vsel %vm917_vm15, %v6084_v37, %v6083_v40 }
 0x135   : > { %v922_v14 = vpack.c.bf16 %v918_v8, %v918_v8  ;;  %v1021_v61 = vpack.c.bf16 %v1017_v51, %v1017_v51  ;;  %v1022_v62 = vpack.c.bf16 %v1018_v52, %v1018_v52 }
 0x137   : > { %v7131_v26 = vsel %vm651_vm5, %v922_v14, 0 }
 0x138   : > { %6146 = vrot.lane.b32.xlu0 %v6040_v15, %s6770_s24  ;;  %6106 = vrot.lane.b32.xlu1 %v6115_v50, %s6763_s15  ;;  %v923_v15 = vpack.c.bf16 %v919_v9, %v919_v9  ;;  %v6771_v9 = vmov 0  }
 0x139   : > { %6150 = vset.pattern.permute.xlu1 %v6771_v9  ;;  %6151 = vset.pattern.permute.xlu2 %v6771_v9 }
 0x13a   : > { %v7134_v28 = vsel %vm651_vm5, %v923_v15, 0  ;;  %6432 = vset.pattern.permute.xlu0 %v6771_v9 }
 0x140   : > { %6121 = vrot.lane.b32.xlu1 %v6115_v50, %s6770_s24  ;;  %v6042_v63 = vpop.permute.xlu0 %6041 }
 0x141   : > { %v6044_v0 = vunpack.i.h.bf16 %v6042_v63  ;;  %v6043_v2 = vunpack.i.l.bf16 %v6042_v63  ;;  %v5411_v63 = vld [vmem:[%s6870_s30 + $0x4] sm:$0x1] }
 0x143   : > { %v743_v6 = vsel %vm8725_vm1, %v6044_v0, %v6043_v2  ;;  %v742_v7 = vsel %vm8725_vm1, %v6043_v2, %v6044_v0  ;;  %v7184_v0 = vsel %vm651_vm5, %v1021_v61, 0  ;;  %v7187_v2 = vsel %vm651_vm5, %v1022_v62, 0 }
 0x144   : > { %v746_v10 = vpack.c.bf16 %v743_v6, %v743_v6  ;;  %v747_v11 = vpack.c.bf16 %v742_v7, %v742_v7 }
 0x146   : > { %v7116_v12 = vsel %vm651_vm5, %v746_v10, 0  ;;  %v7119_v13 = vsel %vm651_vm5, %v747_v11, 0  ;;  %v1060_v10 = vld [vmem:[%s6880_s17] sm:$0xff] }
 0x147   : > { %764 = vmatpush.bf16.msrb.mxu0 %v7116_v12  ;;  %777 = vmatpush.bf16.msrb.mxu1 %v7119_v13 }
 0x148   : > { %6136 = vrot.lane.b32.xlu1 %v6982_v54, %s6770_s24  ;;  %v6057_v21 = vpop.permute.xlu0 %6056 }
 0x149   : > { %v6059_v24 = vunpack.i.h.bf16 %v6057_v21  ;;  %v6058_v25 = vunpack.i.l.bf16 %v6057_v21 }
 0x14a   : > { %5406 = vmatmul.msk.bf16.vlgmr.msrb.gmra.mxu0 %vm647_vm6, %v5405_v16  ;;  %5407 = vmatmul.msk.bf16.vlgmr.msrb.gmra.mxu1 %vm647_vm6, %v5405_v16 }
 0x14b   : > { %851 = vmatpush.bf16.msra.mxu0 %v7110_v17  ;;  %864 = vmatpush.bf16.msra.mxu1 %v7113_v18  ;;  %v970_v54 = vsel %vm917_vm15, %v6058_v25, %v6059_v24  ;;  %v971_v29 = vsel %vm917_vm15, %v6059_v24, %v6058_v25 }
 0x14c   : > { %v974_v20 = vpack.c.bf16 %v970_v54, %v970_v54  ;;  %v975_v30 = vpack.c.bf16 %v971_v29, %v971_v29 }
 0x14e   : > { %v7144_v35 = vsel %vm651_vm5, %v974_v20, 0  ;;  %v7147_v36 = vsel %vm651_vm5, %v975_v30, 0 }
 0x14f   : > { %940 = vmatpush.bf16.msrb.mxu0 %v7131_v26  ;;  %953 = vmatpush.bf16.msrb.mxu1 %v7134_v28 }
 0x150   : > { %992 = vmatpush.bf16.msrb.mxu2 %v7144_v35  ;;  %1005 = vmatpush.bf16.msrb.mxu3 %v7147_v36  ;;  %v6072_v42 = vpop.permute.xlu0 %6071 }
 0x151   : > { %v6074_v45 = vunpack.i.h.bf16 %v6072_v42  ;;  %v6073_v46 = vunpack.i.l.bf16 %v6072_v42  ;;  %1064 = vperm.xlu1 %6150, %v1060_v10  }
 0x153   : > { %v1126_v47 = vsel %vm1125_vm9, %v6073_v46, %v6074_v45  ;;  %v1127_v50 = vsel %vm1125_vm9, %v6074_v45, %v6073_v46  ;;  %5421 = vmatmul.msk.bf16.vlgmr.msrb.gmra.mxu2 %vm647_vm6, %v5420_v3  ;;  %5422 = vmatmul.msk.bf16.vlgmr.msrb.gmra.mxu3 %vm647_vm6, %v5420_v3 }
 0x154   : > { %v7171_v53 = vsel %vm1128_vm8, %v1127_v50, %v1114_v43  ;;  %v7175_v55 = vsel %vm8724_vm7, %v1126_v47, %v1115_v44  ;;  %vm8732_vm7 = vcmp.lt.s32.totalorder %v6943_v27, 32  ;;  %v5901_v43 = vld [vmem:[%s6885_s1] sm:$0xff] }
 0x155   : > { %v6095_v56 = vpack.i.bf16 %v7175_v55, %v7171_v53 }
 0x157   : > { %6096 = vrot.lane.b32.xlu2 %v6095_v56, %s6769_s14 }
 0x158   : > { %v6087_v6 = vpop.permute.xlu0 %6086 }
 0x159   : > { %v6089_v7 = vunpack.i.h.bf16 %v6087_v6  ;;  %v6088_v8 = vunpack.i.l.bf16 %v6087_v6 }
 0x15a   : > { %5412 = vmatmul.msk.bf16.vlgmr.msra.gmra.mxu0 %vm647_vm6, %v5411_v63  ;;  %5413 = vmatmul.msk.bf16.vlgmr.msra.gmra.mxu1 %vm647_vm6, %v5411_v63 }
 0x15b   : > { %1039 = vmatpush.bf16.msra.mxu0 %v7184_v0  ;;  %1052 = vmatpush.bf16.msra.mxu1 %v7187_v2  ;;  %v1260_v11 = vsel %vm8732_vm7, %v6089_v7, %v6088_v8  ;;  %v1259_v14 = vsel %vm8732_vm7, %v6088_v8, %v6089_v7 }
 0x15c   : > { %v1264_v25 = vpack.c.bf16 %v1260_v11, %v1260_v11  ;;  %v1265_v54 = vpack.c.bf16 %v1259_v14, %v1259_v14 }
 0x15e   : > { %v1275_v37 = vsel %vm651_vm5, %v1264_v25, 0  ;;  %v1278_v40 = vsel %vm651_vm5, %v1265_v54, 0  ;;  %v5903_v25 = vld [vmem:[%s6885_s1 + $0x10] sm:$0xff] }
 0x15f   : > { %6111 = vrot.lane.b32.xlu2 %v6095_v56, %s6763_s15 }
 0x160   : > { %v6102_v16 = vpop.permute.xlu0 %6101 }
 0x161   : > { %v6104_v20 = vunpack.i.h.bf16 %v6102_v16  ;;  %v6103_v30 = vunpack.i.l.bf16 %v6102_v16 }
 0x163   : > { %v1317_v45 = vsel %vm8732_vm7, %v6104_v20, %v6103_v30  ;;  %v1316_v46 = vsel %vm8732_vm7, %v6103_v30, %v6104_v20 }
 0x164   : > { %v1322_v61 = vpack.c.bf16 %v1316_v46, %v1316_v46  ;;  %v7262_v46 = vpop.f32.mrf.mxu2 }
 0x166   : > { %v1335_v7 = vsel %vm651_vm5, %v1322_v61, 0 }
 0x167   : > { %6126 = vrot.lane.b32.xlu2 %v6095_v56, %s6765_s19 }
 0x16a   : > { %5418 = vmatmul.msk.bf16.vlgmr.msrb.gmra.mxu0 %vm647_vm6, %v5417_v4  ;;  %5419 = vmatmul.msk.bf16.vlgmr.msrb.gmra.mxu1 %vm647_vm6, %v5417_v4 }
 0x16f   : > { %6141 = vrot.lane.b32.xlu2 %v6095_v56, %s6770_s24  ;;  %v1321_v56 = vpack.c.bf16 %v1317_v45, %v1317_v45 }
 0x171   : > { %v1332_v6 = vsel %vm651_vm5, %v1321_v56, 0 }
 0x17a   : > { %5424 = vmatmul.msk.bf16.vlgmr.msra.gmra.mxu0 %vm647_vm6, %v5423_v5  ;;  %5425 = vmatmul.msk.bf16.vlgmr.msra.gmra.mxu1 %vm647_vm6, %v5423_v5  ;;  %v5902_v5 = vld [vmem:[%s6885_s1 + $0x8] sm:$0xff] }
 0x19a   : > { %v6077_v15 = vpop.permute.xlu1 %6076 }
 0x19b   : > { %v6079_v21 = vunpack.i.h.bf16 %v6077_v15  ;;  %v6078_v24 = vunpack.i.l.bf16 %v6077_v15 }
 0x19d   : > { %v1142_v29 = vsel %vm8732_vm7, %v6079_v21, %v6078_v24  ;;  %v1141_v19 = vsel %vm8732_vm7, %v6078_v24, %v6079_v21 }
 0x19e   : > { %v1145_v31 = vpack.c.bf16 %v1142_v29, %v1142_v29  ;;  %v1146_v34 = vpack.c.bf16 %v1141_v19, %v1141_v19 }
 0x1a0   : > { %v1156_v41 = vsel %vm651_vm5, %v1145_v31, 0  ;;  %v1159_v42 = vsel %vm651_vm5, %v1146_v34, 0 }
 0x1a1   : > { %1168 = vmatpush.bf16.msra.mxu2 %v1156_v41  ;;  %1182 = vmatpush.bf16.msra.mxu3 %v1159_v42  ;;  %v7251_v41 = vpop.f32.mrf.mxu1 }
 0x1a2   : > { %v6092_v44 = vpop.permute.xlu1 %6091 }
 0x1a3   : > { %v6094_v47 = vunpack.i.h.bf16 %v6092_v44  ;;  %v6093_v50 = vunpack.i.l.bf16 %v6092_v44  ;;  %v5904_v44 = vld [vmem:[%s6885_s1 + $0x18] sm:$0xff] }
 0x1a4   : > { %5430 = vmatmul.msk.bf16.vlgmr.msra.gmra.mxu2 %vm647_vm6, %v5901_v43  ;;  %5431 = vmatmul.msk.bf16.vlgmr.msra.gmra.mxu3 %vm647_vm6, %v5901_v43 }
 0x1a5   : > { %1287 = vmatpush.bf16.msrb.mxu2 %v1275_v37  ;;  %1301 = vmatpush.bf16.msrb.mxu3 %v1278_v40  ;;  %v1198_v51 = vsel %vm8732_vm7, %v6094_v47, %v6093_v50  ;;  %v1197_v52 = vsel %vm8732_vm7, %v6093_v50, %v6094_v47  ;;  %v1061_v37 = vld [vmem:[%s6880_s17 + $0x8] sm:$0xff]  ;;  %v7249_v40 = vpop.f32.mrf.mxu0  ;;  %v7264_v47 = vpop.f32.mrf.mxu3 }
 0x1a6   : > { %v1202_v62 = vpack.c.bf16 %v1198_v51, %v1198_v51  ;;  %v1203_v63 = vpack.c.bf16 %v1197_v52, %v1197_v52  ;;  %1069 = vperm.xlu2 %6151, %v1061_v37   ;;  %v5905_v52 = vld [vmem:[%s6885_s1 + $0x20] sm:$0xff]  ;;  %v5910_v37 = vld [vmem:[%s6885_s1 + $0x48] sm:$0xff] }
 0x1a8   : > { %v1213_v3 = vsel %vm651_vm5, %v1202_v62, 0  ;;  %v1216_v4 = vsel %vm651_vm5, %v1203_v63, 0 }
 0x1a9   : > { %1225 = vmatpush.bf16.msrb.mxu0 %v1213_v3  ;;  %1239 = vmatpush.bf16.msrb.mxu1 %v1216_v4  ;;  %v682_v51 = vpop.f32.mrf.mxu1  ;;  %v5906_v3 = vld [vmem:[%s6885_s1 + $0x28] sm:$0xff] }
 0x1aa   : > { %v6107_v8 = vpop.permute.xlu1 %6106  ;;  %v1853_v51 = vpack.c.bf16 %v7175_v55, %v7175_v55 }
 0x1ab   : > { %v6109_v9 = vunpack.i.h.bf16 %v6107_v8  ;;  %v6108_v10 = vunpack.i.l.bf16 %v6107_v8 }
 0x1ac   : > { %5438 = vmatmul.msk.bf16.vlgmr.msrb.gmra.mxu0 %vm647_vm6, %v5902_v5  ;;  %5439 = vmatmul.msk.bf16.vlgmr.msrb.gmra.mxu1 %vm647_vm6, %v5902_v5 }
 0x1ad   : > { %1344 = vmatpush.bf16.msra.mxu0 %v1332_v6  ;;  %1358 = vmatpush.bf16.msra.mxu1 %v1335_v7  ;;  %v1431_v11 = vsel %vm8725_vm1, %v6109_v9, %v6108_v10  ;;  %v1430_v14 = vsel %vm8725_vm1, %v6108_v10, %v6109_v9  ;;  %v669_v50 = vpop.f32.mrf.mxu0  ;;  %v734_v61 = vpop.f32.mrf.mxu3  ;;  %v5907_v10 = vld [vmem:[%s6885_s1 + $0x30] sm:$0xff] }
 0x1ae   : > { %v1435_v15 = vpack.c.bf16 %v1431_v11, %v1431_v11  ;;  %v1436_v16 = vpack.c.bf16 %v1430_v14, %v1430_v14  ;;  %v1672_v11 = vpack.c.bf16 %v7077_v48, %v7077_v48  ;;  %v1673_v14 = vpack.c.bf16 %v7081_v49, %v7081_v49  ;;  %v5908_v48 = vld [vmem:[%s6885_s1 + $0x38] sm:$0xff] }
 0x1af   : > { %v1852_v50 = vpack.c.bf16 %v7171_v53, %v7171_v53 }
 0x1b0   : > { %v1446_v21 = vsel %vm651_vm5, %v1435_v15, 0  ;;  %v1449_v24 = vsel %vm651_vm5, %v1436_v16, 0  ;;  %v1683_v15 = vsel %vm651_vm5, %v1672_v11, 0  ;;  %v1686_v16 = vsel %vm651_vm5, %v1673_v14, 0  ;;  %v5915_v14 = vld [vmem:[%s6885_s1 + $0x70] sm:$0xff] }
 0x1b1   : > { %1458 = vmatpush.bf16.msrb.mxu0 %v1446_v21  ;;  %1472 = vmatpush.bf16.msrb.mxu1 %v1449_v24  ;;  %v6097_v54 = vpop.permute.xlu2 %6096 }
 0x1b2   : > { %v6099_v29 = vunpack.i.h.bf16 %v6097_v54  ;;  %v6098_v19 = vunpack.i.l.bf16 %v6097_v54 }
 0x1b4   : > { %5446 = vmatmul.msk.bf16.vlgmr.msrb.gmra.mxu2 %vm647_vm6, %v5903_v25  ;;  %5447 = vmatmul.msk.bf16.vlgmr.msrb.gmra.mxu3 %vm647_vm6, %v5903_v25  ;;  %v1374_v20 = vsel %vm8732_vm7, %v6099_v29, %v6098_v19  ;;  %v1373_v30 = vsel %vm8732_vm7, %v6098_v19, %v6099_v29 }
 0x1b5   : > { %v1378_v31 = vpack.c.bf16 %v1374_v20, %v1374_v20  ;;  %v1379_v34 = vpack.c.bf16 %v1373_v30, %v1373_v30  ;;  %v7286_v7 = vpop.f32.mrf.mxu3  ;;  %v5909_v30 = vld [vmem:[%s6885_s1 + $0x40] sm:$0xff] }
 0x1b6   : > { %8751 = vst [vmem:[#allocation10_spill] sm:$0xff] %v7286_v7 }
 0x1b7   : > { %v1389_v42 = vsel %vm651_vm5, %v1378_v31, 0  ;;  %v1392_v43 = vsel %vm651_vm5, %v1379_v34, 0 }
 0x1b8   : > { %1401 = vmatpush.bf16.msra.mxu2 %v1389_v42  ;;  %1415 = vmatpush.bf16.msra.mxu3 %v1392_v43 }
 0x1b9   : > { %v6112_v45 = vpop.permute.xlu2 %6111 }
 0x1ba   : > { %v6113_v56 = vunpack.i.l.bf16 %v6112_v45 }
 0x1bc   : > { %1501 = vmatpush.bf16.msrb.mxu2 %v7053_v38  ;;  %1515 = vmatpush.bf16.msrb.mxu3 %v7056_v39  ;;  %v6114_v38 = vunpack.i.h.bf16 %v6112_v45  ;;  %v721_v39 = vpop.f32.mrf.mxu2  ;;  %v5911_v45 = vld [vmem:[%s6885_s1 + $0x50] sm:$0xff] }
 0x1bd   : > { %5454 = vmatmul.msk.bf16.vlgmr.msra.gmra.mxu0 %vm647_vm6, %v5904_v44  ;;  %5455 = vmatmul.msk.bf16.vlgmr.msra.gmra.mxu1 %vm647_vm6, %v5904_v44  ;;  %v822_v24 = vpop.f32.mrf.mxu3 }
 0x1be   : > { %1544 = vmatpush.bf16.msra.mxu0 %v6985_v57  ;;  %1558 = vmatpush.bf16.msra.mxu1 %v6988_v58  ;;  %v1617_v57 = vsel %vm8725_vm1, %v6114_v38, %v6113_v56  ;;  %v1616_v58 = vsel %vm8725_vm1, %v6113_v56, %v6114_v38  ;;  %vm2147_vm1 = vcmp.lt.s32.totalorder %v6943_v27, 96 }
 0x1bf   : > { %v1621_v4 = vpack.c.bf16 %v1617_v57, %v1617_v57  ;;  %v1622_v5 = vpack.c.bf16 %v1616_v58, %v1616_v58  ;;  %v5912_v58 = vld [vmem:[%s6885_s1 + $0x58] sm:$0xff] }
 0x1c1   : > { %v6127_v11 = vpop.permute.xlu2 %6126 }
 0x1c4   : > { %5462 = vmatmul.msk.bf16.vlgmr.msra.gmra.mxu2 %vm647_vm6, %v5905_v52  ;;  %5463 = vmatmul.msk.bf16.vlgmr.msra.gmra.mxu3 %vm647_vm6, %v5905_v52  ;;  %v7284_v6 = vpop.f32.mrf.mxu2 }
 0x1c5   : > { %1587 = vmatpush.bf16.msra.mxu2 %v7116_v12  ;;  %1601 = vmatpush.bf16.msra.mxu3 %v7119_v13  ;;  %v1632_v12 = vsel %vm651_vm5, %v1621_v4, 0  ;;  %v1635_v13 = vsel %vm651_vm5, %v1622_v5, 0  ;;  %v7308_v29 = vpop.f32.mrf.mxu3 }
 0x1c6   : > { %8755 = vst [vmem:[#allocation14_spill] sm:$0xff] %v7308_v29 }
 0x1c7   : > { %v7275_v62 = vpop.f32.mrf.mxu0  ;;  %v7277_v63 = vpop.f32.mrf.mxu1 }
 0x1cc   : > { %v809_v21 = vpop.f32.mrf.mxu2 }
 0x1cd   : > { %5470 = vmatmul.msk.bf16.vlgmr.msrb.gmra.mxu0 %vm647_vm6, %v5906_v3  ;;  %5471 = vmatmul.msk.bf16.vlgmr.msrb.gmra.mxu1 %vm647_vm6, %v5906_v3  ;;  %v6122_v21 = vpop.permute.xlu1 %6121 }
 0x1ce   : > { %1644 = vmatpush.bf16.msrb.mxu0 %v1632_v12  ;;  %1658 = vmatpush.bf16.msrb.mxu1 %v1635_v13  ;;  %v5913_v13 = vld [vmem:[%s6885_s1 + $0x60] sm:$0xff] }
 0x1cf   : > { %v768_v8 = vpop.f32.mrf.mxu0  ;;  %v781_v9 = vpop.f32.mrf.mxu1 }
 0x1d4   : > { %5478 = vmatmul.msk.bf16.vlgmr.msrb.gmra.mxu2 %vm647_vm6, %v5907_v10  ;;  %5479 = vmatmul.msk.bf16.vlgmr.msrb.gmra.mxu3 %vm647_vm6, %v5907_v10  ;;  %v7306_v49 = vpop.f32.mrf.mxu2  ;;  %v5914_v10 = vld [vmem:[%s6885_s1 + $0x68] sm:$0xff] }
 0x1d5   : > { %1695 = vmatpush.bf16.msrb.mxu2 %v1683_v15  ;;  %1709 = vmatpush.bf16.msrb.mxu3 %v1686_v16  ;;  %8754 = vst [vmem:[#allocation13_spill] sm:$0xff] %v7306_v49  ;;  %v6129_v15 = vunpack.i.h.bf16 %v6127_v11  ;;  %v6128_v16 = vunpack.i.l.bf16 %v6127_v11 }
 0x1d7   : > { %v7297_v25 = vpop.f32.mrf.mxu0  ;;  %v7299_v54 = vpop.f32.mrf.mxu1 }
 0x1d8   : > { %8752 = vst [vmem:[#allocation11_spill] sm:$0xff] %v7297_v25 }
 0x1d9   : > { %8753 = vst [vmem:[#allocation12_spill] sm:$0xff] %v7299_v54 }
 0x1dc   : > { %v896_v31 = vpop.f32.mrf.mxu2 }
 0x1dd   : > { %5486 = vmatmul.msk.bf16.vlgmr.msra.gmra.mxu0 %vm647_vm6, %v5908_v48  ;;  %5487 = vmatmul.msk.bf16.vlgmr.msra.gmra.mxu1 %vm647_vm6, %v5908_v48  ;;  %v6124_v48 = vunpack.i.h.bf16 %v6122_v21 }
 0x1de   : > { %1738 = vmatpush.bf16.msra.mxu0 %v6993_v59  ;;  %1752 = vmatpush.bf16.msra.mxu1 %v6996_v60  ;;  %v909_v59 = vpop.f32.mrf.mxu3 }
 0x1df   : > { %v855_v19 = vpop.f32.mrf.mxu0  ;;  %v868_v20 = vpop.f32.mrf.mxu1  ;;  %v5917_v59 = vld [vmem:[%s6885_s1 + $0x80] sm:$0xff] }
 0x1e0   : > { %v6123_v19 = vunpack.i.l.bf16 %v6122_v21  ;;  %v6137_v20 = vpop.permute.xlu1 %6136 }
 0x1e2   : > { %v2149_v31 = vsel %vm2147_vm1, %v6124_v48, %v6123_v19 }
 0x1e4   : > { %5494 = vmatmul.msk.bf16.vlgmr.msra.gmra.mxu2 %vm647_vm6, %v5909_v30  ;;  %5495 = vmatmul.msk.bf16.vlgmr.msra.gmra.mxu3 %vm647_vm6, %v5909_v30  ;;  %v7324_v42 = vpop.f32.mrf.mxu2  ;;  %v2148_v30 = vsel %vm2147_vm1, %v6123_v19, %v6124_v48 }
 0x1e5   : > { %1781 = vmatpush.bf16.msra.mxu2 %v7110_v17  ;;  %1795 = vmatpush.bf16.msra.mxu3 %v7113_v18  ;;  %8758 = vst [vmem:[#allocation17_spill] sm:$0xff] %v7324_v42  ;;  %v6117_v18 = vpop.permute.xlu0 %6116 }
 0x1e6   : > { %v7326_v17 = vpop.f32.mrf.mxu3  ;;  %v6119_v52 = vunpack.i.h.bf16 %v6117_v18  ;;  %v6118_v38 = vunpack.i.l.bf16 %v6117_v18  ;;  %v2154_v18 = vpack.c.bf16 %v2149_v31, %v2149_v31 }
 0x1e7   : > { %v7315_v34 = vpop.f32.mrf.mxu0  ;;  %v7317_v60 = vpop.f32.mrf.mxu1  ;;  %8759 = vst [vmem:[#allocation18_spill] sm:$0xff] %v7326_v17 }
 0x1e8   : > { %8756 = vst [vmem:[#allocation15_spill] sm:$0xff] %v7315_v34  ;;  %v1904_v56 = vsel %vm917_vm15, %v6118_v38, %v6119_v52  ;;  %v1905_v53 = vsel %vm917_vm15, %v6119_v52, %v6118_v38  ;;  %v1065_v52 = vpop.permute.xlu1 %1064 }
 0x1e9   : > { %8757 = vst [vmem:[#allocation16_spill] sm:$0xff] %v7317_v60  ;;  %v1909_v39 = vpack.c.bf16 %v1904_v56, %v1904_v56  ;;  %v1910_v61 = vpack.c.bf16 %v1905_v53, %v1905_v53 }
 0x1eb   : > { %v1920_v5 = vsel %vm651_vm5, %v1909_v39, 0  ;;  %v1923_v12 = vsel %vm651_vm5, %v1910_v61, 0  ;;  %v5918_v39 = vld [vmem:[%s6885_s1 + $0x88] sm:$0xff] }
 0x1ec   : > { %v996_v55 = vpop.f32.mrf.mxu2 }
 0x1ed   : > { %5502 = vmatmul.msk.bf16.vlgmr.msrb.gmra.mxu0 %vm647_vm6, %v5910_v37  ;;  %5503 = vmatmul.msk.bf16.vlgmr.msrb.gmra.mxu1 %vm647_vm6, %v5910_v37  ;;  %v2153_v37 = vpack.c.bf16 %v2148_v30, %v2148_v30 }
 0x1ee   : > { %1824 = vmatpush.bf16.msrb.mxu0 %v7031_v22  ;;  %1838 = vmatpush.bf16.msrb.mxu1 %v7034_v23  ;;  %v1863_v22 = vsel %vm651_vm5, %v1852_v50, 0  ;;  %v1866_v23 = vsel %vm651_vm5, %v1853_v51, 0  ;;  %v1009_v57 = vpop.f32.mrf.mxu3  ;;  %v2167_v51 = vsel %vm651_vm5, %v2154_v18, 0 }
 0x1ef   : > { %v944_v43 = vpop.f32.mrf.mxu0  ;;  %v957_v44 = vpop.f32.mrf.mxu1  ;;  %v2164_v50 = vsel %vm651_vm5, %v2153_v37, 0 }
 0x1f0   : > { %v6139_v43 = vunpack.i.h.bf16 %v6137_v20  ;;  %v6138_v44 = vunpack.i.l.bf16 %v6137_v20 }
 0x1f2   : > { %v2205_v38 = vsel %vm2147_vm1, %v6138_v44, %v6139_v43 }
 0x1f3   : > { %v2210_v61 = vpack.c.bf16 %v2205_v38, %v2205_v38 }
 0x1f4   : > { %5510 = vmatmul.msk.bf16.vlgmr.msrb.gmra.mxu2 %vm647_vm6, %v5911_v45  ;;  %5511 = vmatmul.msk.bf16.vlgmr.msrb.gmra.mxu3 %vm647_vm6, %v5911_v45  ;;  %v6132_v45 = vpop.permute.xlu0 %6131 }
 0x1f5   : > { %1875 = vmatpush.bf16.msrb.mxu2 %v1863_v22  ;;  %1889 = vmatpush.bf16.msrb.mxu3 %v1866_v23  ;;  %v2206_v22 = vsel %vm2147_vm1, %v6139_v43, %v6138_v44  ;;  %v6134_v23 = vunpack.i.h.bf16 %v6132_v45  ;;  %v6133_v56 = vunpack.i.l.bf16 %v6132_v45  ;;  %v5920_v45 = vld [vmem:[%s6885_s1 + $0x98] sm:$0xff] }
 0x1f7   : > { %v7342_v3 = vpop.f32.mrf.mxu0  ;;  %v7344_v4 = vpop.f32.mrf.mxu1  ;;  %v2268_v11 = vsel %vm2147_vm1, %v6134_v23, %v6133_v56 }
 0x1f8   : > { %8760 = vst [vmem:[#allocation19_spill] sm:$0xff] %v7342_v3 }
 0x1f9   : > { %8761 = vst [vmem:[#allocation20_spill] sm:$0xff] %v7344_v4 }
 0x1fd   : > { %5518 = vmatmul.msk.bf16.vlgmr.msra.gmra.mxu0 %vm647_vm6, %v5912_v58  ;;  %5519 = vmatmul.msk.bf16.vlgmr.msra.gmra.mxu1 %vm647_vm6, %v5912_v58 }
 0x1fe   : > { %1932 = vmatpush.bf16.msra.mxu0 %v1920_v5  ;;  %1946 = vmatpush.bf16.msra.mxu1 %v1923_v12  ;;  %v2211_v5 = vpack.c.bf16 %v2206_v22, %v2206_v22 }
 0x1ff   : > { %v1043_v8 = vpop.f32.mrf.mxu0  ;;  %v1056_v9 = vpop.f32.mrf.mxu1 }
 0x204   : > { %5526 = vmatmul.msk.bf16.vlgmr.msra.gmra.mxu2 %vm647_vm6, %v5913_v13  ;;  %5527 = vmatmul.msk.bf16.vlgmr.msra.gmra.mxu3 %vm647_vm6, %v5913_v13 }
 0x205   : > { %1975 = vmatpush.bf16.msra.mxu2 %v7131_v26  ;;  %1989 = vmatpush.bf16.msra.mxu3 %v7134_v28  ;;  %v2090_v26 = vsel %vm917_vm15, %v6128_v16, %v6129_v15  ;;  %v2091_v28 = vsel %vm917_vm15, %v6129_v15, %v6128_v16  ;;  %v2224_v15 = vsel %vm651_vm5, %v2211_v5, 0  ;;  %v6147_v16 = vpop.permute.xlu0 %6146 }
 0x206   : > { %v2096_v24 = vpack.c.bf16 %v2091_v28, %v2091_v28  ;;  %v6148_v48 = vunpack.i.l.bf16 %v6147_v16 }
 0x20d   : > { %5534 = vmatmul.msk.bf16.vlgmr.msrb.gmra.mxu0 %vm647_vm6, %v5914_v10  ;;  %5535 = vmatmul.msk.bf16.vlgmr.msrb.gmra.mxu1 %vm647_vm6, %v5914_v10  ;;  %v2267_v10 = vsel %vm2147_vm1, %v6133_v56, %v6134_v23 }
 0x20e   : > { %2018 = vmatpush.bf16.msrb.mxu0 %v7144_v35  ;;  %2032 = vmatpush.bf16.msrb.mxu1 %v7147_v36  ;;  %v5916_v35 = vld [vmem:[%s6885_s1 + $0x78] sm:$0xff]  ;;  %v2095_v36 = vpack.c.bf16 %v2090_v26, %v2090_v26  ;;  %v2272_v21 = vpack.c.bf16 %v2267_v10, %v2267_v10  ;;  %v2273_v26 = vpack.c.bf16 %v2268_v11, %v2268_v11 }
 0x210   : > { %v2286_v20 = vsel %vm651_vm5, %v2273_v26, 0 }
 0x214   : > { %5542 = vmatmul.msk.bf16.vlgmr.msrb.gmra.mxu2 %vm647_vm6, %v5915_v14  ;;  %5543 = vmatmul.msk.bf16.vlgmr.msrb.gmra.mxu3 %vm647_vm6, %v5915_v14  ;;  %v2221_v14 = vsel %vm651_vm5, %v2210_v61, 0 }
 0x215   : > { %2061 = vmatpush.bf16.msrb.mxu2 %v7184_v0  ;;  %2075 = vmatpush.bf16.msrb.mxu3 %v7187_v2  ;;  %v2106_v0 = vsel %vm651_vm5, %v2095_v36, 0  ;;  %v2109_v2 = vsel %vm651_vm5, %v2096_v24, 0  ;;  %v5919_v36 = vld [vmem:[%s6885_s1 + $0x90] sm:$0xff]  ;;  %v6149_v24 = vunpack.i.h.bf16 %v6147_v16 }
 0x217   : > { %v2324_v30 = vsel %vm2147_vm1, %v6148_v48, %v6149_v24  ;;  %v2325_v31 = vsel %vm2147_vm1, %v6149_v24, %v6148_v48 }
 0x21d   : > { %5550 = vmatmul.msk.bf16.vlgmr.msra.gmra.mxu0 %vm647_vm6, %v5916_v35  ;;  %5551 = vmatmul.msk.bf16.vlgmr.msra.gmra.mxu1 %vm647_vm6, %v5916_v35 }
 0x21e   : > { %2118 = vmatpush.bf16.msra.mxu0 %v2106_v0  ;;  %2132 = vmatpush.bf16.msra.mxu1 %v2109_v2  ;;  %v2283_v2 = vsel %vm651_vm5, %v2272_v21, 0 }
 0x224   : > { %5558 = vmatmul.msk.bf16.vlgmr.msra.gmra.mxu2 %vm647_vm6, %v5917_v59  ;;  %5559 = vmatmul.msk.bf16.vlgmr.msra.gmra.mxu3 %vm647_vm6, %v5917_v59  ;;  %v6142_v59 = vpop.permute.xlu2 %6141 }
 0x225   : > { %2176 = vmatpush.bf16.msra.mxu2 %v2164_v50  ;;  %2190 = vmatpush.bf16.msra.mxu3 %v2167_v51  ;;  %v2329_v50 = vpack.c.bf16 %v2324_v30, %v2324_v30  ;;  %v2330_v51 = vpack.c.bf16 %v2325_v31, %v2325_v31  ;;  %v6143_v38 = vunpack.i.l.bf16 %v6142_v59 }
 0x227   : > { %v1170_v53 = vpop.f32.mrf.mxu2  ;;  %v1184_v55 = vpop.f32.mrf.mxu3 }
 0x228   : > { %v1189_v57 = vadd.f32 %v1170_v53, %v1065_v52  ;;  %v1190_v58 = vadd.f32 %v1184_v55, %v1065_v52  ;;  %v6144_v52 = vunpack.i.h.bf16 %v6142_v59  ;;  %v2340_v55 = vsel %vm651_vm5, %v2329_v50, 0  ;;  %v5923_v59 = vld [vmem:[%s6885_s1 + $0xb0] sm:$0xff] }
 0x229   : > { %v1227_v12 = vpop.f32.mrf.mxu0  ;;  %v1241_v13 = vpop.f32.mrf.mxu1 }
 0x22a   : > { %v1246_v8 = vadd.f32 %v1227_v12, %v1189_v57  ;;  %v1247_v9 = vadd.f32 %v1241_v13, %v1190_v58  ;;  %v2343_v57 = vsel %vm651_vm5, %v2330_v51, 0  ;;  %v2381_v58 = vsel %vm2147_vm1, %v6143_v38, %v6144_v52  ;;  %v5921_v12 = vld [vmem:[%s6885_s1 + $0xa0] sm:$0xff]  ;;  %v5924_v51 = vld [vmem:[%s6885_s1 + $0xb8] sm:$0xff] }
 0x22b   : > { %v2386_v13 = vpack.c.bf16 %v2381_v58, %v2381_v58 }
 0x22d   : > { %5566 = vmatmul.msk.bf16.vlgmr.msrb.gmra.mxu0 %vm647_vm6, %v5918_v39  ;;  %5567 = vmatmul.msk.bf16.vlgmr.msrb.gmra.mxu1 %vm647_vm6, %v5918_v39  ;;  %v2382_v39 = vsel %vm2147_vm1, %v6144_v52, %v6143_v38  ;;  %v2397_v11 = vsel %vm651_vm5, %v2386_v13, 0 }
 0x22e   : > { %2233 = vmatpush.bf16.msrb.mxu0 %v2221_v14  ;;  %2247 = vmatpush.bf16.msrb.mxu1 %v2224_v15 }
 0x22f   : > { %v7397_v28 = vpop.f32.mrf.mxu2  ;;  %v7399_v35 = vpop.f32.mrf.mxu3 }
 0x231   : > { %v7402_v19 = vpop.f32.mrf.mxu0  ;;  %v7404_v0 = vpop.f32.mrf.mxu1 }
 0x234   : > { %5574 = vmatmul.msk.bf16.vlgmr.msrb.gmra.mxu2 %vm647_vm6, %v5919_v36  ;;  %5575 = vmatmul.msk.bf16.vlgmr.msrb.gmra.mxu3 %vm647_vm6, %v5919_v36  ;;  %v5922_v36 = vld [vmem:[%s6885_s1 + $0xa8] sm:$0xff] }
 0x235   : > { %2295 = vmatpush.bf16.msrb.mxu2 %v2283_v2  ;;  %2309 = vmatpush.bf16.msrb.mxu3 %v2286_v20 }
 0x237   : > { %v1289_v37 = vpop.f32.mrf.mxu2  ;;  %v1303_v18 = vpop.f32.mrf.mxu3 }
 0x238   : > { %v1308_v43 = vadd.f32 %v1289_v37, %v1246_v8  ;;  %v1309_v44 = vadd.f32 %v1303_v18, %v1247_v9  ;;  %v2387_v8 = vpack.c.bf16 %v2382_v39, %v2382_v39 }
 0x23a   : > { %v1346_v22 = vpop.f32.mrf.mxu0  ;;  %v1360_v23 = vpop.f32.mrf.mxu1  ;;  %v2400_v14 = vsel %vm651_vm5, %v2387_v8, 0  ;;  %vm8762_vm5 = vcmp.lt.s32.totalorder %v6943_v27, 127 }
 0x23b   : > { %v1365_v56 = vadd.f32 %v1346_v22, %v1308_v43  ;;  %v1366_v53 = vadd.f32 %v1360_v23, %v1309_v44 }
 0x23d   : > { %5582 = vmatmul.msk.bf16.vlgmr.msra.gmra.mxu0 %vm647_vm6, %v5920_v45  ;;  %5583 = vmatmul.msk.bf16.vlgmr.msra.gmra.mxu1 %vm647_vm6, %v5920_v45 }
 0x23e   : > { %2352 = vmatpush.bf16.msra.mxu0 %v2340_v55  ;;  %2366 = vmatpush.bf16.msra.mxu1 %v2343_v57  ;;  %v5925_v55 = vld [vmem:[%s6885_s1 + $0xc0] sm:$0xff]  ;;  %s5165_s1 = sld [smem:[#allocation3]] }
 0x23f   : > { %v7423_v61 = vpop.f32.mrf.mxu2  ;;  %v7425_v5 = vpop.f32.mrf.mxu3 }
 0x242   : > { %v7428_v9 = vpop.f32.mrf.mxu0  ;;  %v7430_v10 = vpop.f32.mrf.mxu1 }
 0x244   : > { %5590 = vmatmul.msk.bf16.vlgmr.msra.gmra.mxu2 %vm647_vm6, %v5921_v12  ;;  %5591 = vmatmul.msk.bf16.vlgmr.msra.gmra.mxu3 %vm647_vm6, %v5921_v12 }
 0x245   : > { %2409 = vmatpush.bf16.msra.mxu2 %v2397_v11  ;;  %2423 = vmatpush.bf16.msra.mxu3 %v2400_v14 }
 0x247   : > { %v1403_v15 = vpop.f32.mrf.mxu2  ;;  %v1417_v16 = vpop.f32.mrf.mxu3 }
 0x248   : > { %v1422_v21 = vadd.f32 %v1403_v15, %v1365_v56  ;;  %v1423_v26 = vadd.f32 %v1417_v16, %v1366_v53 }
 0x24a   : > { %v1460_v24 = vpop.f32.mrf.mxu0  ;;  %v1474_v48 = vpop.f32.mrf.mxu1 }
 0x24b   : > { %v1479_v2 = vadd.f32 %v1460_v24, %v1422_v21  ;;  %v1480_v20 = vadd.f32 %v1474_v48, %v1423_v26 }
 0x24d   : > { %5598 = vmatmul.msk.bf16.vlgmr.msrb.gmra.mxu0 %vm647_vm6, %v5922_v36  ;;  %5599 = vmatmul.msk.bf16.vlgmr.msrb.gmra.mxu1 %vm647_vm6, %v5922_v36 }
 0x24f   : > { %v7439_v30 = vpop.f32.mrf.mxu2  ;;  %v7441_v31 = vpop.f32.mrf.mxu3 }
 0x252   : > { %v7444_v37 = vpop.f32.mrf.mxu0  ;;  %v7446_v18 = vpop.f32.mrf.mxu1 }
 0x254   : > { %5606 = vmatmul.msk.bf16.vlgmr.msrb.gmra.mxu2 %vm647_vm6, %v5923_v59  ;;  %5607 = vmatmul.msk.bf16.vlgmr.msrb.gmra.mxu3 %vm647_vm6, %v5923_v59 }
 0x257   : > { %v1503_v43 = vpop.f32.mrf.mxu2  ;;  %v1517_v44 = vpop.f32.mrf.mxu3 }
 0x258   : > { %v1522_v45 = vadd.f32 %v1503_v43, %v1479_v2  ;;  %v1523_v50 = vadd.f32 %v1517_v44, %v1480_v20 }
 0x25a   : > { %v1546_v52 = vpop.f32.mrf.mxu0  ;;  %v1560_v38 = vpop.f32.mrf.mxu1 }
 0x25b   : > { %v1565_v22 = vadd.f32 %v1546_v52, %v1522_v45  ;;  %v1566_v23 = vadd.f32 %v1560_v38, %v1523_v50 }
 0x25d   : > { %5614 = vmatmul.msk.bf16.vlgmr.msra.gmra.mxu0 %vm647_vm6, %v5924_v51  ;;  %5615 = vmatmul.msk.bf16.vlgmr.msra.gmra.mxu1 %vm647_vm6, %v5924_v51 }
 0x25f   : > { %v7453_v56 = vpop.f32.mrf.mxu2  ;;  %v7455_v53 = vpop.f32.mrf.mxu3 }
 0x262   : > { %v7458_v57 = vpop.f32.mrf.mxu0  ;;  %v7460_v58 = vpop.f32.mrf.mxu1 }
 0x264   : > { %5622 = vmatmul.msk.bf16.vlgmr.msra.gmra.mxu2 %vm647_vm6, %v5925_v55  ;;  %5623 = vmatmul.msk.bf16.vlgmr.msra.gmra.mxu3 %vm647_vm6, %v5925_v55  ;;  %vm8763_vm6 = vmmov %vm8762_vm5 }
 0x267   : > { %v1589_v39 = vpop.f32.mrf.mxu2  ;;  %v1603_v12 = vpop.f32.mrf.mxu3 }
 0x268   : > { %v1608_v13 = vadd.f32 %v1589_v39, %v1565_v22  ;;  %v1609_v8 = vadd.f32 %v1603_v12, %v1566_v23 }
 0x26a   : > { %v1646_v11 = vpop.f32.mrf.mxu0  ;;  %v1660_v14 = vpop.f32.mrf.mxu1 }
 0x26b   : > { %v1665_v15 = vadd.f32 %v1646_v11, %v1608_v13  ;;  %v1666_v16 = vadd.f32 %v1660_v14, %v1609_v8 }
 0x26f   : > { %v7464_v21 = vpop.f32.mrf.mxu2  ;;  %v7466_v26 = vpop.f32.mrf.mxu3 }
 0x272   : > { %v7468_v36 = vpop.f32.mrf.mxu0  ;;  %v7470_v24 = vpop.f32.mrf.mxu1 }
 0x277   : > { %v1697_v48 = vpop.f32.mrf.mxu2  ;;  %v1711_v2 = vpop.f32.mrf.mxu3 }
 0x278   : > { %v1716_v20 = vadd.f32 %v1697_v48, %v1665_v15  ;;  %v1717_v59 = vadd.f32 %v1711_v2, %v1666_v16 }
 0x27a   : > { %v1740_v43 = vpop.f32.mrf.mxu0  ;;  %v1754_v44 = vpop.f32.mrf.mxu1 }
 0x27b   : > { %v1759_v45 = vadd.f32 %v1740_v43, %v1716_v20  ;;  %v1760_v50 = vadd.f32 %v1754_v44, %v1717_v59 }
 0x27f   : > { %v7472_v51 = vpop.f32.mrf.mxu2  ;;  %v7474_v52 = vpop.f32.mrf.mxu3 }
 0x282   : > { %v7476_v38 = vpop.f32.mrf.mxu0  ;;  %v7478_v22 = vpop.f32.mrf.mxu1 }
 0x287   : > { %v1783_v23 = vpop.f32.mrf.mxu2  ;;  %v1797_v55 = vpop.f32.mrf.mxu3 }
 0x288   : > { %v1802_v39 = vadd.f32 %v1783_v23, %v1759_v45  ;;  %v1803_v12 = vadd.f32 %v1797_v55, %v1760_v50  ;;  %v1070_v45 = vpop.permute.xlu2 %1069 }
 0x289   : > { %v1191_v55 = vadd.f32 %v7397_v28, %v1070_v45 }
 0x28a   : > { %v1826_v13 = vpop.f32.mrf.mxu0  ;;  %v1840_v8 = vpop.f32.mrf.mxu1 }
 0x28b   : > { %v1845_v11 = vadd.f32 %v1826_v13, %v1802_v39  ;;  %v1846_v14 = vadd.f32 %v1840_v8, %v1803_v12  ;;  %v1192_v39 = vadd.f32 %v7399_v35, %v1070_v45  ;;  %v1248_v8 = vadd.f32 %v7402_v19, %v1191_v55 }
 0x28f   : > { %v1785_v15 = vpop.f32.mrf.mxu2  ;;  %v1799_v16 = vpop.f32.mrf.mxu3 }
 0x292   : > { %v1828_v48 = vpop.f32.mrf.mxu0  ;;  %v1842_v2 = vpop.f32.mrf.mxu1 }
 0x297   : > { %v1877_v20 = vpop.f32.mrf.mxu2  ;;  %v1891_v59 = vpop.f32.mrf.mxu3 }
 0x298   : > { %v1896_v43 = vadd.f32 %v1877_v20, %v1845_v11  ;;  %v1897_v44 = vadd.f32 %v1891_v59, %v1846_v14  ;;  %v1249_v11 = vadd.f32 %v7404_v0, %v1192_v39  ;;  %v1310_v14 = vadd.f32 %v7423_v61, %v1248_v8 }
 0x29a   : > { %v1934_v1 = vpop.f32.mrf.mxu0  ;;  %v1948_v4 = vpop.f32.mrf.mxu1  ;;  %v1311_v20 = vadd.f32 %v7425_v5, %v1249_v11  ;;  %v1367_v54 = vadd.f32 %v7428_v9, %v1310_v14 }
 0x29c   : > { %v1368_v28 = vadd.f32 %v7430_v10, %v1311_v20  ;;  %v1424_v35 = vadd.f32 %v7439_v30, %v1367_v54 }
 0x29e   : > { %v1425_v45 = vadd.f32 %v7441_v31, %v1368_v28  ;;  %v1481_v0 = vadd.f32 %v7444_v37, %v1424_v35 }
 0x29f   : > { %v1879_v3 = vpop.f32.mrf.mxu2  ;;  %v1893_v17 = vpop.f32.mrf.mxu3 }
 0x2a0   : > { %v1482_v61 = vadd.f32 %v7446_v18, %v1425_v45  ;;  %v1524_v39 = vadd.f32 %v7453_v56, %v1481_v0 }
 0x2a2   : > { %v1936_v42 = vpop.f32.mrf.mxu0  ;;  %v1950_v60 = vpop.f32.mrf.mxu1  ;;  %v1525_v8 = vadd.f32 %v7455_v53, %v1482_v61  ;;  %v1567_v9 = vadd.f32 %v7458_v57, %v1524_v39 }
 0x2a4   : > { %v1568_v10 = vadd.f32 %v7460_v58, %v1525_v8  ;;  %v1610_v30 = vadd.f32 %v7464_v21, %v1567_v9 }
 0x2a6   : > { %v1611_v31 = vadd.f32 %v7466_v26, %v1568_v10  ;;  %v1667_v18 = vadd.f32 %v7468_v36, %v1610_v30  ;;  %v1953_v10 = vadd.f32 %v1934_v1, %v1896_v43 }
 0x2a7   : > { %v1977_v50 = vpop.f32.mrf.mxu2  ;;  %v1991_v23 = vpop.f32.mrf.mxu3 }
 0x2a8   : > { %v1668_v20 = vadd.f32 %v7470_v24, %v1611_v31  ;;  %v1718_v56 = vadd.f32 %v7472_v51, %v1667_v18  ;;  %v1954_v51 = vadd.f32 %v1948_v4, %v1897_v44  ;;  %v1996_v31 = vadd.f32 %v1977_v50, %v1953_v10 }
 0x2aa   : > { %v2020_v12 = vpop.f32.mrf.mxu0  ;;  %v2034_v13 = vpop.f32.mrf.mxu1  ;;  %v1719_v53 = vadd.f32 %v7474_v52, %v1668_v20  ;;  %v1761_v58 = vadd.f32 %v7476_v38, %v1718_v56  ;;  %v1997_v18 = vadd.f32 %v1991_v23, %v1954_v51 }
 0x2ac   : > { %v1762_v35 = vadd.f32 %v7478_v22, %v1719_v53  ;;  %v1804_v45 = vadd.f32 %v1785_v15, %v1761_v58  ;;  %v2039_v53 = vadd.f32 %v2020_v12, %v1996_v31  ;;  %v2040_v58 = vadd.f32 %v2034_v13, %v1997_v18 }
 0x2ae   : > { %v1805_v21 = vadd.f32 %v1799_v16, %v1762_v35  ;;  %v1847_v8 = vadd.f32 %v1828_v48, %v1804_v45 }
 0x2af   : > { %v1979_v59 = vpop.f32.mrf.mxu2  ;;  %v1993_v34 = vpop.f32.mrf.mxu3 }
 0x2b0   : > { %v1848_v36 = vadd.f32 %v1842_v2, %v1805_v21  ;;  %v1898_v9 = vadd.f32 %v1879_v3, %v1847_v8 }
 0x2b2   : > { %v2022_v29 = vpop.f32.mrf.mxu0  ;;  %v2036_v49 = vpop.f32.mrf.mxu1  ;;  %v1899_v24 = vadd.f32 %v1893_v17, %v1848_v36  ;;  %v1955_v30 = vadd.f32 %v1936_v42, %v1898_v9 }
 0x2b4   : > { %v1956_v52 = vadd.f32 %v1950_v60, %v1899_v24  ;;  %v1998_v15 = vadd.f32 %v1979_v59, %v1955_v30 }
 0x2b6   : > { %v1999_v16 = vadd.f32 %v1993_v34, %v1956_v52  ;;  %v2041_v35 = vadd.f32 %v2022_v29, %v1998_v15 }
 0x2b7   : > { %v2063_v25 = vpop.f32.mrf.mxu2  ;;  %v2077_v19 = vpop.f32.mrf.mxu3 }
 0x2b8   : > { %v2042_v7 = vadd.f32 %v2036_v49, %v1999_v16  ;;  %v2082_v48 = vadd.f32 %v2063_v25, %v2039_v53  ;;  %v2083_v2 = vadd.f32 %v2077_v19, %v2040_v58 }
 0x2ba   : > { %v2120_v55 = vpop.f32.mrf.mxu0  ;;  %v2134_v5 = vpop.f32.mrf.mxu1 }
 0x2bb   : > { %v2139_v42 = vadd.f32 %v2120_v55, %v2082_v48  ;;  %v2140_v60 = vadd.f32 %v2134_v5, %v2083_v2 }
 0x2bf   : > { %v2065_v11 = vpop.f32.mrf.mxu2  ;;  %v2079_v54 = vpop.f32.mrf.mxu3 }
 0x2c0   : > { %v2084_v3 = vadd.f32 %v2065_v11, %v2041_v35  ;;  %v2085_v17 = vadd.f32 %v2079_v54, %v2042_v7 }
 0x2c2   : > { %v2122_v14 = vpop.f32.mrf.mxu0  ;;  %v2136_v37 = vpop.f32.mrf.mxu1 }
 0x2c3   : > { %v2141_v50 = vadd.f32 %v2122_v14, %v2084_v3  ;;  %v2142_v23 = vadd.f32 %v2136_v37, %v2085_v17 }
 0x2c7   : > { %v2178_v28 = vpop.f32.mrf.mxu2  ;;  %v2192_v57 = vpop.f32.mrf.mxu3 }
 0x2c8   : > { %v2197_v45 = vadd.f32 %v2178_v28, %v2139_v42  ;;  %v2198_v21 = vadd.f32 %v2192_v57, %v2140_v60 }
 0x2ca   : > { %v2235_v0 = vpop.f32.mrf.mxu0  ;;  %v2249_v26 = vpop.f32.mrf.mxu1 }
 0x2cb   : > { %v2254_v12 = vadd.f32 %v2235_v0, %v2197_v45  ;;  %v2255_v13 = vadd.f32 %v2249_v26, %v2198_v21 }
 0x2cf   : > { %v2180_v61 = vpop.f32.mrf.mxu2  ;;  %v2194_v39 = vpop.f32.mrf.mxu3 }
 0x2d0   : > { %v2199_v59 = vadd.f32 %v2180_v61, %v2141_v50  ;;  %v2200_v34 = vadd.f32 %v2194_v39, %v2142_v23 }
 0x2d2   : > { %v2237_v20 = vpop.f32.mrf.mxu0  ;;  %v2251_v38 = vpop.f32.mrf.mxu1 }
 0x2d3   : > { %v2256_v25 = vadd.f32 %v2237_v20, %v2199_v59  ;;  %v2257_v19 = vadd.f32 %v2251_v38, %v2200_v34 }
 0x2d7   : > { %v2297_v56 = vpop.f32.mrf.mxu2  ;;  %v2311_v22 = vpop.f32.mrf.mxu3 }
 0x2d8   : > { %v2316_v11 = vadd.f32 %v2297_v56, %v2254_v12  ;;  %v2317_v7 = vadd.f32 %v2311_v22, %v2255_v13 }
 0x2da   : > { %v2354_v43 = vpop.f32.mrf.mxu0  ;;  %v2368_v44 = vpop.f32.mrf.mxu1 }
 0x2db   : > { %v2373_v36 = vadd.f32 %v2354_v43, %v2316_v11  ;;  %v2374_v9 = vadd.f32 %v2368_v44, %v2317_v7 }
 0x2df   : > { %v2299_v1 = vpop.f32.mrf.mxu2  ;;  %v2313_v4 = vpop.f32.mrf.mxu3 }
 0x2e0   : > { %v2318_v54 = vadd.f32 %v2299_v1, %v2256_v25  ;;  %v2319_v8 = vadd.f32 %v2313_v4, %v2257_v19 }
 0x2e2   : > { %v2356_v55 = vpop.f32.mrf.mxu0  ;;  %v2370_v5 = vpop.f32.mrf.mxu1 }
 0x2e3   : > { %v2375_v14 = vadd.f32 %v2356_v55, %v2318_v54  ;;  %v2376_v37 = vadd.f32 %v2370_v5, %v2319_v8 }
 0x2e7   : > { %v2411_v29 = vpop.f32.mrf.mxu2  ;;  %v2425_v49 = vpop.f32.mrf.mxu3 }
 0x2e8   : > { %v2430_v28 = vadd.f32 %v2411_v29, %v2373_v36  ;;  %v2431_v57 = vadd.f32 %v2425_v49, %v2374_v9 }
 0x2ea   : > { %v2434_v24 = vmax.f32 %v2430_v28, 0.0  ;;  %v2435_v10 = vmax.f32 %v2431_v57, 0.0 }
 0x2ef   : > { %v2413_v61 = vpop.f32.mrf.mxu2  ;;  %v2427_v39 = vpop.f32.mrf.mxu3 }
 0x2f0   : > { %v2432_v0 = vadd.f32 %v2413_v61, %v2375_v14  ;;  %v2433_v26 = vadd.f32 %v2427_v39, %v2376_v37 }
 0x2f2   : > { %v2436_v51 = vmax.f32 %v2432_v0, 0.0  ;;  %v2437_v30 = vmax.f32 %v2433_v26, 0.0 }
 0x2f4   : > { %v7504_v52 = vpack.i.bf16 %v2436_v51, %v2434_v24  ;;  %v7506_v31 = vpack.i.bf16 %v2437_v30, %v2435_v10  ;;  %v7514_v18 = vpack.c.bf16 %v2436_v51, %v2434_v24  ;;  %v7516_v20 = vpack.c.bf16 %v2437_v30, %v2435_v10 }
 0x2f6   : > { %6163 = vrot.lane.b32.xlu2 %v7504_v52, %s6766_s20  ;;  %6153 = vrot.lane.b32.xlu0 %v7504_v52, %s6764_s16 }
 0x2f7   : > { %6158 = vrot.lane.b32.xlu1 %v7506_v31, %s6764_s16 }
 0x2fe   : > { %6178 = vrot.lane.b32.xlu2 %v7506_v31, %s6759_s3  ;;  %6168 = vrot.lane.b32.xlu0 %v7506_v31, %s6766_s20 }
 0x2ff   : > { %6173 = vrot.lane.b32.xlu1 %v7504_v52, %s6759_s3 }
 0x306   : > { %6193 = vrot.lane.b32.xlu2 %v7504_v52, %s6761_s5  ;;  %6183 = vrot.lane.b32.xlu0 %v7504_v52, %s6760_s4 }
 0x307   : > { %6188 = vrot.lane.b32.xlu1 %v7506_v31, %s6760_s4 }
 0x30e   : > { %6208 = vrot.lane.b32.xlu2 %v7506_v31, %s6762_s7  ;;  %6198 = vrot.lane.b32.xlu0 %v7506_v31, %s6761_s5 }
 0x30f   : > { %6203 = vrot.lane.b32.xlu1 %v7504_v52, %s6762_s7 }
 0x316   : > { %6223 = vrot.lane.b32.xlu2 %v7504_v52, %s6768_s26  ;;  %6213 = vrot.lane.b32.xlu0 %v7504_v52, %s6767_s21 }
 0x317   : > { %6218 = vrot.lane.b32.xlu1 %v7506_v31, %s6767_s21 }
 0x31e   : > { %6228 = vrot.lane.b32.xlu0 %v7506_v31, %s6768_s26 }
 0x350   : > { %v6164_v38 = vpop.permute.xlu2 %6163 }
 0x351   : > { %v6166_v2 = vunpack.i.h.bf16 %v6164_v38  ;;  %v6165_v3 = vunpack.i.l.bf16 %v6164_v38 }
 0x358   : > { %v6179_v15 = vpop.permute.xlu2 %6178 }
 0x359   : > { %v6181_v55 = vunpack.i.h.bf16 %v6179_v15  ;;  %v6180_v5 = vunpack.i.l.bf16 %v6179_v15 }
 0x360   : > { %v6194_v29 = vpop.permute.xlu2 %6193 }
 0x368   : > { %v6154_v56 = vpop.permute.xlu0 %6153 }
 0x369   : > { %v6159_v22 = vpop.permute.xlu1 %6158  ;;  %v6156_v16 = vunpack.i.h.bf16 %v6154_v56  ;;  %v6155_v53 = vunpack.i.l.bf16 %v6154_v56 }
 0x36a   : > { %v6161_v58 = vunpack.i.h.bf16 %v6159_v22  ;;  %v6160_v35 = vunpack.i.l.bf16 %v6159_v22 }
 0x36c   : > { %v2459_v42 = vsel %vm1081_vm11, %v6156_v16, %v6161_v58  ;;  %v2461_v60 = vsel %vm1081_vm11, %v6161_v58, %v6156_v16  ;;  %v2458_v43 = vsel %vm1081_vm11, %v6155_v53, %v6160_v35  ;;  %v2460_v44 = vsel %vm1081_vm11, %v6160_v35, %v6155_v53  ;;  %v6209_v53 = vpop.permute.xlu2 %6208 }
 0x370   : > { %v6169_v48 = vpop.permute.xlu0 %6168 }
 0x371   : > { %v6171_v17 = vunpack.i.h.bf16 %v6169_v48  ;;  %v6170_v1 = vunpack.i.l.bf16 %v6169_v48  ;;  %v6174_v4 = vpop.permute.xlu1 %6173 }
 0x372   : > { %v6176_v19 = vunpack.i.h.bf16 %v6174_v4  ;;  %v6175_v11 = vunpack.i.l.bf16 %v6174_v4 }
 0x373   : > { %v2471_v50 = vsel %vm1093_vm12, %v6166_v2, %v6171_v17  ;;  %v2473_v23 = vsel %vm1093_vm12, %v6171_v17, %v6166_v2  ;;  %v2470_v45 = vsel %vm1093_vm12, %v6165_v3, %v6170_v1  ;;  %v2472_v21 = vsel %vm1093_vm12, %v6170_v1, %v6165_v3 }
 0x374   : > { %v7562_v59 = vsel %vm1096_vm13, %v2470_v45, %v2460_v44  ;;  %v7566_v34 = vsel %vm8731_vm14, %v2472_v21, %v2458_v43  ;;  %v7570_v12 = vsel %vm1096_vm13, %v2471_v50, %v2461_v60  ;;  %v7574_v13 = vsel %vm8731_vm14, %v2473_v23, %v2459_v42 }
 0x375   : > { %v7578_v49 = vpack.i.bf16 %v7570_v12, %v7562_v59  ;;  %v7582_v25 = vpack.i.bf16 %v7574_v13, %v7566_v34  ;;  %v3135_v54 = vpack.c.bf16 %v7570_v12, %v7562_v59  ;;  %v3136_v8 = vpack.c.bf16 %v7574_v13, %v7566_v34  ;;  %v5935_v59 = vld [vmem:[%s6900_s0 + $0x48] sm:$0xff]  ;;  %v5936_v12 = vld [vmem:[%s6900_s0 + $0x50] sm:$0xff] }
 0x376   : > { %v2487_v57 = vsel %vm8729_vm0, %v6176_v19, %v6181_v55  ;;  %v2489_v61 = vsel %vm8729_vm0, %v6181_v55, %v6176_v19  ;;  %v2486_v39 = vsel %vm8729_vm0, %v6175_v11, %v6180_v5  ;;  %v2488_v0 = vsel %vm8729_vm0, %v6180_v5, %v6175_v11 }
 0x377   : > { %6233 = vrot.lane.b32.xlu1 %v7578_v49, %s6769_s14  ;;  %6238 = vrot.lane.b32.xlu2 %v7582_v25, %s6769_s14  ;;  %v6196_v2 = vunpack.i.h.bf16 %v6194_v29  ;;  %v6195_v3 = vunpack.i.l.bf16 %v6194_v29  ;;  %v6211_v42 = vunpack.i.h.bf16 %v6209_v53  ;;  %v6210_v60 = vunpack.i.l.bf16 %v6209_v53 }
 0x378   : > { %v6184_v7 = vpop.permute.xlu0 %6183  ;;  %vm8766_vm0 = vcmp.lt.s32.totalorder %v6943_v27, 15 }
 0x379   : > { %v6186_v36 = vunpack.i.h.bf16 %v6184_v7  ;;  %v6185_v9 = vunpack.i.l.bf16 %v6184_v7  ;;  %v6189_v14 = vpop.permute.xlu1 %6188  ;;  %vm8768_vm14 = vmmov %vm8766_vm0 }
 0x37a   : > { %v6191_v37 = vunpack.i.h.bf16 %v6189_v14  ;;  %v6190_v28 = vunpack.i.l.bf16 %v6189_v14 }
 0x37c   : > { %v2499_v26 = vsel %vm8730_vm2, %v6186_v36, %v6191_v37  ;;  %v2501_v24 = vsel %vm8730_vm2, %v6191_v37, %v6186_v36  ;;  %v2498_v10 = vsel %vm8730_vm2, %v6185_v9, %v6190_v28  ;;  %v2500_v51 = vsel %vm8730_vm2, %v6190_v28, %v6185_v9  ;;  %vm8767_vm2 = vmmov %vm8766_vm0 }
 0x37d   : > { %v7610_v30 = vsel %vm8728_vm3, %v2498_v10, %v2488_v0  ;;  %v7614_v38 = vsel %vm8727_vm4, %v2500_v51, %v2486_v39  ;;  %v7618_v56 = vsel %vm8728_vm3, %v2499_v26, %v2489_v61  ;;  %v7622_v22 = vsel %vm8727_vm4, %v2501_v24, %v2487_v57  ;;  %vm8764_vm4 = vmmov %vm8762_vm5  ;;  %v6224_v0 = vpop.permute.xlu2 %6223 }
 0x37e   : > { %v7626_v15 = vpack.i.bf16 %v7618_v56, %v7610_v30  ;;  %v7630_v16 = vpack.i.bf16 %v7622_v22, %v7614_v38  ;;  %v3180_v35 = vpack.c.bf16 %v7618_v56, %v7610_v30  ;;  %v3181_v48 = vpack.c.bf16 %v7622_v22, %v7614_v38  ;;  %vm8765_vm3 = vmmov %vm8764_vm4  ;;  %v5937_v38 = vld [vmem:[%s6900_s0 + $0x58] sm:$0xff] }
 0x37f   : > { %6253 = vrot.lane.b32.xlu2 %v7504_v52, %s6769_s14 }
 0x380   : > { %6243 = vrot.lane.b32.xlu0 %v7626_v15, %s6769_s14  ;;  %6248 = vrot.lane.b32.xlu1 %v7630_v16, %s6769_s14  ;;  %v6199_v58 = vpop.permute.xlu0 %6198 }
 0x381   : > { %v6201_v17 = vunpack.i.h.bf16 %v6199_v58  ;;  %v6200_v1 = vunpack.i.l.bf16 %v6199_v58  ;;  %v6204_v4 = vpop.permute.xlu1 %6203  ;;  %v6226_v58 = vunpack.i.h.bf16 %v6224_v0 }
 0x382   : > { %v6206_v43 = vunpack.i.h.bf16 %v6204_v4  ;;  %v6205_v44 = vunpack.i.l.bf16 %v6204_v4 }
 0x383   : > { %v2515_v50 = vsel %vm8762_vm5, %v6196_v2, %v6201_v17  ;;  %v2517_v23 = vsel %vm8763_vm6, %v6201_v17, %v6196_v2  ;;  %v2514_v45 = vsel %vm8764_vm4, %v6195_v3, %v6200_v1  ;;  %v2516_v21 = vsel %vm8765_vm3, %v6200_v1, %v6195_v3  ;;  %vm8769_vm5 = vmmov %vm8766_vm0 }
 0x384   : > { %v2527_v29 = vsel %vm8766_vm0, %v6206_v43, %v6211_v42  ;;  %v2529_v19 = vsel %vm8767_vm2, %v6211_v42, %v6206_v43  ;;  %v2526_v11 = vsel %vm8768_vm14, %v6205_v44, %v6210_v60  ;;  %v2528_v7 = vsel %vm8769_vm5, %v6210_v60, %v6205_v44 }
 0x385   : > { %vm8770_vm6 = vcmp.ge.s32.totalorder %v6952_v32, 15  ;;  %vm8771_vm4 = vcmp.ge.s32.totalorder %v6954_v33, 15  ;;  %v6225_v2 = vunpack.i.l.bf16 %v6224_v0  ;;  %vm8774_vm2 = vcmp.ge.s32.totalorder %v6954_v33, 14  ;;  %v2438_v0 = vld [vmem:[%s6905_s22] sm:$0xff] }
 0x386   : > { %v7660_v55 = vsel %vm8770_vm6, %v2529_v19, %v2515_v50  ;;  %v7664_v5 = vsel %vm8771_vm4, %v2527_v29, %v2517_v23  ;;  %vm8772_vm3 = vmmov %vm8770_vm6  ;;  %vm2583_vm5 = vcmask 130048   ;;  %vm8776_vm6 = vcmp.lt.s32.totalorder %v6943_v27, 16 }
 0x387   : > { %v7668_v36 = vsel %vm8772_vm3, %v2528_v7, %v2514_v45  ;;  %vm8773_vm0 = vmmov %vm8771_vm4 }
 0x388   : > { %v7672_v9 = vsel %vm8773_vm0, %v2526_v11, %v2516_v21  ;;  %v7676_v14 = vpack.i.bf16 %v7660_v55, %v7668_v36  ;;  %6258 = vrot.lane.b32.xlu0 %v7506_v31, %s6769_s14  ;;  %v6214_v28 = vpop.permute.xlu0 %6213  ;;  %v3270_v57 = vpack.c.bf16 %v7660_v55, %v7668_v36  ;;  %vm8775_vm14 = vmmov %vm8774_vm2 }
 0x389   : > { %v6267_v37 = vpack.i.bf16 %v7664_v5, %v7672_v9  ;;  %v3271_v61 = vpack.c.bf16 %v7664_v5, %v7672_v9  ;;  %v6219_v39 = vpop.permute.xlu1 %6218  ;;  %v6216_v26 = vunpack.i.h.bf16 %v6214_v28  ;;  %v6215_v24 = vunpack.i.l.bf16 %v6214_v28  ;;  %vm8777_vm4 = vmmov %vm8776_vm6 }
 0x38a   : > { %6263 = vrot.lane.b32.xlu1 %v7676_v14, %s6769_s14  ;;  %v6221_v10 = vunpack.i.h.bf16 %v6219_v39  ;;  %v6220_v51 = vunpack.i.l.bf16 %v6219_v39  ;;  %vm8778_vm3 = vmmov %vm8777_vm4 }
 0x38b   : > { %6268 = vrot.lane.b32.xlu2 %v6267_v37, %s6769_s14  ;;  %vm8779_vm0 = vmmov %vm8778_vm3 }
 0x38c   : > { %v2543_v1 = vsel %vm1113_vm10, %v6216_v26, %v6221_v10  ;;  %v2545_v4 = vsel %vm1113_vm10, %v6221_v10, %v6216_v26  ;;  %v2542_v42 = vsel %vm1113_vm10, %v6215_v24, %v6220_v51  ;;  %v2544_v60 = vsel %vm1113_vm10, %v6220_v51, %v6215_v24  ;;  %v2439_v24 = vld [vmem:[%s6905_s22 + $0x8] sm:$0xff] }
 0x390   : > { %v6229_v53 = vpop.permute.xlu0 %6228 }
 0x391   : > { %v6231_v3 = vunpack.i.h.bf16 %v6229_v53  ;;  %v6230_v17 = vunpack.i.l.bf16 %v6229_v53 }
 0x393   : > { %6283 = vrot.lane.b32.xlu2 %v7578_v49, %s6763_s15  ;;  %v2555_v43 = vsel %vm1125_vm9, %v6226_v58, %v6231_v3  ;;  %v2557_v44 = vsel %vm1125_vm9, %v6231_v3, %v6226_v58  ;;  %v2554_v50 = vsel %vm1125_vm9, %v6225_v2, %v6230_v17  ;;  %v2556_v23 = vsel %vm1125_vm9, %v6230_v17, %v6225_v2  ;;  %v5926_v2 = vld [vmem:[%s6900_s0] sm:$0xff] }
 0x394   : > { %v7709_v45 = vsel %vm1128_vm8, %v2556_v23, %v2542_v42  ;;  %v7713_v21 = vsel %vm8774_vm2, %v2554_v50, %v2544_v60  ;;  %v7717_v29 = vsel %vm1128_vm8, %v2557_v44, %v2543_v1  ;;  %v7721_v19 = vsel %vm8775_vm14, %v2555_v43, %v2545_v4  ;;  %vm8780_vm2 = vmmov %vm8779_vm0 }
 0x395   : > { %v6272_v11 = vpack.i.bf16 %v7717_v29, %v7709_v45  ;;  %v6277_v7 = vpack.i.bf16 %v7721_v19, %v7713_v21  ;;  %v3315_v28 = vpack.c.bf16 %v7717_v29, %v7709_v45  ;;  %v3316_v39 = vpack.c.bf16 %v7721_v19, %v7713_v21  ;;  %vm8781_vm14 = vmmov %vm8779_vm0 }
 0x397   : > { %6273 = vrot.lane.b32.xlu0 %v6272_v11, %s6769_s14  ;;  %6278 = vrot.lane.b32.xlu1 %v6277_v7, %s6769_s14 }
 0x39b   : > { %6298 = vrot.lane.b32.xlu2 %v7630_v16, %s6763_s15 }
 0x39f   : > { %6293 = vrot.lane.b32.xlu1 %v7626_v15, %s6763_s15  ;;  %6288 = vrot.lane.b32.xlu0 %v7582_v25, %s6763_s15 }
 0x3a3   : > { %6313 = vrot.lane.b32.xlu2 %v7676_v14, %s6763_s15 }
 0x3a7   : > { %6308 = vrot.lane.b32.xlu1 %v7506_v31, %s6763_s15  ;;  %6303 = vrot.lane.b32.xlu0 %v7504_v52, %s6763_s15 }
 0x3ab   : > { %6328 = vrot.lane.b32.xlu2 %v6277_v7, %s6763_s15 }
 0x3af   : > { %6323 = vrot.lane.b32.xlu1 %v6272_v11, %s6763_s15  ;;  %6318 = vrot.lane.b32.xlu0 %v6267_v37, %s6763_s15 }
 0x3b3   : > { %6343 = vrot.lane.b32.xlu2 %v7626_v15, %s6765_s19 }
 0x3b7   : > { %6338 = vrot.lane.b32.xlu1 %v7582_v25, %s6765_s19  ;;  %6333 = vrot.lane.b32.xlu0 %v7578_v49, %s6765_s19 }
 0x3bb   : > { %6358 = vrot.lane.b32.xlu2 %v7506_v31, %s6765_s19 }
 0x3bf   : > { %6353 = vrot.lane.b32.xlu1 %v7504_v52, %s6765_s19  ;;  %6348 = vrot.lane.b32.xlu0 %v7630_v16, %s6765_s19 }
 0x3c3   : > { %6373 = vrot.lane.b32.xlu2 %v6272_v11, %s6765_s19 }
 0x3c7   : > { %6368 = vrot.lane.b32.xlu1 %v6267_v37, %s6765_s19  ;;  %6363 = vrot.lane.b32.xlu0 %v7676_v14, %s6765_s19 }
 0x3cb   : > { %6388 = vrot.lane.b32.xlu2 %v7582_v25, %s6770_s24 }
 0x3cf   : > { %6383 = vrot.lane.b32.xlu1 %v7578_v49, %s6770_s24  ;;  %6378 = vrot.lane.b32.xlu0 %v6277_v7, %s6765_s19 }
 0x3d1   : > { %v6239_v49 = vpop.permute.xlu2 %6238 }
 0x3d2   : > { %v6241_v25 = vunpack.i.h.bf16 %v6239_v49 }
 0x3d3   : > { %6403 = vrot.lane.b32.xlu2 %v7504_v52, %s6770_s24 }
 0x3d7   : > { %6398 = vrot.lane.b32.xlu1 %v7630_v16, %s6770_s24  ;;  %6393 = vrot.lane.b32.xlu0 %v7626_v15, %s6770_s24  ;;  %v6240_v16 = vunpack.i.l.bf16 %v6239_v49  ;;  %v5927_v49 = vld [vmem:[%s6900_s0 + $0x8] sm:$0xff] }
 0x3db   : > { %6418 = vrot.lane.b32.xlu2 %v6267_v37, %s6770_s24  ;;  %v6254_v37 = vpop.permute.xlu2 %6253 }
 0x3df   : > { %6413 = vrot.lane.b32.xlu1 %v7676_v14, %s6770_s24  ;;  %6408 = vrot.lane.b32.xlu0 %v7506_v31, %s6770_s24 }
 0x3e3   : > { %2442 = vperm.xlu2 %6151, %v2438_v0  }
 0x3e7   : > { %6428 = vrot.lane.b32.xlu1 %v6277_v7, %s6770_s24  ;;  %6423 = vrot.lane.b32.xlu0 %v6272_v11, %s6770_s24  ;;  %v6269_v11 = vpop.permute.xlu2 %6268 }
 0x3e9   : > { %v6234_v52 = vpop.permute.xlu1 %6233 }
 0x3ea   : > { %v6236_v15 = vunpack.i.h.bf16 %v6234_v52  ;;  %v6235_v26 = vunpack.i.l.bf16 %v6234_v52  ;;  %v6256_v52 = vunpack.i.h.bf16 %v6254_v37 }
 0x3ec   : > { %v2570_v14 = vsel %vm8732_vm7, %v6235_v26, %v6240_v16  ;;  %v2571_v31 = vsel %vm8732_vm7, %v6236_v15, %v6241_v25  ;;  %v2572_v10 = vsel %vm8732_vm7, %v6240_v16, %v6235_v26  ;;  %v2573_v51 = vsel %vm8732_vm7, %v6241_v25, %v6236_v15 }
 0x3ed   : > { %v2576_v53 = vpack.c.bf16 %v2573_v51, %v2572_v10  ;;  %v2577_v58 = vpack.c.bf16 %v2571_v31, %v2570_v14  ;;  %v6255_v25 = vunpack.i.l.bf16 %v6254_v37  ;;  %v6271_v10 = vunpack.i.h.bf16 %v6269_v11 }
 0x3ee   : > { %v6270_v51 = vunpack.i.l.bf16 %v6269_v11  ;;  %v5929_v11 = vld [vmem:[%s6900_s0 + $0x18] sm:$0xff] }
 0x3ef   : > { %2447 = vperm.xlu0 %6432, %v2439_v24   ;;  %2594 = vmatpush.bf16.msrb.mxu0 %v2576_v53 }
 0x3f0   : > { %2608 = vmatpush.bf16.msrb.mxu1 %v2577_v58 }
 0x3f2   : > { %v6244_v3 = vpop.permute.xlu0 %6243  ;;  %v6249_v17 = vpop.permute.xlu1 %6248  ;;  %5628 = vmatmul.msk.bf16.vlgmr.msrb.gmra.mxu0 %vm2583_vm5, %v5926_v2 }
 0x3f3   : > { %v6246_v1 = vunpack.i.h.bf16 %v6244_v3  ;;  %v6245_v4 = vunpack.i.l.bf16 %v6244_v3  ;;  %v6251_v42 = vunpack.i.h.bf16 %v6249_v17  ;;  %v6250_v60 = vunpack.i.l.bf16 %v6249_v17  ;;  %5629 = vmatmul.msk.bf16.vlgmr.msrb.gmra.mxu1 %vm2583_vm5, %v5926_v2 }
 0x3f5   : > { %v2628_v43 = vsel %vm8732_vm7, %v6246_v1, %v6251_v42  ;;  %v2630_v44 = vsel %vm8732_vm7, %v6251_v42, %v6246_v1  ;;  %v2627_v50 = vsel %vm8732_vm7, %v6245_v4, %v6250_v60  ;;  %v2629_v23 = vsel %vm8732_vm7, %v6250_v60, %v6245_v4 }
 0x3f6   : > { %v2634_v7 = vpack.c.bf16 %v2630_v44, %v2629_v23  ;;  %v2635_v0 = vpack.c.bf16 %v2628_v43, %v2627_v50  ;;  %v5928_v44 = vld [vmem:[%s6900_s0 + $0x10] sm:$0xff]  ;;  %v6284_v50 = vpop.permute.xlu2 %6283 }
 0x3f8   : > { %2651 = vmatpush.bf16.msrb.mxu2 %v2634_v7  ;;  %2665 = vmatpush.bf16.msrb.mxu3 %v2635_v0 }
 0x3fa   : > { %v6259_v16 = vpop.permute.xlu0 %6258 }
 0x3fb   : > { %v6261_v26 = vunpack.i.h.bf16 %v6259_v16  ;;  %v6260_v24 = vunpack.i.l.bf16 %v6259_v16  ;;  %5636 = vmatmul.msk.bf16.vlgmr.msrb.gmra.mxu2 %vm2583_vm5, %v5927_v49  ;;  %5637 = vmatmul.msk.bf16.vlgmr.msrb.gmra.mxu3 %vm2583_vm5, %v5927_v49 }
 0x3fc   : > { %v6264_v15 = vpop.permute.xlu1 %6263 }
 0x3fd   : > { %v6266_v14 = vunpack.i.h.bf16 %v6264_v15  ;;  %v6265_v31 = vunpack.i.l.bf16 %v6264_v15  ;;  %v2684_v53 = vsel %vm8732_vm7, %v6255_v25, %v6260_v24  ;;  %v2685_v58 = vsel %vm8732_vm7, %v6256_v52, %v6261_v26 }
 0x3fe   : > { %v2686_v37 = vsel %vm8732_vm7, %v6260_v24, %v6255_v25  ;;  %v2687_v2 = vsel %vm8732_vm7, %v6261_v26, %v6256_v52  ;;  %v2692_v17 = vpack.c.bf16 %v2685_v58, %v2684_v53  ;;  %v6299_v49 = vpop.permute.xlu2 %6298  ;;  %v5930_v53 = vld [vmem:[%s6900_s0 + $0x20] sm:$0xff] }
 0x3ff   : > { %v2691_v3 = vpack.c.bf16 %v2687_v2, %v2686_v37  ;;  %v2741_v1 = vsel %vm8732_vm7, %v6265_v31, %v6270_v51  ;;  %v2742_v4 = vsel %vm8732_vm7, %v6266_v14, %v6271_v10  ;;  %v2743_v42 = vsel %vm8732_vm7, %v6270_v51, %v6265_v31 }
 0x400   : > { %v2744_v60 = vsel %vm8732_vm7, %v6271_v10, %v6266_v14  ;;  %v2749_v43 = vpack.c.bf16 %v2742_v4, %v2741_v1  ;;  %2722 = vmatpush.bf16.msra.mxu1 %v2692_v17  ;;  %v6301_v58 = vunpack.i.h.bf16 %v6299_v49  ;;  %v6300_v37 = vunpack.i.l.bf16 %v6299_v49 }
 0x401   : > { %v2748_v23 = vpack.c.bf16 %v2744_v60, %v2743_v42  ;;  %2708 = vmatpush.bf16.msra.mxu0 %v2691_v3  ;;  %v6286_v60 = vunpack.i.h.bf16 %v6284_v50 }
 0x402   : > { %2779 = vmatpush.bf16.msra.mxu3 %v2749_v43  ;;  %v6285_v43 = vunpack.i.l.bf16 %v6284_v50 }
 0x403   : > { %2765 = vmatpush.bf16.msra.mxu2 %v2748_v23  ;;  %5645 = vmatmul.msk.bf16.vlgmr.msra.gmra.mxu1 %vm2583_vm5, %v5928_v44 }
 0x404   : > { %5644 = vmatmul.msk.bf16.vlgmr.msra.gmra.mxu0 %vm2583_vm5, %v5928_v44 }
 0x406   : > { %v6314_v44 = vpop.permute.xlu2 %6313 }
 0x409   : > { %v6274_v7 = vpop.permute.xlu0 %6273  ;;  %v6279_v0 = vpop.permute.xlu1 %6278 }
 0x40a   : > { %v6276_v52 = vunpack.i.h.bf16 %v6274_v7  ;;  %v6275_v25 = vunpack.i.l.bf16 %v6274_v7  ;;  %v6281_v16 = vunpack.i.h.bf16 %v6279_v0  ;;  %v6280_v15 = vunpack.i.l.bf16 %v6279_v0 }
 0x40b   : > { %5652 = vmatmul.msk.bf16.vlgmr.msra.gmra.mxu2 %vm2583_vm5, %v5929_v11  ;;  %5653 = vmatmul.msk.bf16.vlgmr.msra.gmra.mxu3 %vm2583_vm5, %v5929_v11 }
 0x40c   : > { %v2799_v26 = vsel %vm8732_vm7, %v6276_v52, %v6281_v16  ;;  %v2801_v24 = vsel %vm8732_vm7, %v6281_v16, %v6276_v52  ;;  %v2798_v14 = vsel %vm8732_vm7, %v6275_v25, %v6280_v15  ;;  %v2800_v31 = vsel %vm8732_vm7, %v6280_v15, %v6275_v25  ;;  %vm8782_vm7 = vmmov %vm8779_vm0 }
 0x40d   : > { %v2805_v10 = vpack.c.bf16 %v2801_v24, %v2800_v31  ;;  %v2806_v51 = vpack.c.bf16 %v2799_v26, %v2798_v14  ;;  %v5931_v14 = vld [vmem:[%s6900_s0 + $0x28] sm:$0xff] }
 0x40f   : > { %2822 = vmatpush.bf16.msrb.mxu0 %v2805_v10  ;;  %2836 = vmatpush.bf16.msrb.mxu1 %v2806_v51 }
 0x411   : > { %v6294_v2 = vpop.permute.xlu1 %6293  ;;  %v6289_v3 = vpop.permute.xlu0 %6288 }
 0x412   : > { %v6296_v17 = vunpack.i.h.bf16 %v6294_v2  ;;  %v6295_v1 = vunpack.i.l.bf16 %v6294_v2  ;;  %v6291_v4 = vunpack.i.h.bf16 %v6289_v3  ;;  %v6290_v42 = vunpack.i.l.bf16 %v6289_v3 }
 0x413   : > { %5661 = vmatmul.msk.bf16.vlgmr.msrb.gmra.mxu1 %vm2583_vm5, %v5930_v53 }
 0x414   : > { %5660 = vmatmul.msk.bf16.vlgmr.msrb.gmra.mxu0 %vm2583_vm5, %v5930_v53  ;;  %v2912_v23 = vsel %vm8776_vm6, %v6295_v1, %v6300_v37  ;;  %v2913_v11 = vsel %vm8777_vm4, %v6296_v17, %v6301_v58  ;;  %v2914_v7 = vsel %vm8778_vm3, %v6300_v37, %v6295_v1  ;;  %v2915_v0 = vsel %vm8779_vm0, %v6301_v58, %v6296_v17  ;;  %vm8783_vm6 = vmmov %vm8779_vm0 }
 0x415   : > { %v2919_v49 = vpack.c.bf16 %v2915_v0, %v2914_v7  ;;  %v2920_v50 = vpack.c.bf16 %v2913_v11, %v2912_v23  ;;  %v2855_v52 = vsel %vm8780_vm2, %v6285_v43, %v6290_v42  ;;  %v2856_v25 = vsel %vm8781_vm14, %v6286_v60, %v6291_v4  ;;  %vm8785_vm4 = vmmov %vm8779_vm0 }
 0x416   : > { %v2857_v16 = vsel %vm8782_vm7, %v6290_v42, %v6285_v43  ;;  %v2858_v15 = vsel %vm8783_vm6, %v6291_v4, %v6286_v60  ;;  %v2863_v26 = vpack.c.bf16 %v2856_v25, %v2855_v52  ;;  %vm8784_vm7 = vmmov %vm8779_vm0  ;;  %v6329_v60 = vpop.permute.xlu2 %6328  ;;  %v5932_v43 = vld [vmem:[%s6900_s0 + $0x30] sm:$0xff] }
 0x417   : > { %v2862_v24 = vpack.c.bf16 %v2858_v15, %v2857_v16  ;;  %2936 = vmatpush.bf16.msra.mxu0 %v2919_v49  ;;  %2950 = vmatpush.bf16.msra.mxu1 %v2920_v50  ;;  %vm8786_vm3 = vmmov %vm8779_vm0  ;;  %v6331_v23 = vunpack.i.h.bf16 %v6329_v60  ;;  %v6330_v11 = vunpack.i.l.bf16 %v6329_v60  ;;  %v6316_v16 = vunpack.i.h.bf16 %v6314_v44 }
 0x418   : > { %2893 = vmatpush.bf16.msrb.mxu3 %v2863_v26  ;;  %v6315_v15 = vunpack.i.l.bf16 %v6314_v44  ;;  %vm8787_vm2 = vmmov %vm8779_vm0 }
 0x419   : > { %2879 = vmatpush.bf16.msrb.mxu2 %v2862_v24  ;;  %v6309_v31 = vpop.permute.xlu1 %6308  ;;  %v6304_v10 = vpop.permute.xlu0 %6303  ;;  %vm8788_vm14 = vmmov %vm8779_vm0 }
 0x41a   : > { %v6311_v51 = vunpack.i.h.bf16 %v6309_v31  ;;  %v6310_v53 = vunpack.i.l.bf16 %v6309_v31  ;;  %v6306_v58 = vunpack.i.h.bf16 %v6304_v10  ;;  %v6305_v37 = vunpack.i.l.bf16 %v6304_v10  ;;  %vm8789_vm6 = vmmov %vm8779_vm0 }
 0x41b   : > { %5669 = vmatmul.msk.bf16.vlgmr.msrb.gmra.mxu3 %vm2583_vm5, %v5931_v14 }
 0x41c   : > { %v2970_v2 = vsel %vm8784_vm7, %v6306_v58, %v6311_v51  ;;  %v2972_v3 = vsel %vm8785_vm4, %v6311_v51, %v6306_v58  ;;  %v2969_v17 = vsel %vm8786_vm3, %v6305_v37, %v6310_v53  ;;  %v2971_v1 = vsel %vm8779_vm0, %v6310_v53, %v6305_v37  ;;  %5668 = vmatmul.msk.bf16.vlgmr.msrb.gmra.mxu2 %vm2583_vm5, %v5931_v14  ;;  %vm8790_vm7 = vmmov %vm8779_vm0 }
 0x41d   : > { %v2976_v4 = vpack.c.bf16 %v2972_v3, %v2971_v1  ;;  %v2977_v42 = vpack.c.bf16 %v2970_v2, %v2969_v17  ;;  %vm8791_vm4 = vmmov %vm8779_vm0  ;;  %v5933_v17 = vld [vmem:[%s6900_s0 + $0x38] sm:$0xff]  ;;  %v5934_v1 = vld [vmem:[%s6900_s0 + $0x40] sm:$0xff] }
 0x41e   : > { %vm8792_vm3 = vmmov %vm8779_vm0  ;;  %v6344_v13 = vpop.permute.xlu2 %6343 }
 0x41f   : > { %2993 = vmatpush.bf16.msra.mxu2 %v2976_v4  ;;  %3007 = vmatpush.bf16.msra.mxu3 %v2977_v42  ;;  %v6346_v45 = vunpack.i.h.bf16 %v6344_v13  ;;  %v6345_v21 = vunpack.i.l.bf16 %v6344_v13 }
 0x421   : > { %v6324_v7 = vpop.permute.xlu1 %6323  ;;  %v6319_v0 = vpop.permute.xlu0 %6318 }
 0x422   : > { %v6326_v49 = vunpack.i.h.bf16 %v6324_v7  ;;  %v6325_v50 = vunpack.i.l.bf16 %v6324_v7  ;;  %v6321_v52 = vunpack.i.h.bf16 %v6319_v0  ;;  %v6320_v25 = vunpack.i.l.bf16 %v6319_v0 }
 0x423   : > { %5677 = vmatmul.msk.bf16.vlgmr.msra.gmra.mxu1 %vm2583_vm5, %v5932_v43 }
 0x424   : > { %5676 = vmatmul.msk.bf16.vlgmr.msra.gmra.mxu0 %vm2583_vm5, %v5932_v43  ;;  %v3083_v26 = vsel %vm8787_vm2, %v6325_v50, %v6330_v11  ;;  %v3084_v24 = vsel %vm8788_vm14, %v6326_v49, %v6331_v23  ;;  %v3085_v14 = vsel %vm8789_vm6, %v6330_v11, %v6325_v50  ;;  %v3086_v31 = vsel %vm8790_vm7, %v6331_v23, %v6326_v49  ;;  %vm8793_vm2 = vmmov %vm8779_vm0 }
 0x425   : > { %v3090_v10 = vpack.c.bf16 %v3086_v31, %v3085_v14  ;;  %v3091_v51 = vpack.c.bf16 %v3084_v24, %v3083_v26  ;;  %v3026_v44 = vsel %vm8791_vm4, %v6315_v15, %v6320_v25  ;;  %v3027_v53 = vsel %vm8792_vm3, %v6316_v16, %v6321_v52  ;;  %v5939_v26 = vld [vmem:[%s6900_s0 + $0x68] sm:$0xff] }
 0x426   : > { %v3028_v58 = vsel %vm8779_vm0, %v6320_v25, %v6315_v15  ;;  %v3029_v37 = vsel %vm8793_vm2, %v6321_v52, %v6316_v16  ;;  %v3034_v2 = vpack.c.bf16 %v3027_v53, %v3026_v44  ;;  %v6359_v5 = vpop.permute.xlu2 %6358  ;;  %vm8794_vm14 = vcmp.lt.s32.totalorder %v6954_v33, 2 }
 0x427   : > { %v3033_v3 = vpack.c.bf16 %v3029_v37, %v3028_v58  ;;  %3107 = vmatpush.bf16.msrb.mxu2 %v3090_v10  ;;  %3121 = vmatpush.bf16.msrb.mxu3 %v3091_v51  ;;  %v6361_v0 = vunpack.i.h.bf16 %v6359_v5  ;;  %v6360_v49 = vunpack.i.l.bf16 %v6359_v5  ;;  %vm8800_vm4 = vcmp.lt.s32.totalorder %v6943_v27, 1 }
 0x428   : > { %3064 = vmatpush.bf16.msrb.mxu1 %v3034_v2  ;;  %vm8801_vm3 = vmmov %vm8800_vm4 }
 0x429   : > { %3050 = vmatpush.bf16.msrb.mxu0 %v3033_v3  ;;  %v6334_v34 = vpop.permute.xlu0 %6333  ;;  %vm8802_vm0 = vmmov %vm8801_vm3 }
 0x42a   : > { %v6335_v30 = vunpack.i.l.bf16 %v6334_v34  ;;  %vm8803_vm2 = vmmov %vm8802_vm0 }
 0x42b   : > { %5685 = vmatmul.msk.bf16.vlgmr.msra.gmra.mxu3 %vm2583_vm5, %v5933_v17 }
 0x42c   : > { %3166 = vmatpush.bf16.msra.mxu1 %v3136_v8  ;;  %5684 = vmatmul.msk.bf16.vlgmr.msra.gmra.mxu2 %vm2583_vm5, %v5933_v17  ;;  %v6336_v8 = vunpack.i.h.bf16 %v6334_v34 }
 0x42d   : > { %3152 = vmatpush.bf16.msra.mxu0 %v3135_v54  ;;  %3197 = vmatpush.bf16.msra.mxu2 %v3180_v35 }
 0x42e   : > { %3211 = vmatpush.bf16.msra.mxu3 %v3181_v48  ;;  %v6374_v7 = vpop.permute.xlu2 %6373 }
 0x431   : > { %v6349_v55 = vpop.permute.xlu0 %6348 }
 0x433   : > { %5693 = vmatmul.msk.bf16.vlgmr.msrb.gmra.mxu1 %vm2583_vm5, %v5934_v1 }
 0x434   : > { %5692 = vmatmul.msk.bf16.vlgmr.msrb.gmra.mxu0 %vm2583_vm5, %v5934_v1  ;;  %3256 = vmatpush.bf16.msrb.mxu1 %v7516_v20  ;;  %v5940_v1 = vld [vmem:[%s6900_s0 + $0x70] sm:$0xff] }
 0x435   : > { %3242 = vmatpush.bf16.msrb.mxu0 %v7514_v18  ;;  %v6339_v18 = vpop.permute.xlu1 %6338 }
 0x436   : > { %v6341_v20 = vunpack.i.h.bf16 %v6339_v18  ;;  %v6340_v54 = vunpack.i.l.bf16 %v6339_v18  ;;  %v6389_v58 = vpop.permute.xlu2 %6388 }
 0x438   : > { %v3366_v56 = vsel %vm917_vm15, %v6336_v8, %v6341_v20  ;;  %v3368_v22 = vsel %vm917_vm15, %v6341_v20, %v6336_v8  ;;  %v3365_v35 = vsel %vm917_vm15, %v6335_v30, %v6340_v54  ;;  %v3367_v48 = vsel %vm917_vm15, %v6340_v54, %v6335_v30 }
 0x439   : > { %v3372_v36 = vpack.c.bf16 %v3366_v56, %v3365_v35  ;;  %v3373_v9 = vpack.c.bf16 %v3368_v22, %v3367_v48  ;;  %v6364_v50 = vpop.permute.xlu0 %6363  ;;  %v6376_v20 = vunpack.i.h.bf16 %v6374_v7  ;;  %v6375_v54 = vunpack.i.l.bf16 %v6374_v7  ;;  %v5941_v56 = vld [vmem:[%s6900_s0 + $0x78] sm:$0xff] }
 0x43a   : > { %v6366_v44 = vunpack.i.h.bf16 %v6364_v50  ;;  %v6365_v53 = vunpack.i.l.bf16 %v6364_v50 }
 0x43b   : > { %5701 = vmatmul.msk.bf16.vlgmr.msrb.gmra.mxu3 %vm2583_vm5, %v5935_v59 }
 0x43c   : > { %5700 = vmatmul.msk.bf16.vlgmr.msrb.gmra.mxu2 %vm2583_vm5, %v5935_v59  ;;  %3301 = vmatpush.bf16.msrb.mxu3 %v3271_v61  ;;  %v6350_v61 = vunpack.i.l.bf16 %v6349_v55 }
 0x43d   : > { %3287 = vmatpush.bf16.msrb.mxu2 %v3270_v57  ;;  %v6351_v57 = vunpack.i.h.bf16 %v6349_v55  ;;  %v6354_v29 = vpop.permute.xlu1 %6353 }
 0x43e   : > { %v3422_v19 = vsel %vm917_vm15, %v6345_v21, %v6350_v61  ;;  %v3424_v4 = vsel %vm917_vm15, %v6350_v61, %v6345_v21  ;;  %v6356_v43 = vunpack.i.h.bf16 %v6354_v29  ;;  %v6355_v23 = vunpack.i.l.bf16 %v6354_v29  ;;  %v6404_v22 = vpop.permute.xlu2 %6403 }
 0x43f   : > { %v3425_v42 = vsel %vm917_vm15, %v6351_v57, %v6346_v45  ;;  %v6390_v61 = vunpack.i.l.bf16 %v6389_v58 }
 0x440   : > { %v3430_v11 = vpack.c.bf16 %v3425_v42, %v3424_v4  ;;  %v3479_v52 = vsel %vm917_vm15, %v6355_v23, %v6360_v49  ;;  %v3480_v25 = vsel %vm917_vm15, %v6356_v43, %v6361_v0  ;;  %v3481_v16 = vsel %vm917_vm15, %v6360_v49, %v6355_v23  ;;  %v5942_v4 = vld [vmem:[%s6900_s0 + $0x80] sm:$0xff] }
 0x441   : > { %v3482_v15 = vsel %vm917_vm15, %v6361_v0, %v6356_v43  ;;  %v3486_v14 = vpack.c.bf16 %v3480_v25, %v3479_v52  ;;  %v6379_v59 = vpop.permute.xlu0 %6378 }
 0x442   : > { %v3487_v31 = vpack.c.bf16 %v3482_v15, %v3481_v16  ;;  %v6381_v13 = vunpack.i.h.bf16 %v6379_v59  ;;  %v6380_v18 = vunpack.i.l.bf16 %v6379_v59  ;;  %v5943_v15 = vld [vmem:[%s6900_s0 + $0x88] sm:$0xff] }
 0x443   : > { %5709 = vmatmul.msk.bf16.vlgmr.msra.gmra.mxu1 %vm2583_vm5, %v5936_v12 }
 0x444   : > { %5708 = vmatmul.msk.bf16.vlgmr.msra.gmra.mxu0 %vm2583_vm5, %v5936_v12  ;;  %3346 = vmatpush.bf16.msra.mxu1 %v3316_v39  ;;  %v5938_v39 = vld [vmem:[%s6900_s0 + $0x60] sm:$0xff]  ;;  %v3595_v30 = vsel %vm917_vm15, %v6380_v18, %v6375_v54  ;;  %v3593_v35 = vsel %vm917_vm15, %v6375_v54, %v6380_v18  ;;  %v3594_v48 = vsel %vm917_vm15, %v6376_v20, %v6381_v13 }
 0x445   : > { %3332 = vmatpush.bf16.msra.mxu0 %v3315_v28  ;;  %v3423_v28 = vsel %vm917_vm15, %v6346_v45, %v6351_v57  ;;  %v6369_v24 = vpop.permute.xlu1 %6368  ;;  %v6391_v57 = vunpack.i.h.bf16 %v6389_v58  ;;  %v6406_v58 = vunpack.i.h.bf16 %v6404_v22 }
 0x446   : > { %v3429_v60 = vpack.c.bf16 %v3423_v28, %v3422_v19  ;;  %v6371_v10 = vunpack.i.h.bf16 %v6369_v24  ;;  %v6370_v51 = vunpack.i.l.bf16 %v6369_v24  ;;  %v7987_v43 = vpop.permute.xlu2 %6418 }
 0x448   : > { %v3537_v37 = vsel %vm917_vm15, %v6366_v44, %v6371_v10  ;;  %v3539_v2 = vsel %vm917_vm15, %v6371_v10, %v6366_v44  ;;  %v3536_v3 = vsel %vm917_vm15, %v6365_v53, %v6370_v51  ;;  %v3538_v17 = vsel %vm917_vm15, %v6370_v51, %v6365_v53 }
 0x449   : > { %v3543_v34 = vpack.c.bf16 %v3537_v37, %v3536_v3  ;;  %v3544_v12 = vpack.c.bf16 %v3539_v2, %v3538_v17  ;;  %v6394_v45 = vpop.permute.xlu0 %6393  ;;  %v6405_v37 = vunpack.i.l.bf16 %v6404_v22 }
 0x44a   : > { %v6396_v49 = vunpack.i.h.bf16 %v6394_v45  ;;  %v6395_v50 = vunpack.i.l.bf16 %v6394_v45 }
 0x44b   : > { %5717 = vmatmul.msk.bf16.vlgmr.msra.gmra.mxu3 %vm2583_vm5, %v5937_v38 }
 0x44c   : > { %5716 = vmatmul.msk.bf16.vlgmr.msra.gmra.mxu2 %vm2583_vm5, %v5937_v38  ;;  %3403 = vmatpush.bf16.msra.mxu3 %v3373_v9  ;;  %v3596_v38 = vsel %vm917_vm15, %v6381_v13, %v6376_v20  ;;  %v3600_v9 = vpack.c.bf16 %v3594_v48, %v3593_v35 }
 0x44d   : > { %3389 = vmatpush.bf16.msra.mxu2 %v3372_v36  ;;  %v6384_v8 = vpop.permute.xlu1 %6383  ;;  %v3601_v55 = vpack.c.bf16 %v3596_v38, %v3595_v30  ;;  %v5944_v30 = vld [vmem:[%s6900_s0 + $0x90] sm:$0xff] }
 0x44e   : > { %v6386_v5 = vunpack.i.h.bf16 %v6384_v8  ;;  %v6385_v36 = vunpack.i.l.bf16 %v6384_v8  ;;  %v2443_v2 = vpop.permute.xlu2 %2442 }
 0x450   : > { %v3650_v21 = vsel %vm2147_vm1, %v6385_v36, %v6390_v61  ;;  %v3651_v29 = vsel %vm2147_vm1, %v6386_v5, %v6391_v57  ;;  %v3652_v19 = vsel %vm2147_vm1, %v6390_v61, %v6385_v36  ;;  %v3653_v28 = vsel %vm2147_vm1, %v6391_v57, %v6386_v5 }
 0x451   : > { %v3657_v23 = vpack.c.bf16 %v3651_v29, %v3650_v21  ;;  %v6409_v16 = vpop.permute.xlu0 %6408  ;;  %v6420_v57 = vunpack.i.l.bf16 %v7987_v43 }
 0x452   : > { %v6411_v51 = vunpack.i.h.bf16 %v6409_v16  ;;  %v6410_v44 = vunpack.i.l.bf16 %v6409_v16 }
 0x453   : > { %5725 = vmatmul.msk.bf16.vlgmr.msrb.gmra.mxu1 %vm2583_vm5, %v5938_v39 }
 0x454   : > { %5724 = vmatmul.msk.bf16.vlgmr.msrb.gmra.mxu0 %vm2583_vm5, %v5938_v39  ;;  %3460 = vmatpush.bf16.msrb.mxu1 %v3430_v11  ;;  %v3658_v11 = vpack.c.bf16 %v3653_v28, %v3652_v19  ;;  %v3764_v59 = vsel %vm2147_vm1, %v6405_v37, %v6410_v44  ;;  %v3766_v18 = vsel %vm2147_vm1, %v6410_v44, %v6405_v37  ;;  %v5946_v44 = vld [vmem:[%s6900_s0 + $0xa0] sm:$0xff] }
 0x455   : > { %3446 = vmatpush.bf16.msrb.mxu0 %v3429_v60  ;;  %v6399_v39 = vpop.permute.xlu1 %6398  ;;  %v3767_v20 = vsel %vm2147_vm1, %v6411_v51, %v6406_v58 }
 0x456   : > { %v6401_v7 = vunpack.i.h.bf16 %v6399_v39  ;;  %v6400_v0 = vunpack.i.l.bf16 %v6399_v39  ;;  %v5945_v39 = vld [vmem:[%s6900_s0 + $0x98] sm:$0xff] }
 0x458   : > { %v3710_v52 = vsel %vm2147_vm1, %v6401_v7, %v6396_v49  ;;  %v3709_v25 = vsel %vm2147_vm1, %v6400_v0, %v6395_v50  ;;  %v3707_v24 = vsel %vm2147_vm1, %v6395_v50, %v6400_v0 }
 0x459   : > { %v3715_v10 = vpack.c.bf16 %v3710_v52, %v3709_v25  ;;  %v6424_v28 = vpop.permute.xlu0 %6423 }
 0x45a   : > { %v6425_v50 = vunpack.i.l.bf16 %v6424_v28 }
 0x45b   : > { %5733 = vmatmul.msk.bf16.vlgmr.msrb.gmra.mxu3 %vm2583_vm5, %v5939_v26 }
 0x45c   : > { %5732 = vmatmul.msk.bf16.vlgmr.msrb.gmra.mxu2 %vm2583_vm5, %v5939_v26  ;;  %3517 = vmatpush.bf16.msrb.mxu3 %v3487_v31  ;;  %v3708_v26 = vsel %vm2147_vm1, %v6396_v49, %v6401_v7  ;;  %v6426_v7 = vunpack.i.h.bf16 %v6424_v28 }
 0x45d   : > { %3503 = vmatpush.bf16.msrb.mxu2 %v3486_v14  ;;  %v3714_v53 = vpack.c.bf16 %v3708_v26, %v3707_v24  ;;  %v6414_v3 = vpop.permute.xlu1 %6413 }
 0x45e   : > { %v6416_v5 = vunpack.i.h.bf16 %v6414_v3  ;;  %v6415_v36 = vunpack.i.l.bf16 %v6414_v3 }
 0x460   : > { %v3823_v21 = vsel %vm2147_vm1, %v6420_v57, %v6415_v36 }
 0x463   : > { %5741 = vmatmul.msk.bf16.vlgmr.msra.gmra.mxu1 %vm2583_vm5, %v5940_v1 }
 0x464   : > { %5740 = vmatmul.msk.bf16.vlgmr.msra.gmra.mxu0 %vm2583_vm5, %v5940_v1  ;;  %3574 = vmatpush.bf16.msra.mxu1 %v3544_v12 }
 0x465   : > { %3560 = vmatpush.bf16.msra.mxu0 %v3543_v34  ;;  %v3765_v34 = vsel %vm2147_vm1, %v6406_v58, %v6411_v51  ;;  %v6429_v19 = vpop.permute.xlu1 %6428 }
 0x466   : > { %v3771_v48 = vpack.c.bf16 %v3765_v34, %v3764_v59  ;;  %v6430_v49 = vunpack.i.l.bf16 %v6429_v19  ;;  %v5947_v34 = vld [vmem:[%s6900_s0 + $0xa8] sm:$0xff] }
 0x468   : > { %v3878_v26 = vsel %vm2147_vm1, %v6425_v50, %v6430_v49  ;;  %v3880_v24 = vsel %vm2147_vm1, %v6430_v49, %v6425_v50 }
 0x46b   : > { %5749 = vmatmul.msk.bf16.vlgmr.msra.gmra.mxu3 %vm2583_vm5, %v5941_v56 }
 0x46c   : > { %5748 = vmatmul.msk.bf16.vlgmr.msra.gmra.mxu2 %vm2583_vm5, %v5941_v56  ;;  %3631 = vmatpush.bf16.msra.mxu3 %v3601_v55  ;;  %v3772_v55 = vpack.c.bf16 %v3767_v20, %v3766_v18 }
 0x46d   : > { %3617 = vmatpush.bf16.msra.mxu2 %v3600_v9  ;;  %v6421_v9 = vunpack.i.h.bf16 %v7987_v43 }
 0x46f   : > { %v2596_v42 = vpop.f32.mrf.mxu0  ;;  %v3824_v29 = vsel %vm2147_vm1, %v6421_v9, %v6416_v5 }
 0x470   : > { %v2610_v60 = vpop.f32.mrf.mxu1  ;;  %v2615_v17 = vadd.f32 %v2596_v42, %v2443_v2  ;;  %v3822_v42 = vsel %vm2147_vm1, %v6416_v5, %v6421_v9  ;;  %v5949_v5 = vld [vmem:[%s6900_s0 + $0xb8] sm:$0xff] }
 0x471   : > { %v2616_v1 = vadd.f32 %v2610_v60, %v2443_v2 }
 0x473   : > { %5757 = vmatmul.msk.bf16.vlgmr.msrb.gmra.mxu1 %vm2583_vm5, %v5942_v4 }
 0x474   : > { %5756 = vmatmul.msk.bf16.vlgmr.msrb.gmra.mxu0 %vm2583_vm5, %v5942_v4  ;;  %3688 = vmatpush.bf16.msrb.mxu1 %v3658_v11  ;;  %v3821_v4 = vsel %vm2147_vm1, %v6415_v36, %v6420_v57  ;;  %v6431_v11 = vunpack.i.h.bf16 %v6429_v19  ;;  %v5950_v19 = vld [vmem:[%s6900_s0 + $0xc0] sm:$0xff] }
 0x475   : > { %3674 = vmatpush.bf16.msrb.mxu0 %v3657_v23  ;;  %v3829_v23 = vpack.c.bf16 %v3824_v29, %v3823_v21  ;;  %v3828_v0 = vpack.c.bf16 %v3822_v42, %v3821_v4 }
 0x476   : > { %v3879_v52 = vsel %vm2147_vm1, %v6426_v7, %v6431_v11  ;;  %v3881_v25 = vsel %vm2147_vm1, %v6431_v11, %v6426_v7 }
 0x477   : > { %v8000_v14 = vpop.f32.mrf.mxu0  ;;  %v3885_v3 = vpack.c.bf16 %v3879_v52, %v3878_v26 }
 0x478   : > { %v8002_v31 = vpop.f32.mrf.mxu1 }
 0x47b   : > { %5765 = vmatmul.msk.bf16.vlgmr.msrb.gmra.mxu3 %vm2583_vm5, %v5943_v15 }
 0x47c   : > { %5764 = vmatmul.msk.bf16.vlgmr.msrb.gmra.mxu2 %vm2583_vm5, %v5943_v15  ;;  %3745 = vmatpush.bf16.msrb.mxu3 %v3715_v10 }
 0x47d   : > { %3731 = vmatpush.bf16.msrb.mxu2 %v3714_v53 }
 0x47e   : > { %v2653_v12 = vpop.f32.mrf.mxu2  ;;  %v2667_v13 = vpop.f32.mrf.mxu3 }
 0x47f   : > { %v2672_v54 = vadd.f32 %v2653_v12, %v2615_v17  ;;  %v2673_v8 = vadd.f32 %v2667_v13, %v2616_v1  ;;  %v3886_v17 = vpack.c.bf16 %v3881_v25, %v3880_v24 }
 0x480   : > { %v2724_v56 = vpop.f32.mrf.mxu1 }
 0x481   : > { %v2710_v38 = vpop.f32.mrf.mxu0  ;;  %v2730_v35 = vadd.f32 %v2724_v56, %v2673_v8  ;;  %v5948_v8 = vld [vmem:[%s6900_s0 + $0xb0] sm:$0xff] }
 0x482   : > { %v2729_v22 = vadd.f32 %v2710_v38, %v2672_v54 }
 0x483   : > { %5773 = vmatmul.msk.bf16.vlgmr.msra.gmra.mxu1 %vm2583_vm5, %v5944_v30 }
 0x484   : > { %5772 = vmatmul.msk.bf16.vlgmr.msra.gmra.mxu0 %vm2583_vm5, %v5944_v30  ;;  %3802 = vmatpush.bf16.msra.mxu1 %v3772_v55 }
 0x485   : > { %3788 = vmatpush.bf16.msra.mxu0 %v3771_v48 }
 0x486   : > { %v8019_v61 = vpop.f32.mrf.mxu2  ;;  %v8021_v45 = vpop.f32.mrf.mxu3 }
 0x488   : > { %v8034_v43 = vpop.f32.mrf.mxu1 }
 0x489   : > { %v8032_v60 = vpop.f32.mrf.mxu0 }
 0x48b   : > { %5781 = vmatmul.msk.bf16.vlgmr.msra.gmra.mxu3 %vm2583_vm5, %v5945_v39 }
 0x48c   : > { %5780 = vmatmul.msk.bf16.vlgmr.msra.gmra.mxu2 %vm2583_vm5, %v5945_v39  ;;  %3859 = vmatpush.bf16.msra.mxu3 %v3829_v23 }
 0x48d   : > { %3845 = vmatpush.bf16.msra.mxu2 %v3828_v0 }
 0x48e   : > { %v2767_v16 = vpop.f32.mrf.mxu2  ;;  %v2781_v15 = vpop.f32.mrf.mxu3 }
 0x48f   : > { %v2786_v10 = vadd.f32 %v2767_v16, %v2729_v22  ;;  %v2787_v51 = vadd.f32 %v2781_v15, %v2730_v35 }
 0x490   : > { %v2838_v58 = vpop.f32.mrf.mxu1 }
 0x491   : > { %v2824_v53 = vpop.f32.mrf.mxu0  ;;  %v2844_v2 = vadd.f32 %v2838_v58, %v2787_v51 }
 0x492   : > { %v2843_v37 = vadd.f32 %v2824_v53, %v2786_v10 }
 0x493   : > { %5789 = vmatmul.msk.bf16.vlgmr.msrb.gmra.mxu1 %vm2583_vm5, %v5946_v44 }
 0x494   : > { %5788 = vmatmul.msk.bf16.vlgmr.msrb.gmra.mxu0 %vm2583_vm5, %v5946_v44  ;;  %3916 = vmatpush.bf16.msrb.mxu1 %v3886_v17 }
 0x495   : > { %3902 = vmatpush.bf16.msrb.mxu0 %v3885_v3 }
 0x496   : > { %v8049_v1 = vpop.f32.mrf.mxu2  ;;  %v8051_v59 = vpop.f32.mrf.mxu3 }
 0x498   : > { %v8056_v13 = vpop.f32.mrf.mxu1 }
 0x499   : > { %v8054_v12 = vpop.f32.mrf.mxu0 }
 0x49b   : > { %5797 = vmatmul.msk.bf16.vlgmr.msrb.gmra.mxu3 %vm2583_vm5, %v5947_v34 }
 0x49c   : > { %5796 = vmatmul.msk.bf16.vlgmr.msrb.gmra.mxu2 %vm2583_vm5, %v5947_v34 }
 0x49e   : > { %v2895_v18 = vpop.f32.mrf.mxu3 }
 0x49f   : > { %v2881_v20 = vpop.f32.mrf.mxu2  ;;  %v2901_v54 = vadd.f32 %v2895_v18, %v2844_v2 }
 0x4a0   : > { %v2900_v30 = vadd.f32 %v2881_v20, %v2843_v37  ;;  %v2952_v56 = vpop.f32.mrf.mxu1 }
 0x4a1   : > { %v2938_v38 = vpop.f32.mrf.mxu0  ;;  %v2958_v22 = vadd.f32 %v2952_v56, %v2901_v54 }
 0x4a2   : > { %v2957_v35 = vadd.f32 %v2938_v38, %v2900_v30 }
 0x4a3   : > { %5805 = vmatmul.msk.bf16.vlgmr.msra.gmra.mxu1 %vm2583_vm5, %v5948_v8 }
 0x4a4   : > { %5804 = vmatmul.msk.bf16.vlgmr.msra.gmra.mxu0 %vm2583_vm5, %v5948_v8 }
 0x4a6   : > { %v8063_v48 = vpop.f32.mrf.mxu3 }
 0x4a7   : > { %v8065_v55 = vpop.f32.mrf.mxu2 }
 0x4a8   : > { %v8070_v9 = vpop.f32.mrf.mxu1 }
 0x4a9   : > { %v8068_v36 = vpop.f32.mrf.mxu0 }
 0x4ab   : > { %5813 = vmatmul.msk.bf16.vlgmr.msra.gmra.mxu3 %vm2583_vm5, %v5949_v5 }
 0x4ac   : > { %5812 = vmatmul.msk.bf16.vlgmr.msra.gmra.mxu2 %vm2583_vm5, %v5949_v5 }
 0x4ae   : > { %v3009_v57 = vpop.f32.mrf.mxu3 }
 0x4af   : > { %v2995_v21 = vpop.f32.mrf.mxu2  ;;  %v3015_v29 = vadd.f32 %v3009_v57, %v2958_v22 }
 0x4b0   : > { %v3014_v28 = vadd.f32 %v2995_v21, %v2957_v35  ;;  %v3066_v4 = vpop.f32.mrf.mxu1 }
 0x4b1   : > { %v3052_v39 = vpop.f32.mrf.mxu0  ;;  %v3072_v42 = vadd.f32 %v3066_v4, %v3015_v29 }
 0x4b2   : > { %v3071_v23 = vadd.f32 %v3052_v39, %v3014_v28 }
 0x4b3   : > { %5821 = vmatmul.msk.bf16.vlgmr.msrb.gmra.mxu1 %vm2583_vm5, %v5950_v19 }
 0x4b4   : > { %5820 = vmatmul.msk.bf16.vlgmr.msrb.gmra.mxu0 %vm2583_vm5, %v5950_v19 }
 0x4b6   : > { %v8077_v11 = vpop.f32.mrf.mxu3 }
 0x4b7   : > { %v8079_v7 = vpop.f32.mrf.mxu2 }
 0x4b8   : > { %v8083_v49 = vpop.f32.mrf.mxu1 }
 0x4b9   : > { %v8081_v0 = vpop.f32.mrf.mxu0 }
 0x4be   : > { %v3123_v50 = vpop.f32.mrf.mxu3 }
 0x4bf   : > { %v3109_v52 = vpop.f32.mrf.mxu2  ;;  %v3129_v25 = vadd.f32 %v3123_v50, %v3072_v42 }
 0x4c0   : > { %v3128_v16 = vadd.f32 %v3109_v52, %v3071_v23  ;;  %v3168_v26 = vpop.f32.mrf.mxu1  ;;  %v2448_v52 = vpop.permute.xlu0 %2447 }
 0x4c1   : > { %v3154_v15 = vpop.f32.mrf.mxu0  ;;  %v3174_v24 = vadd.f32 %v3168_v26, %v3129_v25  ;;  %v2618_v26 = vadd.f32 %v8002_v31, %v2448_v52 }
 0x4c2   : > { %v3173_v10 = vadd.f32 %v3154_v15, %v3128_v16 }
 0x4c6   : > { %v8085_v51 = vpop.f32.mrf.mxu3 }
 0x4c7   : > { %v8087_v44 = vpop.f32.mrf.mxu2 }
 0x4c8   : > { %v8091_v58 = vpop.f32.mrf.mxu1 }
 0x4c9   : > { %v8089_v53 = vpop.f32.mrf.mxu0 }
 0x4ce   : > { %v3213_v37 = vpop.f32.mrf.mxu3 }
 0x4cf   : > { %v3199_v2 = vpop.f32.mrf.mxu2  ;;  %v3219_v3 = vadd.f32 %v3213_v37, %v3174_v24  ;;  %v2617_v24 = vadd.f32 %v8000_v14, %v2448_v52 }
 0x4d0   : > { %v3218_v17 = vadd.f32 %v3199_v2, %v3173_v10  ;;  %v3258_v18 = vpop.f32.mrf.mxu1  ;;  %v2675_v10 = vadd.f32 %v8021_v45, %v2618_v26 }
 0x4d1   : > { %v3244_v34 = vpop.f32.mrf.mxu0  ;;  %v3264_v20 = vadd.f32 %v3258_v18, %v3219_v3  ;;  %v2674_v37 = vadd.f32 %v8019_v61, %v2617_v24 }
 0x4d2   : > { %v3263_v54 = vadd.f32 %v3244_v34, %v3218_v17  ;;  %v2732_v18 = vadd.f32 %v8034_v43, %v2675_v10 }
 0x4d6   : > { %v3215_v8 = vpop.f32.mrf.mxu3 }
 0x4d7   : > { %v3201_v30 = vpop.f32.mrf.mxu2 }
 0x4d8   : > { %v3260_v56 = vpop.f32.mrf.mxu1 }
 0x4d9   : > { %v3246_v38 = vpop.f32.mrf.mxu0 }
 0x4de   : > { %v3303_v22 = vpop.f32.mrf.mxu3 }
 0x4df   : > { %v3289_v35 = vpop.f32.mrf.mxu2  ;;  %v3309_v5 = vadd.f32 %v3303_v22, %v3264_v20  ;;  %v2731_v20 = vadd.f32 %v8032_v60, %v2674_v37 }
 0x4e0   : > { %v3308_v57 = vadd.f32 %v3289_v35, %v3263_v54  ;;  %v3348_v29 = vpop.f32.mrf.mxu1  ;;  %v2789_v54 = vadd.f32 %v8051_v59, %v2732_v18 }
 0x4e1   : > { %v3334_v21 = vpop.f32.mrf.mxu0  ;;  %v3354_v19 = vadd.f32 %v3348_v29, %v3309_v5  ;;  %v2788_v22 = vadd.f32 %v8049_v1, %v2731_v20 }
 0x4e2   : > { %v3353_v28 = vadd.f32 %v3334_v21, %v3308_v57  ;;  %v2846_v31 = vadd.f32 %v8056_v13, %v2789_v54 }
 0x4e3   : > { %v2845_v45 = vadd.f32 %v8054_v12, %v2788_v22 }
 0x4e4   : > { %v2903_v57 = vadd.f32 %v8063_v48, %v2846_v31 }
 0x4e5   : > { %v2902_v21 = vadd.f32 %v8065_v55, %v2845_v45 }
 0x4e6   : > { %v3305_v39 = vpop.f32.mrf.mxu3  ;;  %v2960_v43 = vadd.f32 %v8070_v9, %v2903_v57 }
 0x4e7   : > { %v3291_v4 = vpop.f32.mrf.mxu2  ;;  %v2959_v60 = vadd.f32 %v8068_v36, %v2902_v21 }
 0x4e8   : > { %v3350_v23 = vpop.f32.mrf.mxu1  ;;  %v3017_v59 = vadd.f32 %v8077_v11, %v2960_v43 }
 0x4e9   : > { %v3336_v42 = vpop.f32.mrf.mxu0  ;;  %v3016_v52 = vadd.f32 %v8079_v7, %v2959_v60 }
 0x4ea   : > { %v3074_v12 = vadd.f32 %v8083_v49, %v3017_v59 }
 0x4eb   : > { %v3073_v24 = vadd.f32 %v8081_v0, %v3016_v52 }
 0x4ec   : > { %v3131_v48 = vadd.f32 %v8085_v51, %v3074_v12 }
 0x4ed   : > { %v3130_v55 = vadd.f32 %v8087_v44, %v3073_v24 }
 0x4ee   : > { %v3405_v50 = vpop.f32.mrf.mxu3  ;;  %v3176_v18 = vadd.f32 %v8091_v58, %v3131_v48 }
 0x4ef   : > { %v3391_v25 = vpop.f32.mrf.mxu2  ;;  %v3175_v11 = vadd.f32 %v8089_v53, %v3130_v55  ;;  %v3411_v21 = vadd.f32 %v3405_v50, %v3354_v19 }
 0x4f0   : > { %v3462_v15 = vpop.f32.mrf.mxu1  ;;  %v3221_v20 = vadd.f32 %v3215_v8, %v3176_v18  ;;  %v3410_v44 = vadd.f32 %v3391_v25, %v3353_v28 }
 0x4f1   : > { %v3448_v16 = vpop.f32.mrf.mxu0  ;;  %v3220_v7 = vadd.f32 %v3201_v30, %v3175_v11  ;;  %v3468_v52 = vadd.f32 %v3462_v15, %v3411_v21 }
 0x4f2   : > { %v3266_v22 = vadd.f32 %v3260_v56, %v3221_v20  ;;  %v3467_v24 = vadd.f32 %v3448_v16, %v3410_v44 }
 0x4f3   : > { %v3265_v49 = vadd.f32 %v3246_v38, %v3220_v7 }
 0x4f4   : > { %v3311_v57 = vadd.f32 %v3305_v39, %v3266_v22 }
 0x4f5   : > { %v3310_v51 = vadd.f32 %v3291_v4, %v3265_v49 }
 0x4f6   : > { %v3407_v2 = vpop.f32.mrf.mxu3  ;;  %v3356_v43 = vadd.f32 %v3350_v23, %v3311_v57 }
 0x4f7   : > { %v3393_v3 = vpop.f32.mrf.mxu2  ;;  %v3355_v60 = vadd.f32 %v3336_v42, %v3310_v51 }
 0x4f8   : > { %v3464_v34 = vpop.f32.mrf.mxu1  ;;  %v3413_v12 = vadd.f32 %v3407_v2, %v3356_v43 }
 0x4f9   : > { %v3450_v17 = vpop.f32.mrf.mxu0  ;;  %v3412_v53 = vadd.f32 %v3393_v3, %v3355_v60 }
 0x4fa   : > { %v3470_v55 = vadd.f32 %v3464_v34, %v3413_v12 }
 0x4fb   : > { %v3469_v38 = vadd.f32 %v3450_v17, %v3412_v53 }
 0x4fe   : > { %v3519_v35 = vpop.f32.mrf.mxu3 }
 0x4ff   : > { %v3505_v14 = vpop.f32.mrf.mxu2  ;;  %v3525_v48 = vadd.f32 %v3519_v35, %v3468_v52 }
 0x500   : > { %v3576_v61 = vpop.f32.mrf.mxu1  ;;  %v3524_v56 = vadd.f32 %v3505_v14, %v3467_v24 }
 0x501   : > { %v3562_v5 = vpop.f32.mrf.mxu0  ;;  %v3582_v18 = vadd.f32 %v3576_v61, %v3525_v48 }
 0x502   : > { %v3581_v39 = vadd.f32 %v3562_v5, %v3524_v56 }
 0x506   : > { %v3521_v29 = vpop.f32.mrf.mxu3 }
 0x507   : > { %v3507_v1 = vpop.f32.mrf.mxu2  ;;  %v3527_v11 = vadd.f32 %v3521_v29, %v3470_v55 }
 0x508   : > { %v3578_v26 = vpop.f32.mrf.mxu1  ;;  %v3526_v4 = vadd.f32 %v3507_v1, %v3469_v38 }
 0x509   : > { %v3564_v13 = vpop.f32.mrf.mxu0  ;;  %v3584_v15 = vadd.f32 %v3578_v26, %v3527_v11 }
 0x50a   : > { %v3583_v2 = vadd.f32 %v3564_v13, %v3526_v4 }
 0x50e   : > { %v3633_v10 = vpop.f32.mrf.mxu3 }
 0x50f   : > { %v3619_v9 = vpop.f32.mrf.mxu2  ;;  %v3639_v28 = vadd.f32 %v3633_v10, %v3582_v18 }
 0x510   : > { %v3690_v36 = vpop.f32.mrf.mxu1  ;;  %v3638_v42 = vadd.f32 %v3619_v9, %v3581_v39 }
 0x511   : > { %v3676_v37 = vpop.f32.mrf.mxu0  ;;  %v3696_v16 = vadd.f32 %v3690_v36, %v3639_v28 }
 0x512   : > { %v3695_v20 = vadd.f32 %v3676_v37, %v3638_v42 }
 0x516   : > { %v3635_v54 = vpop.f32.mrf.mxu3 }
 0x517   : > { %v3621_v31 = vpop.f32.mrf.mxu2  ;;  %v3641_v3 = vadd.f32 %v3635_v54, %v3584_v15 }
 0x518   : > { %v3692_v0 = vpop.f32.mrf.mxu1  ;;  %v3640_v7 = vadd.f32 %v3621_v31, %v3583_v2 }
 0x519   : > { %v3678_v45 = vpop.f32.mrf.mxu0  ;;  %v3698_v17 = vadd.f32 %v3692_v0, %v3641_v3 }
 0x51a   : > { %v3697_v29 = vadd.f32 %v3678_v45, %v3640_v7 }
 0x51e   : > { %v3747_v59 = vpop.f32.mrf.mxu3 }
 0x51f   : > { %v3733_v58 = vpop.f32.mrf.mxu2  ;;  %v3753_v35 = vadd.f32 %v3747_v59, %v3696_v16 }
 0x520   : > { %v3804_v30 = vpop.f32.mrf.mxu1  ;;  %v3752_v14 = vadd.f32 %v3733_v58, %v3695_v20 }
 0x521   : > { %v3790_v8 = vpop.f32.mrf.mxu0  ;;  %v3810_v22 = vadd.f32 %v3804_v30, %v3753_v35 }
 0x522   : > { %v3809_v49 = vadd.f32 %v3790_v8, %v3752_v14 }
 0x526   : > { %v3749_v19 = vpop.f32.mrf.mxu3 }
 0x527   : > { %v3735_v23 = vpop.f32.mrf.mxu2  ;;  %v3755_v10 = vadd.f32 %v3749_v19, %v3698_v17 }
 0x528   : > { %v3806_v25 = vpop.f32.mrf.mxu1  ;;  %v3754_v9 = vadd.f32 %v3735_v23, %v3697_v29 }
 0x529   : > { %v3792_v50 = vpop.f32.mrf.mxu0  ;;  %v3812_v26 = vadd.f32 %v3806_v25, %v3755_v10 }
 0x52a   : > { %v3811_v13 = vadd.f32 %v3792_v50, %v3754_v9 }
 0x52e   : > { %v3861_v34 = vpop.f32.mrf.mxu3 }
 0x52f   : > { %v3847_v61 = vpop.f32.mrf.mxu2  ;;  %v3867_v57 = vadd.f32 %v3861_v34, %v3810_v22 }
 0x530   : > { %v3918_v1 = vpop.f32.mrf.mxu1  ;;  %v3866_v51 = vadd.f32 %v3847_v61, %v3809_v49 }
 0x531   : > { %v3904_v5 = vpop.f32.mrf.mxu0  ;;  %v3924_v54 = vadd.f32 %v3918_v1, %v3867_v57 }
 0x532   : > { %v3923_v21 = vadd.f32 %v3904_v5, %v3866_v51 }
 0x533   : > { %v3928_v59 = vmax.f32 %v3924_v54, 0.0 }
 0x534   : > { %v3927_v12 = vmax.f32 %v3923_v21, 0.0 }
 0x536   : > { %v3863_v36 = vpop.f32.mrf.mxu3 }
 0x537   : > { %v3849_v37 = vpop.f32.mrf.mxu2  ;;  %v3869_v31 = vadd.f32 %v3863_v36, %v3812_v26 }
 0x538   : > { %v3868_v44 = vadd.f32 %v3849_v37, %v3811_v13  ;;  %v3920_v0 = vpop.f32.mrf.mxu1 }
 0x539   : > { %v3906_v43 = vpop.f32.mrf.mxu0  ;;  %v3926_v60 = vadd.f32 %v3920_v0, %v3869_v31 }
 0x53a   : > { %v3925_v45 = vadd.f32 %v3906_v43, %v3868_v44 }
 0x53b   : > { %v3930_v52 = vmax.f32 %v3926_v60, 0.0 }
 0x53c   : > { %v3929_v58 = vmax.f32 %v3925_v45, 0.0 }
 0x53d   : > { %v8115_v24 = vpack.i.bf16 %v3930_v52, %v3928_v59  ;;  %v8127_v30 = vpack.c.bf16 %v3930_v52, %v3928_v59 }
 0x53e   : > { %v8117_v53 = vpack.i.bf16 %v3929_v58, %v3927_v12  ;;  %v8125_v8 = vpack.c.bf16 %v3929_v58, %v3927_v12 }
 0x53f   : > { %6439 = vrot.lane.b32.xlu2 %v8115_v24, %s6764_s16 }
 0x540   : > { %6454 = vrot.lane.b32.xlu0 %v8117_v53, %s6759_s3  ;;  %6434 = vrot.lane.b32.xlu1 %v8117_v53, %s6764_s16 }
 0x547   : > { %6449 = vrot.lane.b32.xlu2 %v8115_v24, %s6766_s20 }
 0x548   : > { %6444 = vrot.lane.b32.xlu1 %v8117_v53, %s6766_s20  ;;  %6469 = vrot.lane.b32.xlu0 %v8115_v24, %s6760_s4 }
 0x54f   : > { %6464 = vrot.lane.b32.xlu2 %v8117_v53, %s6760_s4 }
 0x550   : > { %6484 = vrot.lane.b32.xlu0 %v8117_v53, %s6768_s26  ;;  %6459 = vrot.lane.b32.xlu1 %v8115_v24, %s6759_s3 }
 0x557   : > { %6479 = vrot.lane.b32.xlu2 %v8115_v24, %s6767_s21 }
 0x558   : > { %6499 = vrot.lane.b32.xlu0 %v8115_v24, %s6761_s5  ;;  %6474 = vrot.lane.b32.xlu1 %v8117_v53, %s6767_s21 }
 0x55f   : > { %6494 = vrot.lane.b32.xlu2 %v8117_v53, %s6761_s5 }
 0x560   : > { %6489 = vrot.lane.b32.xlu1 %v8115_v24, %s6768_s26 }
 0x567   : > { %6509 = vrot.lane.b32.xlu2 %v8115_v24, %s6762_s7 }
 0x568   : > { %6504 = vrot.lane.b32.xlu1 %v8117_v53, %s6762_s7 }
 0x56f   : > { %6524 = vrot.lane.b32.xlu2 %v8117_v53, %s6769_s14 }
 0x599   : > { %v6440_v48 = vpop.permute.xlu2 %6439 }
 0x59a   : > { %v6442_v39 = vunpack.i.h.bf16 %v6440_v48  ;;  %v6441_v4 = vunpack.i.l.bf16 %v6440_v48 }
 0x5a1   : > { %v6450_v56 = vpop.permute.xlu2 %6449 }
 0x5a2   : > { %v6452_v23 = vunpack.i.h.bf16 %v6450_v56  ;;  %v6451_v42 = vunpack.i.l.bf16 %v6450_v56 }
 0x5a9   : > { %v6465_v19 = vpop.permute.xlu2 %6464 }
 0x5aa   : > { %v6467_v9 = vunpack.i.h.bf16 %v6465_v19  ;;  %v6466_v57 = vunpack.i.l.bf16 %v6465_v19 }
 0x5b1   : > { %v6480_v21 = vpop.permute.xlu2 %6479 }
 0x5b2   : > { %v6435_v55 = vpop.permute.xlu1 %6434  ;;  %v6455_v38 = vpop.permute.xlu0 %6454 }
 0x5b3   : > { %v6437_v18 = vunpack.i.h.bf16 %v6435_v55  ;;  %v6436_v11 = vunpack.i.l.bf16 %v6435_v55  ;;  %v6457_v36 = vunpack.i.h.bf16 %v6455_v38  ;;  %v6456_v54 = vunpack.i.l.bf16 %v6455_v38 }
 0x5b5   : > { %v3945_v15 = vsel %vm1081_vm11, %v6436_v11, %v6441_v4  ;;  %v3946_v2 = vsel %vm1081_vm11, %v6437_v18, %v6442_v39  ;;  %v3947_v16 = vsel %vm1081_vm11, %v6441_v4, %v6436_v11  ;;  %v3948_v3 = vsel %vm1081_vm11, %v6442_v39, %v6437_v18  ;;  %vm8795_vm11 = vmmov %vm8794_vm14 }
 0x5ba   : > { %v6445_v28 = vpop.permute.xlu1 %6444  ;;  %v6470_v34 = vpop.permute.xlu0 %6469 }
 0x5bb   : > { %v6447_v50 = vunpack.i.h.bf16 %v6445_v28  ;;  %v6446_v25 = vunpack.i.l.bf16 %v6445_v28  ;;  %v6472_v1 = vunpack.i.h.bf16 %v6470_v34  ;;  %v6471_v22 = vunpack.i.l.bf16 %v6470_v34  ;;  %v6495_v28 = vpop.permute.xlu2 %6494 }
 0x5bd   : > { %v3957_v20 = vsel %vm1093_vm12, %v6446_v25, %v6451_v42  ;;  %v3958_v7 = vsel %vm1093_vm12, %v6447_v50, %v6452_v23  ;;  %v3959_v35 = vsel %vm1093_vm12, %v6451_v42, %v6446_v25  ;;  %v3960_v14 = vsel %vm1093_vm12, %v6452_v23, %v6447_v50 }
 0x5be   : > { %v8175_v17 = vsel %vm1096_vm13, %v3957_v20, %v3947_v16  ;;  %v8179_v61 = vsel %vm8794_vm14, %v3959_v35, %v3945_v15  ;;  %v8183_v29 = vsel %vm1096_vm13, %v3958_v7, %v3948_v3  ;;  %v8187_v5 = vsel %vm8795_vm11, %v3960_v14, %v3946_v2 }
 0x5bf   : > { %v8191_v10 = vpack.i.bf16 %v8183_v29, %v8175_v17  ;;  %v8195_v49 = vpack.i.bf16 %v8187_v5, %v8179_v61  ;;  %v4520_v26 = vpack.c.bf16 %v8183_v29, %v8175_v17  ;;  %v4521_v13 = vpack.c.bf16 %v8187_v5, %v8179_v61  ;;  %v5842_v61 = vld [vmem:[%s6895_s2 + $0x7] sm:$0x1]  ;;  %v5845_v29 = vld [vmem:[%s6895_s2 + $0x8] sm:$0x1] }
 0x5c0   : > { %vm8796_vm12 = vcmp.lt.s32.totalorder %v6943_v27, 113  ;;  %vm8804_vm14 = vcmp.lt.s32.totalorder %v6952_v32, 1  ;;  %vm8805_vm11 = vcmp.lt.s32.totalorder %v6954_v33, 1  ;;  %v6482_v50 = vunpack.i.h.bf16 %v6480_v21 }
 0x5c1   : > { %6514 = vrot.lane.b32.xlu0 %v8191_v10, %s6769_s14  ;;  %6519 = vrot.lane.b32.xlu1 %v8195_v49, %s6769_s14  ;;  %v3985_v44 = vsel %vm8796_vm12, %v6466_v57, %v6471_v22  ;;  %vm8797_vm13 = vmmov %vm8796_vm12  ;;  %v6481_v25 = vunpack.i.l.bf16 %v6480_v21 }
 0x5c2   : > { %v6460_v51 = vpop.permute.xlu1 %6459  ;;  %v3986_v43 = vsel %vm8797_vm13, %v6467_v9, %v6472_v1  ;;  %vm8798_vm6 = vmmov %vm8796_vm12  ;;  %v6485_v4 = vpop.permute.xlu0 %6484 }
 0x5c3   : > { %v6462_v37 = vunpack.i.h.bf16 %v6460_v51  ;;  %v6461_v31 = vunpack.i.l.bf16 %v6460_v51  ;;  %v3987_v0 = vsel %vm8798_vm6, %v6471_v22, %v6466_v57  ;;  %vm8799_vm7 = vmmov %vm8798_vm6  ;;  %v6487_v2 = vunpack.i.h.bf16 %v6485_v4 }
 0x5c4   : > { %v3988_v60 = vsel %vm8799_vm7, %v6472_v1, %v6467_v9  ;;  %vm8806_vm12 = vmmov %vm8804_vm14  ;;  %v6486_v16 = vunpack.i.l.bf16 %v6485_v4  ;;  %vm8808_vm6 = vcmp.ge.s32.totalorder %v6954_v33, 14 }
 0x5c5   : > { %v3974_v45 = vsel %vm8800_vm4, %v6457_v36, %v6462_v37  ;;  %v3976_v59 = vsel %vm8801_vm3, %v6462_v37, %v6457_v36  ;;  %v3973_v52 = vsel %vm8802_vm0, %v6456_v54, %v6461_v31  ;;  %v3975_v12 = vsel %vm8803_vm2, %v6461_v31, %v6456_v54  ;;  %vm8807_vm13 = vmmov %vm8805_vm11 }
 0x5c6   : > { %v8223_v58 = vsel %vm8804_vm14, %v3985_v44, %v3975_v12  ;;  %v8227_v48 = vsel %vm8805_vm11, %v3987_v0, %v3973_v52  ;;  %v8231_v56 = vsel %vm8806_vm12, %v3986_v43, %v3976_v59  ;;  %v8235_v55 = vsel %vm8807_vm13, %v3988_v60, %v3974_v45  ;;  %v6510_v60 = vpop.permute.xlu2 %6509 }
 0x5c7   : > { %v8239_v38 = vpack.i.bf16 %v8235_v55, %v8227_v48  ;;  %v8243_v18 = vpack.i.bf16 %v8231_v56, %v8223_v58  ;;  %v4555_v11 = vpack.c.bf16 %v8231_v56, %v8223_v58  ;;  %v4556_v39 = vpack.c.bf16 %v8235_v55, %v8227_v48 }
 0x5c8   : > { %v6497_v52 = vunpack.i.h.bf16 %v6495_v28  ;;  %v6496_v12 = vunpack.i.l.bf16 %v6495_v28  ;;  %vm8814_vm3 = vcmp.lt.s32.totalorder %v6943_v27, 15  ;;  %vm8818_vm11 = vcmp.ge.s32.totalorder %v6952_v32, 15 }
 0x5c9   : > { %6539 = vrot.lane.b32.xlu2 %v8239_v38, %s6769_s14  ;;  %6529 = vrot.lane.b32.xlu0 %v8115_v24, %s6769_s14  ;;  %vm8815_vm0 = vmmov %vm8814_vm3  ;;  %vm8819_vm12 = vcmp.ge.s32.totalorder %v6954_v33, 15  ;;  %v3931_v33 = vld [vmem:[%s6890_s29] sm:$0x3] }
 0x5ca   : > { %6534 = vrot.lane.b32.xlu1 %v8243_v18, %s6769_s14  ;;  %v6475_v19 = vpop.permute.xlu1 %6474  ;;  %v6500_v7 = vpop.permute.xlu0 %6499  ;;  %vm8816_vm2 = vmmov %vm8815_vm0 }
 0x5cb   : > { %v6477_v23 = vunpack.i.h.bf16 %v6475_v19  ;;  %v6476_v42 = vunpack.i.l.bf16 %v6475_v19  ;;  %v6502_v21 = vunpack.i.h.bf16 %v6500_v7  ;;  %v6501_v44 = vunpack.i.l.bf16 %v6500_v7  ;;  %vm8817_vm14 = vmmov %vm8815_vm0 }
 0x5cc   : > { %v6512_v19 = vunpack.i.h.bf16 %v6510_v60  ;;  %vm8820_vm13 = vmmov %vm8818_vm11 }
 0x5cd   : > { %v4029_v35 = vsel %vm1113_vm10, %v6476_v42, %v6481_v25  ;;  %v4030_v14 = vsel %vm1113_vm10, %v6477_v23, %v6482_v50  ;;  %v4031_v34 = vsel %vm1113_vm10, %v6481_v25, %v6476_v42  ;;  %v4032_v1 = vsel %vm1113_vm10, %v6482_v50, %v6477_v23  ;;  %vm8809_vm10 = vmmov %vm8808_vm6 }
 0x5ce   : > { %v6511_v23 = vunpack.i.l.bf16 %v6510_v60 }
 0x5d2   : > { %v6490_v15 = vpop.permute.xlu1 %6489 }
 0x5d3   : > { %v6492_v3 = vunpack.i.h.bf16 %v6490_v15  ;;  %v6491_v20 = vunpack.i.l.bf16 %v6490_v15 }
 0x5d5   : > { %v4042_v22 = vsel %vm1125_vm9, %v6487_v2, %v6492_v3  ;;  %v4044_v9 = vsel %vm1125_vm9, %v6492_v3, %v6487_v2  ;;  %v4041_v57 = vsel %vm1125_vm9, %v6486_v16, %v6491_v20  ;;  %v4043_v51 = vsel %vm1125_vm9, %v6491_v20, %v6486_v16 }
 0x5d6   : > { %v8273_v36 = vsel %vm1128_vm8, %v4043_v51, %v4029_v35  ;;  %v8277_v54 = vsel %vm8808_vm6, %v4041_v57, %v4031_v34  ;;  %v8281_v37 = vsel %vm1128_vm8, %v4044_v9, %v4030_v14  ;;  %v8285_v31 = vsel %vm8809_vm10, %v4042_v22, %v4032_v1  ;;  %vm8821_vm6 = vmmov %vm8819_vm12 }
 0x5d7   : > { %v6543_v43 = vpack.i.bf16 %v8281_v37, %v8273_v36  ;;  %v6548_v0 = vpack.i.bf16 %v8285_v31, %v8277_v54  ;;  %v4660_v45 = vpack.c.bf16 %v8281_v37, %v8273_v36  ;;  %v4661_v59 = vpack.c.bf16 %v8285_v31, %v8277_v54 }
 0x5d8   : > { %vm8810_vm8 = vcmp.lt.s32.totalorder %v6943_v27, 127  ;;  %vm8822_vm10 = vcmp.lt.s32.totalorder %v6943_v27, 32 }
 0x5d9   : > { %6544 = vrot.lane.b32.xlu0 %v6543_v43, %s6769_s14  ;;  %6549 = vrot.lane.b32.xlu1 %v6548_v0, %s6769_s14  ;;  %v4001_v25 = vsel %vm8810_vm8, %v6496_v12, %v6501_v44  ;;  %vm8811_vm9 = vmmov %vm8810_vm8 }
 0x5da   : > { %v6505_v4 = vpop.permute.xlu1 %6504  ;;  %v4002_v15 = vsel %vm8811_vm9, %v6497_v52, %v6502_v21  ;;  %vm8812_vm7 = vmmov %vm8810_vm8 }
 0x5db   : > { %v6507_v42 = vunpack.i.h.bf16 %v6505_v4  ;;  %v6506_v50 = vunpack.i.l.bf16 %v6505_v4  ;;  %v4003_v2 = vsel %vm8812_vm7, %v6501_v44, %v6496_v12  ;;  %vm8813_vm4 = vmmov %vm8812_vm7  ;;  %v566_v44 = vld [vmem:[%s6875_s13] sm:$0x3] }
 0x5dc   : > { %v4004_v16 = vsel %vm8813_vm4, %v6502_v21, %v6497_v52  ;;  %vm8823_vm8 = vmmov %vm8822_vm10  ;;  %v4061_v4 = vld [vmem:[%s6895_s2] sm:$0x1] }
 0x5dd   : > { %v4013_v28 = vsel %vm8814_vm3, %v6506_v50, %v6511_v23  ;;  %v4014_v3 = vsel %vm8815_vm0, %v6507_v42, %v6512_v19  ;;  %v4015_v20 = vsel %vm8816_vm2, %v6511_v23, %v6506_v50  ;;  %v4016_v7 = vsel %vm8817_vm14, %v6512_v19, %v6507_v42  ;;  %vm8824_vm9 = vmmov %vm8823_vm8 }
 0x5de   : > { %v8315_v35 = vsel %vm8818_vm11, %v4015_v20, %v4001_v25  ;;  %v8319_v14 = vsel %vm8819_vm12, %v4013_v28, %v4003_v2  ;;  %v8323_v34 = vsel %vm8820_vm13, %v4016_v7, %v4002_v15  ;;  %v8327_v1 = vsel %vm8821_vm6, %v4014_v3, %v4004_v16  ;;  %vm8825_vm7 = vmmov %vm8823_vm8 }
 0x5df   : > { %v6553_v22 = vpack.i.bf16 %v8323_v34, %v8315_v35  ;;  %v6558_v9 = vpack.i.bf16 %v8327_v1, %v8319_v14  ;;  %v4625_v57 = vpack.c.bf16 %v8323_v34, %v8315_v35  ;;  %v4626_v32 = vpack.c.bf16 %v8327_v1, %v8319_v14  ;;  %vm8826_vm4 = vmmov %vm8825_vm7 }
 0x5e0   : > { %vm8827_vm3 = vmmov %vm8826_vm4 }
 0x5e1   : > { %6554 = vrot.lane.b32.xlu2 %v6553_v22, %s6769_s14  ;;  %6559 = vrot.lane.b32.xlu0 %v6558_v9, %s6769_s14  ;;  %vm8828_vm0 = vmmov %vm8827_vm3 }
 0x5e2   : > { %6564 = vrot.lane.b32.xlu1 %v8243_v18, %s6763_s15  ;;  %vm8829_vm2 = vmmov %vm8828_vm0 }
 0x5e3   : > { %vm8830_vm14 = vmmov %vm8828_vm0 }
 0x5e4   : > { %vm8831_vm11 = vmmov %vm8828_vm0 }
 0x5e5   : > { %vm8832_vm12 = vmmov %vm8828_vm0 }
 0x5e6   : > { %vm8833_vm13 = vmmov %vm8828_vm0 }
 0x5e7   : > { %vm8834_vm6 = vmmov %vm8828_vm0 }
 0x5e9   : > { %6569 = vrot.lane.b32.xlu2 %v8239_v38, %s6763_s15  ;;  %6574 = vrot.lane.b32.xlu0 %v8191_v10, %s6763_s15 }
 0x5ea   : > { %6579 = vrot.lane.b32.xlu1 %v8195_v49, %s6763_s15 }
 0x5f1   : > { %6584 = vrot.lane.b32.xlu2 %v6553_v22, %s6763_s15  ;;  %6589 = vrot.lane.b32.xlu0 %v6558_v9, %s6763_s15 }
 0x5f2   : > { %6594 = vrot.lane.b32.xlu1 %v8117_v53, %s6763_s15 }
 0x5f9   : > { %6599 = vrot.lane.b32.xlu2 %v8115_v24, %s6763_s15  ;;  %6604 = vrot.lane.b32.xlu0 %v6543_v43, %s6763_s15 }
 0x5fa   : > { %6609 = vrot.lane.b32.xlu1 %v6548_v0, %s6763_s15 }
 0x601   : > { %6614 = vrot.lane.b32.xlu2 %v8243_v18, %s6765_s19  ;;  %6619 = vrot.lane.b32.xlu0 %v8239_v38, %s6765_s19 }
 0x602   : > { %6624 = vrot.lane.b32.xlu1 %v8191_v10, %s6765_s19 }
 0x609   : > { %6634 = vrot.lane.b32.xlu0 %v6553_v22, %s6765_s19  ;;  %6629 = vrot.lane.b32.xlu2 %v8195_v49, %s6765_s19 }
 0x60a   : > { %6639 = vrot.lane.b32.xlu1 %v6558_v9, %s6765_s19 }
 0x611   : > { %6649 = vrot.lane.b32.xlu0 %v8115_v24, %s6765_s19  ;;  %6644 = vrot.lane.b32.xlu2 %v8117_v53, %s6765_s19 }
 0x612   : > { %6654 = vrot.lane.b32.xlu1 %v8191_v10, %s6770_s24 }
 0x619   : > { %6664 = vrot.lane.b32.xlu0 %v6543_v43, %s6765_s19  ;;  %6659 = vrot.lane.b32.xlu2 %v8195_v49, %s6770_s24 }
 0x61a   : > { %6669 = vrot.lane.b32.xlu1 %v6548_v0, %s6765_s19 }
 0x621   : > { %6679 = vrot.lane.b32.xlu0 %v8115_v24, %s6770_s24  ;;  %6674 = vrot.lane.b32.xlu2 %v8117_v53, %s6770_s24  ;;  %v6525_v24 = vpop.permute.xlu2 %6524 }
 0x622   : > { %6684 = vrot.lane.b32.xlu1 %v8243_v18, %s6770_s24  ;;  %v6527_v23 = vunpack.i.h.bf16 %v6525_v24  ;;  %v6526_v42 = vunpack.i.l.bf16 %v6525_v24 }
 0x629   : > { %6694 = vrot.lane.b32.xlu0 %v6543_v43, %s6770_s24  ;;  %6689 = vrot.lane.b32.xlu2 %v8239_v38, %s6770_s24  ;;  %v6540_v19 = vpop.permute.xlu2 %6539 }
 0x62a   : > { %6699 = vrot.lane.b32.xlu1 %v6548_v0, %s6770_s24  ;;  %v6542_v3 = vunpack.i.h.bf16 %v6540_v19  ;;  %v6541_v20 = vunpack.i.l.bf16 %v6540_v19 }
 0x631   : > { %6709 = vrot.lane.b32.xlu0 %v6558_v9, %s6770_s24  ;;  %6704 = vrot.lane.b32.xlu2 %v6553_v22, %s6770_s24 }
 0x632   : > { %3934 = vperm.xlu1 %6150, %v3931_v33  }
 0x633   : > { %v6515_v10 = vpop.permute.xlu0 %6514  ;;  %v6520_v53 = vpop.permute.xlu1 %6519 }
 0x634   : > { %v6517_v49 = vunpack.i.h.bf16 %v6515_v10  ;;  %v6516_v51 = vunpack.i.l.bf16 %v6515_v10  ;;  %v6522_v18 = vunpack.i.h.bf16 %v6520_v53  ;;  %v6521_v21 = vunpack.i.l.bf16 %v6520_v53 }
 0x636   : > { %v4058_v38 = vsel %vm8822_vm10, %v6517_v49, %v6522_v18  ;;  %v4060_v43 = vsel %vm8823_vm8, %v6522_v18, %v6517_v49  ;;  %v4057_v0 = vsel %vm8824_vm9, %v6516_v51, %v6521_v21  ;;  %v4059_v60 = vsel %vm8825_vm7, %v6521_v21, %v6516_v51  ;;  %vm8835_vm10 = vmmov %vm8828_vm0 }
 0x637   : > { %v4062_v52 = vpack.c.bf16 %v4060_v43, %v4059_v60  ;;  %v4063_v12 = vpack.c.bf16 %v4058_v38, %v4057_v0  ;;  %v5824_v43 = vld [vmem:[%s6895_s2 + $0x1] sm:$0x1]  ;;  %v5827_v0 = vld [vmem:[%s6895_s2 + $0x2] sm:$0x1]  ;;  %vm8836_vm8 = vmmov %vm8828_vm0 }
 0x638   : > { %vm8837_vm9 = vmmov %vm8828_vm0 }
 0x639   : > { %569 = vperm.xlu2 %6151, %v566_v44   ;;  %4074 = vmatpush.bf16.msrb.mxu2 %v4062_v52  ;;  %vm8838_vm7 = vmmov %vm8828_vm0 }
 0x63a   : > { %4087 = vmatpush.bf16.msrb.mxu3 %v4063_v12 }
 0x63b   : > { %v6530_v50 = vpop.permute.xlu0 %6529  ;;  %v6555_v38 = vpop.permute.xlu2 %6554 }
 0x63c   : > { %v6535_v25 = vpop.permute.xlu1 %6534  ;;  %v6532_v15 = vunpack.i.h.bf16 %v6530_v50  ;;  %v6531_v2 = vunpack.i.l.bf16 %v6530_v50  ;;  %5822 = vmatmul.msk.bf16.vlgmr.msrb.gmra.mxu2 %vm2583_vm5, %v4061_v4 }
 0x63d   : > { %v6537_v16 = vunpack.i.h.bf16 %v6535_v25  ;;  %v6536_v28 = vunpack.i.l.bf16 %v6535_v25  ;;  %5823 = vmatmul.msk.bf16.vlgmr.msrb.gmra.mxu3 %vm2583_vm5, %v4061_v4 }
 0x63e   : > { %v4151_v7 = vsel %vm8826_vm4, %v6527_v23, %v6532_v15  ;;  %v4153_v22 = vsel %vm8827_vm3, %v6532_v15, %v6527_v23  ;;  %v4150_v9 = vsel %vm8828_vm0, %v6526_v42, %v6531_v2  ;;  %v4152_v33 = vsel %vm8829_vm2, %v6531_v2, %v6526_v42  ;;  %vm8839_vm4 = vmmov %vm8828_vm0 }
 0x63f   : > { %v4156_v24 = vpack.c.bf16 %v4153_v22, %v4152_v33  ;;  %v4157_v10 = vpack.c.bf16 %v4151_v7, %v4150_v9  ;;  %v4104_v53 = vsel %vm8830_vm14, %v6537_v16, %v6542_v3  ;;  %v4106_v49 = vsel %vm8831_vm11, %v6542_v3, %v6537_v16  ;;  %vm8840_vm3 = vmmov %vm8828_vm0 }
 0x640   : > { %v4103_v51 = vsel %vm8832_vm12, %v6536_v28, %v6541_v20  ;;  %v4105_v18 = vsel %vm8833_vm13, %v6541_v20, %v6536_v28  ;;  %v6557_v20 = vunpack.i.h.bf16 %v6555_v38  ;;  %v6556_v7 = vunpack.i.l.bf16 %v6555_v38 }
 0x641   : > { %v4109_v21 = vpack.c.bf16 %v4106_v49, %v4105_v18  ;;  %v4110_v44 = vpack.c.bf16 %v4104_v53, %v4103_v51  ;;  %4168 = vmatpush.bf16.msra.mxu2 %v4156_v24  ;;  %4181 = vmatpush.bf16.msra.mxu3 %v4157_v10  ;;  %vm8841_vm2 = vcmp.lt.s32.totalorder %v6943_v27, 16 }
 0x642   : > { %vm8842_vm14 = vmmov %vm8841_vm2 }
 0x643   : > { %4121 = vmatpush.bf16.msra.mxu0 %v4109_v21  ;;  %4134 = vmatpush.bf16.msra.mxu1 %v4110_v44  ;;  %v6570_v42 = vpop.permute.xlu2 %6569  ;;  %vm8843_vm11 = vmmov %vm8841_vm2 }
 0x644   : > { %v6572_v24 = vunpack.i.h.bf16 %v6570_v42  ;;  %v6571_v10 = vunpack.i.l.bf16 %v6570_v42  ;;  %vm8844_vm12 = vmmov %vm8841_vm2  ;;  %v5830_v42 = vld [vmem:[%s6895_s2 + $0x3] sm:$0x1] }
 0x645   : > { %vm8845_vm13 = vmmov %vm8841_vm2 }
 0x646   : > { %5825 = vmatmul.msk.bf16.vlgmr.msra.gmra.mxu0 %vm2583_vm5, %v5824_v43  ;;  %5826 = vmatmul.msk.bf16.vlgmr.msra.gmra.mxu1 %vm2583_vm5, %v5824_v43 }
 0x64b   : > { %v6545_v60 = vpop.permute.xlu0 %6544  ;;  %v6550_v4 = vpop.permute.xlu1 %6549 }
 0x64c   : > { %v6547_v52 = vunpack.i.h.bf16 %v6545_v60  ;;  %v6546_v12 = vunpack.i.l.bf16 %v6545_v60  ;;  %v6552_v19 = vunpack.i.h.bf16 %v6550_v4  ;;  %v6551_v23 = vunpack.i.l.bf16 %v6550_v4  ;;  %5828 = vmatmul.msk.bf16.vlgmr.msra.gmra.mxu2 %vm2583_vm5, %v5827_v0 }
 0x64d   : > { %5829 = vmatmul.msk.bf16.vlgmr.msra.gmra.mxu3 %vm2583_vm5, %v5827_v0 }
 0x64e   : > { %v4245_v50 = vsel %vm8834_vm6, %v6547_v52, %v6552_v19  ;;  %v4247_v25 = vsel %vm8835_vm10, %v6552_v19, %v6547_v52  ;;  %v4244_v15 = vsel %vm8836_vm8, %v6546_v12, %v6551_v23  ;;  %v4246_v2 = vsel %vm8837_vm9, %v6551_v23, %v6546_v12  ;;  %v6585_v52 = vpop.permute.xlu2 %6584  ;;  %vm8846_vm6 = vmmov %vm8841_vm2 }
 0x64f   : > { %v4250_v16 = vpack.c.bf16 %v4247_v25, %v4246_v2  ;;  %v4251_v28 = vpack.c.bf16 %v4245_v50, %v4244_v15  ;;  %v5833_v50 = vld [vmem:[%s6895_s2 + $0x4] sm:$0x1]  ;;  %vm8847_vm10 = vmmov %vm8841_vm2 }
 0x650   : > { %vm8848_vm8 = vmmov %vm8841_vm2 }
 0x651   : > { %4262 = vmatpush.bf16.msrb.mxu2 %v4250_v16  ;;  %4275 = vmatpush.bf16.msrb.mxu3 %v4251_v28  ;;  %vm8849_vm9 = vmmov %vm8841_vm2 }
 0x653   : > { %v6560_v3 = vpop.permute.xlu0 %6559 }
 0x654   : > { %v6562_v22 = vunpack.i.h.bf16 %v6560_v3  ;;  %v6561_v9 = vunpack.i.l.bf16 %v6560_v3  ;;  %v6565_v33 = vpop.permute.xlu1 %6564 }
 0x655   : > { %v6567_v53 = vunpack.i.h.bf16 %v6565_v33  ;;  %v6566_v49 = vunpack.i.l.bf16 %v6565_v33 }
 0x656   : > { %v4198_v51 = vsel %vm8838_vm7, %v6557_v20, %v6562_v22  ;;  %v4200_v18 = vsel %vm8839_vm4, %v6562_v22, %v6557_v20  ;;  %v4197_v21 = vsel %vm8840_vm3, %v6556_v7, %v6561_v9  ;;  %v4199_v44 = vsel %vm8828_vm0, %v6561_v9, %v6556_v7  ;;  %vm8850_vm7 = vmmov %vm8841_vm2 }
 0x657   : > { %v4203_v38 = vpack.c.bf16 %v4200_v18, %v4199_v44  ;;  %v4204_v43 = vpack.c.bf16 %v4198_v51, %v4197_v21  ;;  %v4339_v0 = vsel %vm8841_vm2, %v6567_v53, %v6572_v24  ;;  %v4341_v60 = vsel %vm8842_vm14, %v6572_v24, %v6567_v53  ;;  %vm8851_vm4 = vmmov %vm8841_vm2 }
 0x658   : > { %v4338_v12 = vsel %vm8843_vm11, %v6566_v49, %v6571_v10  ;;  %v4340_v4 = vsel %vm8844_vm12, %v6571_v10, %v6566_v49  ;;  %v6600_v10 = vpop.permute.xlu2 %6599  ;;  %v6587_v49 = vunpack.i.h.bf16 %v6585_v52  ;;  %v6586_v51 = vunpack.i.l.bf16 %v6585_v52  ;;  %vm8852_vm3 = vmmov %vm8841_vm2 }
 0x659   : > { %v4344_v19 = vpack.c.bf16 %v4341_v60, %v4340_v4  ;;  %v4345_v23 = vpack.c.bf16 %v4339_v0, %v4338_v12  ;;  %4215 = vmatpush.bf16.msrb.mxu0 %v4203_v38  ;;  %4228 = vmatpush.bf16.msrb.mxu1 %v4204_v43  ;;  %v6602_v38 = vunpack.i.h.bf16 %v6600_v10  ;;  %v6601_v43 = vunpack.i.l.bf16 %v6600_v10  ;;  %vm8853_vm0 = vmmov %vm8841_vm2 }
 0x65a   : > { %vm8854_vm2 = vmmov %vm8853_vm0 }
 0x65b   : > { %4356 = vmatpush.bf16.msra.mxu2 %v4344_v19  ;;  %4369 = vmatpush.bf16.msra.mxu3 %v4345_v23  ;;  %v6575_v25 = vpop.permute.xlu0 %6574  ;;  %vm8855_vm14 = vmmov %vm8853_vm0 }
 0x65c   : > { %v6577_v15 = vunpack.i.h.bf16 %v6575_v25  ;;  %v6576_v2 = vunpack.i.l.bf16 %v6575_v25  ;;  %v6580_v16 = vpop.permute.xlu1 %6579  ;;  %5831 = vmatmul.msk.bf16.vlgmr.msrb.gmra.mxu0 %vm2583_vm5, %v5830_v42  ;;  %5832 = vmatmul.msk.bf16.vlgmr.msrb.gmra.mxu1 %vm2583_vm5, %v5830_v42  ;;  %vm8856_vm11 = vmmov %vm8853_vm0 }
 0x65d   : > { %v6582_v28 = vunpack.i.h.bf16 %v6580_v16  ;;  %v6581_v3 = vunpack.i.l.bf16 %v6580_v16  ;;  %5834 = vmatmul.msk.bf16.vlgmr.msrb.gmra.mxu2 %vm2583_vm5, %v5833_v50  ;;  %5835 = vmatmul.msk.bf16.vlgmr.msrb.gmra.mxu3 %vm2583_vm5, %v5833_v50  ;;  %vm8857_vm12 = vmmov %vm8853_vm0 }
 0x65f   : > { %v4292_v20 = vsel %vm8845_vm13, %v6577_v15, %v6582_v28  ;;  %v4294_v7 = vsel %vm8846_vm6, %v6582_v28, %v6577_v15  ;;  %v4291_v22 = vsel %vm8847_vm10, %v6576_v2, %v6581_v3  ;;  %v4293_v9 = vsel %vm8848_vm8, %v6581_v3, %v6576_v2  ;;  %v5836_v3 = vld [vmem:[%s6895_s2 + $0x5] sm:$0x1]  ;;  %vm8858_vm13 = vmmov %vm8853_vm0 }
 0x660   : > { %v4297_v33 = vpack.c.bf16 %v4294_v7, %v4293_v9  ;;  %v4298_v24 = vpack.c.bf16 %v4292_v20, %v4291_v22  ;;  %v5839_v20 = vld [vmem:[%s6895_s2 + $0x6] sm:$0x1]  ;;  %vm8859_vm6 = vmmov %vm8853_vm0 }
 0x661   : > { %vm8860_vm10 = vmmov %vm8853_vm0 }
 0x662   : > { %4309 = vmatpush.bf16.msra.mxu0 %v4297_v33  ;;  %4322 = vmatpush.bf16.msra.mxu1 %v4298_v24 }
 0x663   : > { %v6590_v53 = vpop.permute.xlu0 %6589 }
 0x664   : > { %v6592_v18 = vunpack.i.h.bf16 %v6590_v53  ;;  %v6591_v21 = vunpack.i.l.bf16 %v6590_v53  ;;  %v6595_v44 = vpop.permute.xlu1 %6594 }
 0x665   : > { %v6597_v0 = vunpack.i.h.bf16 %v6595_v44  ;;  %v6596_v60 = vunpack.i.l.bf16 %v6595_v44  ;;  %v5851_v44 = vld [vmem:[%s6895_s2 + $0xa] sm:$0x1] }
 0x666   : > { %v4433_v12 = vsel %vm8849_vm9, %v6587_v49, %v6592_v18  ;;  %v4435_v4 = vsel %vm8850_vm7, %v6592_v18, %v6587_v49  ;;  %v4432_v19 = vsel %vm8851_vm4, %v6586_v51, %v6591_v21  ;;  %v4434_v52 = vsel %vm8852_vm3, %v6591_v21, %v6586_v51 }
 0x667   : > { %v4438_v23 = vpack.c.bf16 %v4435_v4, %v4434_v52  ;;  %v4439_v42 = vpack.c.bf16 %v4433_v12, %v4432_v19  ;;  %v4386_v50 = vsel %vm8853_vm0, %v6597_v0, %v6602_v38  ;;  %v4388_v25 = vsel %vm8854_vm2, %v6602_v38, %v6597_v0 }
 0x668   : > { %v4385_v15 = vsel %vm8855_vm14, %v6596_v60, %v6601_v43  ;;  %v4387_v2 = vsel %vm8856_vm11, %v6601_v43, %v6596_v60  ;;  %vm5194_vm9 = vcmask 1041408  }
 0x669   : > { %v4391_v16 = vpack.c.bf16 %v4388_v25, %v4387_v2  ;;  %v4392_v28 = vpack.c.bf16 %v4386_v50, %v4385_v15  ;;  %4450 = vmatpush.bf16.msrb.mxu2 %v4438_v23  ;;  %4463 = vmatpush.bf16.msrb.mxu3 %v4439_v42 }
 0x66b   : > { %4403 = vmatpush.bf16.msrb.mxu0 %v4391_v16  ;;  %4416 = vmatpush.bf16.msrb.mxu1 %v4392_v28  ;;  %v6605_v7 = vpop.permute.xlu0 %6604 }
 0x66c   : > { %v6607_v22 = vunpack.i.h.bf16 %v6605_v7  ;;  %v6606_v9 = vunpack.i.l.bf16 %v6605_v7  ;;  %v6610_v33 = vpop.permute.xlu1 %6609  ;;  %5837 = vmatmul.msk.bf16.vlgmr.msra.gmra.mxu0 %vm2583_vm5, %v5836_v3  ;;  %5838 = vmatmul.msk.bf16.vlgmr.msra.gmra.mxu1 %vm2583_vm5, %v5836_v3 }
 0x66d   : > { %v6612_v24 = vunpack.i.h.bf16 %v6610_v33  ;;  %v6611_v10 = vunpack.i.l.bf16 %v6610_v33  ;;  %5840 = vmatmul.msk.bf16.vlgmr.msra.gmra.mxu2 %vm2583_vm5, %v5839_v20  ;;  %5841 = vmatmul.msk.bf16.vlgmr.msra.gmra.mxu3 %vm2583_vm5, %v5839_v20 }
 0x66e   : > { %4532 = vmatpush.bf16.msra.mxu2 %v4520_v26  ;;  %4545 = vmatpush.bf16.msra.mxu3 %v4521_v13  ;;  %v5848_v26 = vld [vmem:[%s6895_s2 + $0x9] sm:$0x1]  ;;  %v6615_v13 = vpop.permute.xlu2 %6614 }
 0x66f   : > { %v4480_v53 = vsel %vm8857_vm12, %v6607_v22, %v6612_v24  ;;  %v4482_v49 = vsel %vm8858_vm13, %v6612_v24, %v6607_v22  ;;  %v4479_v51 = vsel %vm8859_vm6, %v6606_v9, %v6611_v10  ;;  %v4481_v18 = vsel %vm8860_vm10, %v6611_v10, %v6606_v9  ;;  %v5860_v24 = vld [vmem:[%s6895_s2 + $0xd] sm:$0x1] }
 0x670   : > { %v4485_v21 = vpack.c.bf16 %v4482_v49, %v4481_v18  ;;  %v4486_v17 = vpack.c.bf16 %v4480_v53, %v4479_v51  ;;  %v6617_v14 = vunpack.i.h.bf16 %v6615_v13  ;;  %v6616_v34 = vunpack.i.l.bf16 %v6615_v13  ;;  %v5863_v18 = vld [vmem:[%s6895_s2 + $0xe] sm:$0x1] }
 0x672   : > { %4497 = vmatpush.bf16.msra.mxu0 %v4485_v21  ;;  %4510 = vmatpush.bf16.msra.mxu1 %v4486_v17 }
 0x673   : > { %v6620_v58 = vpop.permute.xlu0 %6619 }
 0x674   : > { %v6625_v5 = vpop.permute.xlu1 %6624  ;;  %v6622_v56 = vunpack.i.h.bf16 %v6620_v58  ;;  %v6621_v55 = vunpack.i.l.bf16 %v6620_v58 }
 0x675   : > { %v6626_v48 = vunpack.i.l.bf16 %v6625_v5 }
 0x676   : > { %v4751_v43 = vsel %vm917_vm15, %v6622_v56, %v6617_v14  ;;  %v4750_v0 = vsel %vm917_vm15, %v6621_v55, %v6616_v34 }
 0x677   : > { %v4755_v19 = vpack.c.bf16 %v4751_v43, %v4750_v0 }
 0x67b   : > { %v6635_v1 = vpop.permute.xlu0 %6634 }
 0x67c   : > { %5843 = vmatmul.msk.bf16.vlgmr.msrb.gmra.mxu0 %vm2583_vm5, %v5842_v61  ;;  %5844 = vmatmul.msk.bf16.vlgmr.msrb.gmra.mxu1 %vm2583_vm5, %v5842_v61  ;;  %v6640_v38 = vpop.permute.xlu1 %6639  ;;  %v6637_v15 = vunpack.i.h.bf16 %v6635_v1  ;;  %v6636_v2 = vunpack.i.l.bf16 %v6635_v1 }
 0x67d   : > { %5846 = vmatmul.msk.bf16.vlgmr.msrb.gmra.mxu2 %vm2583_vm5, %v5845_v29  ;;  %5847 = vmatmul.msk.bf16.vlgmr.msrb.gmra.mxu3 %vm2583_vm5, %v5845_v29  ;;  %v6642_v16 = vunpack.i.h.bf16 %v6640_v38  ;;  %v6641_v28 = vunpack.i.l.bf16 %v6640_v38 }
 0x67e   : > { %4567 = vmatpush.bf16.msrb.mxu0 %v4555_v11  ;;  %4580 = vmatpush.bf16.msrb.mxu1 %v4556_v39 }
 0x67f   : > { %4602 = vmatpush.bf16.msrb.mxu2 %v8125_v8  ;;  %4615 = vmatpush.bf16.msrb.mxu3 %v8127_v30  ;;  %v6630_v8 = vpop.permute.xlu2 %6629  ;;  %v6627_v30 = vunpack.i.h.bf16 %v6625_v5  ;;  %v4843_v10 = vsel %vm917_vm15, %v6637_v15, %v6642_v16  ;;  %v4845_v53 = vsel %vm917_vm15, %v6642_v16, %v6637_v15  ;;  %v4842_v49 = vsel %vm917_vm15, %v6636_v2, %v6641_v28 }
 0x680   : > { %v6632_v11 = vunpack.i.h.bf16 %v6630_v8  ;;  %v6631_v39 = vunpack.i.l.bf16 %v6630_v8  ;;  %v4844_v51 = vsel %vm917_vm15, %v6641_v28, %v6636_v2  ;;  %v4848_v29 = vpack.c.bf16 %v4843_v10, %v4842_v49 }
 0x681   : > { %v4849_v5 = vpack.c.bf16 %v4845_v53, %v4844_v51 }
 0x682   : > { %v4702_v36 = vsel %vm917_vm15, %v6627_v30, %v6632_v11  ;;  %v4704_v54 = vsel %vm917_vm15, %v6632_v11, %v6627_v30  ;;  %v4701_v37 = vsel %vm917_vm15, %v6626_v48, %v6631_v39  ;;  %v4703_v31 = vsel %vm917_vm15, %v6631_v39, %v6626_v48 }
 0x683   : > { %v4707_v60 = vpack.c.bf16 %v4702_v36, %v4701_v37  ;;  %v4708_v12 = vpack.c.bf16 %v4704_v54, %v4703_v31  ;;  %v6650_v23 = vpop.permute.xlu0 %6649  ;;  %v5866_v54 = vld [vmem:[%s6895_s2 + $0xf] sm:$0x1] }
 0x684   : > { %v8528_v35 = vpop.permute.xlu1 %6654  ;;  %v6652_v50 = vunpack.i.h.bf16 %v6650_v23  ;;  %v6651_v25 = vunpack.i.l.bf16 %v6650_v23 }
 0x685   : > { %v6657_v48 = vunpack.i.h.bf16 %v8528_v35 }
 0x687   : > { %v6645_v42 = vpop.permute.xlu2 %6644 }
 0x688   : > { %v6647_v3 = vunpack.i.h.bf16 %v6645_v42  ;;  %v6646_v20 = vunpack.i.l.bf16 %v6645_v42 }
 0x68a   : > { %v4795_v7 = vsel %vm917_vm15, %v6646_v20, %v6651_v25  ;;  %v4796_v22 = vsel %vm917_vm15, %v6647_v3, %v6652_v50  ;;  %v4797_v9 = vsel %vm917_vm15, %v6651_v25, %v6646_v20  ;;  %v4798_v33 = vsel %vm917_vm15, %v6652_v50, %v6647_v3 }
 0x68b   : > { %v4801_v17 = vpack.c.bf16 %v4796_v22, %v4795_v7  ;;  %v4802_v61 = vpack.c.bf16 %v4798_v33, %v4797_v9  ;;  %v6665_v13 = vpop.permute.xlu0 %6664 }
 0x68c   : > { %5849 = vmatmul.msk.bf16.vlgmr.msra.gmra.mxu0 %vm2583_vm5, %v5848_v26  ;;  %5850 = vmatmul.msk.bf16.vlgmr.msra.gmra.mxu1 %vm2583_vm5, %v5848_v26  ;;  %v6670_v52 = vpop.permute.xlu1 %6669  ;;  %v6666_v38 = vunpack.i.l.bf16 %v6665_v13 }
 0x68d   : > { %5852 = vmatmul.msk.bf16.vlgmr.msra.gmra.mxu2 %vm2583_vm5, %v5851_v44  ;;  %5853 = vmatmul.msk.bf16.vlgmr.msra.gmra.mxu3 %vm2583_vm5, %v5851_v44  ;;  %v6667_v44 = vunpack.i.h.bf16 %v6665_v13  ;;  %v6672_v58 = vunpack.i.h.bf16 %v6670_v52  ;;  %v6671_v8 = vunpack.i.l.bf16 %v6670_v52  ;;  %v5875_v13 = vld [vmem:[%s6895_s2 + $0x12] sm:$0x1] }
 0x68e   : > { %4637 = vmatpush.bf16.msra.mxu0 %v4625_v57  ;;  %4650 = vmatpush.bf16.msra.mxu1 %v4626_v32  ;;  %v4748_v57 = vsel %vm917_vm15, %v6616_v34, %v6621_v55  ;;  %v5857_v32 = vld [vmem:[%s6895_s2 + $0xc] sm:$0x1] }
 0x68f   : > { %4672 = vmatpush.bf16.msra.mxu2 %v4660_v45  ;;  %4685 = vmatpush.bf16.msra.mxu3 %v4661_v59  ;;  %v5854_v45 = vld [vmem:[%s6895_s2 + $0xb] sm:$0x1]  ;;  %v4749_v59 = vsel %vm917_vm15, %v6617_v14, %v6622_v56  ;;  %v6660_v26 = vpop.permute.xlu2 %6659  ;;  %v6656_v56 = vunpack.i.l.bf16 %v8528_v35  ;;  %v4890_v14 = vsel %vm917_vm15, %v6667_v44, %v6672_v58  ;;  %v4892_v34 = vsel %vm917_vm15, %v6672_v58, %v6667_v44 }
 0x690   : > { %v4754_v4 = vpack.c.bf16 %v4749_v59, %v4748_v57  ;;  %v6662_v55 = vunpack.i.h.bf16 %v6660_v26  ;;  %v6661_v11 = vunpack.i.l.bf16 %v6660_v26  ;;  %v4889_v1 = vsel %vm917_vm15, %v6666_v38, %v6671_v8  ;;  %v5869_v59 = vld [vmem:[%s6895_s2 + $0x10] sm:$0x1] }
 0x691   : > { %v4891_v36 = vsel %vm917_vm15, %v6671_v8, %v6666_v38  ;;  %v4895_v57 = vpack.c.bf16 %v4890_v14, %v4889_v1 }
 0x692   : > { %v4937_v37 = vsel %vm2147_vm1, %v6657_v48, %v6662_v55  ;;  %v4939_v35 = vsel %vm2147_vm1, %v6662_v55, %v6657_v48  ;;  %v4936_v31 = vsel %vm2147_vm1, %v6656_v56, %v6661_v11 }
 0x693   : > { %v4942_v43 = vpack.c.bf16 %v4937_v37, %v4936_v31 }
 0x694   : > { %v8570_v21 = vpop.permute.xlu1 %6684 }
 0x695   : > { %v6687_v15 = vunpack.i.h.bf16 %v8570_v21  ;;  %v6686_v2 = vunpack.i.l.bf16 %v8570_v21 }
 0x697   : > { %v6675_v39 = vpop.permute.xlu2 %6674 }
 0x698   : > { %v6677_v33 = vunpack.i.h.bf16 %v6675_v39 }
 0x69c   : > { %5855 = vmatmul.msk.bf16.vlgmr.msrb.gmra.mxu0 %vm2583_vm5, %v5854_v45  ;;  %5856 = vmatmul.msk.bf16.vlgmr.msrb.gmra.mxu1 %vm2583_vm5, %v5854_v45  ;;  %v8576_v30 = vpop.permute.xlu1 %6699  ;;  %v4938_v45 = vsel %vm2147_vm1, %v6661_v11, %v6656_v56 }
 0x69d   : > { %5858 = vmatmul.msk.bf16.vlgmr.msrb.gmra.mxu2 %vm2583_vm5, %v5857_v32  ;;  %5859 = vmatmul.msk.bf16.vlgmr.msrb.gmra.mxu3 %vm2583_vm5, %v5857_v32  ;;  %v4896_v32 = vpack.c.bf16 %v4892_v34, %v4891_v36  ;;  %v4943_v0 = vpack.c.bf16 %v4939_v35, %v4938_v45  ;;  %v6701_v45 = vunpack.i.l.bf16 %v8576_v30 }
 0x69e   : > { %4719 = vmatpush.bf16.msrb.mxu0 %v4707_v60  ;;  %4732 = vmatpush.bf16.msrb.mxu1 %v4708_v12  ;;  %v6680_v60 = vpop.permute.xlu0 %6679 }
 0x69f   : > { %4766 = vmatpush.bf16.msrb.mxu2 %v4754_v4  ;;  %4779 = vmatpush.bf16.msrb.mxu3 %v4755_v19  ;;  %v6690_v42 = vpop.permute.xlu2 %6689  ;;  %v6682_v3 = vunpack.i.h.bf16 %v6680_v60  ;;  %v6681_v20 = vunpack.i.l.bf16 %v6680_v60 }
 0x6a0   : > { %v6692_v7 = vunpack.i.h.bf16 %v6690_v42  ;;  %v6691_v22 = vunpack.i.l.bf16 %v6690_v42  ;;  %v5878_v42 = vld [vmem:[%s6895_s2 + $0x13] sm:$0x1] }
 0x6a1   : > { %v5033_v26 = vsel %vm2147_vm1, %v6682_v3, %v6677_v33 }
 0x6a2   : > { %v4984_v49 = vsel %vm2147_vm1, %v6687_v15, %v6692_v7  ;;  %v4986_v51 = vsel %vm2147_vm1, %v6692_v7, %v6687_v15  ;;  %v4985_v21 = vsel %vm2147_vm1, %v6691_v22, %v6686_v2 }
 0x6a3   : > { %v4990_v38 = vpack.c.bf16 %v4986_v51, %v4985_v21  ;;  %v5884_v21 = vld [vmem:[%s6895_s2 + $0x15] sm:$0x1] }
 0x6a4   : > { %v3935_v12 = vpop.permute.xlu1 %3934 }
 0x6a6   : > { %v6695_v9 = vpop.permute.xlu0 %6694 }
 0x6a7   : > { %v6705_v1 = vpop.permute.xlu2 %6704  ;;  %v6697_v36 = vunpack.i.h.bf16 %v6695_v9  ;;  %v6696_v31 = vunpack.i.l.bf16 %v6695_v9 }
 0x6ac   : > { %5861 = vmatmul.msk.bf16.vlgmr.msra.gmra.mxu0 %vm2583_vm5, %v5860_v24  ;;  %5862 = vmatmul.msk.bf16.vlgmr.msra.gmra.mxu1 %vm2583_vm5, %v5860_v24  ;;  %v6676_v24 = vunpack.i.l.bf16 %v6675_v39 }
 0x6ad   : > { %5864 = vmatmul.msk.bf16.vlgmr.msra.gmra.mxu2 %vm2583_vm5, %v5863_v18  ;;  %5865 = vmatmul.msk.bf16.vlgmr.msra.gmra.mxu3 %vm2583_vm5, %v5863_v18  ;;  %v4983_v18 = vsel %vm2147_vm1, %v6686_v2, %v6691_v22 }
 0x6ae   : > { %4813 = vmatpush.bf16.msra.mxu0 %v4801_v17  ;;  %4826 = vmatpush.bf16.msra.mxu1 %v4802_v61  ;;  %v5872_v17 = vld [vmem:[%s6895_s2 + $0x11] sm:$0x1]  ;;  %v5030_v61 = vsel %vm2147_vm1, %v6676_v24, %v6681_v20  ;;  %v4989_v44 = vpack.c.bf16 %v4984_v49, %v4983_v18  ;;  %v6710_v34 = vpop.permute.xlu0 %6709 }
 0x6af   : > { %4860 = vmatpush.bf16.msra.mxu2 %v4848_v29  ;;  %4873 = vmatpush.bf16.msra.mxu3 %v4849_v5  ;;  %v5031_v29 = vsel %vm2147_vm1, %v6677_v33, %v6682_v3  ;;  %v5032_v5 = vsel %vm2147_vm1, %v6681_v20, %v6676_v24  ;;  %v6712_v37 = vunpack.i.h.bf16 %v6710_v34  ;;  %v6711_v35 = vunpack.i.l.bf16 %v6710_v34  ;;  %v5893_v34 = vld [vmem:[%s6895_s2 + $0x18] sm:$0x1] }
 0x6b0   : > { %v5036_v48 = vpack.c.bf16 %v5031_v29, %v5030_v61  ;;  %v5037_v56 = vpack.c.bf16 %v5033_v26, %v5032_v5  ;;  %v5887_v29 = vld [vmem:[%s6895_s2 + $0x16] sm:$0x1] }
 0x6bc   : > { %5867 = vmatmul.msk.bf16.vlgmr.msrb.gmra.mxu0 %vm2583_vm5, %v5866_v54  ;;  %5868 = vmatmul.msk.bf16.vlgmr.msrb.gmra.mxu1 %vm2583_vm5, %v5866_v54  ;;  %v6702_v54 = vunpack.i.h.bf16 %v8576_v30 }
 0x6bd   : > { %5870 = vmatmul.msk.bf16.vlgmr.msrb.gmra.mxu2 %vm2583_vm5, %v5869_v59  ;;  %5871 = vmatmul.msk.bf16.vlgmr.msrb.gmra.mxu3 %vm2583_vm5, %v5869_v59  ;;  %v6707_v59 = vunpack.i.h.bf16 %v6705_v1 }
 0x6be   : > { %4907 = vmatpush.bf16.msrb.mxu0 %v4895_v57  ;;  %4920 = vmatpush.bf16.msrb.mxu1 %v4896_v32  ;;  %v6706_v57 = vunpack.i.l.bf16 %v6705_v1  ;;  %v5125_v32 = vsel %vm2147_vm1, %v6697_v36, %v6702_v54 }
 0x6bf   : > { %4954 = vmatpush.bf16.msrb.mxu2 %v4942_v43  ;;  %4967 = vmatpush.bf16.msrb.mxu3 %v4943_v0  ;;  %v4076_v4 = vpop.f32.mrf.mxu2  ;;  %v5127_v43 = vsel %vm2147_vm1, %v6702_v54, %v6697_v36 }
 0x6c0   : > { %v4089_v19 = vpop.f32.mrf.mxu3  ;;  %v4093_v52 = vadd.f32 %v4076_v4, %v3935_v12  ;;  %v5078_v4 = vsel %vm2147_vm1, %v6707_v59, %v6712_v37  ;;  %v5079_v30 = vsel %vm2147_vm1, %v6711_v35, %v6706_v57 }
 0x6c1   : > { %v4094_v23 = vadd.f32 %v4089_v19, %v3935_v12  ;;  %v5077_v12 = vsel %vm2147_vm1, %v6706_v57, %v6711_v35  ;;  %v5080_v19 = vsel %vm2147_vm1, %v6712_v37, %v6707_v59 }
 0x6c2   : > { %v5084_v3 = vpack.c.bf16 %v5080_v19, %v5079_v30 }
 0x6c3   : > { %v4123_v50 = vpop.f32.mrf.mxu0  ;;  %v4136_v25 = vpop.f32.mrf.mxu1 }
 0x6c4   : > { %v4140_v16 = vadd.f32 %v4123_v50, %v4093_v52  ;;  %v4141_v28 = vadd.f32 %v4136_v25, %v4094_v23  ;;  %v5124_v50 = vsel %vm2147_vm1, %v6696_v31, %v6701_v45  ;;  %v5126_v25 = vsel %vm2147_vm1, %v6701_v45, %v6696_v31 }
 0x6c5   : > { %v5130_v20 = vpack.c.bf16 %v5125_v32, %v5124_v50  ;;  %v5131_v7 = vpack.c.bf16 %v5127_v43, %v5126_v25 }
 0x6c7   : > { %v4078_v10 = vpop.f32.mrf.mxu2 }
 0x6c8   : > { %v4091_v53 = vpop.f32.mrf.mxu3 }
 0x6cb   : > { %v4125_v58 = vpop.f32.mrf.mxu0  ;;  %v4138_v8 = vpop.f32.mrf.mxu1 }
 0x6cc   : > { %5873 = vmatmul.msk.bf16.vlgmr.msra.gmra.mxu0 %vm2583_vm5, %v5872_v17  ;;  %5874 = vmatmul.msk.bf16.vlgmr.msra.gmra.mxu1 %vm2583_vm5, %v5872_v17 }
 0x6cd   : > { %5876 = vmatmul.msk.bf16.vlgmr.msra.gmra.mxu2 %vm2583_vm5, %v5875_v13  ;;  %5877 = vmatmul.msk.bf16.vlgmr.msra.gmra.mxu3 %vm2583_vm5, %v5875_v13 }
 0x6ce   : > { %5001 = vmatpush.bf16.msra.mxu0 %v4989_v44  ;;  %5014 = vmatpush.bf16.msra.mxu1 %v4990_v38 }
 0x6cf   : > { %5048 = vmatpush.bf16.msra.mxu2 %v5036_v48  ;;  %5061 = vmatpush.bf16.msra.mxu3 %v5037_v56  ;;  %v4170_v55 = vpop.f32.mrf.mxu2 }
 0x6d0   : > { %v4183_v11 = vpop.f32.mrf.mxu3  ;;  %v4187_v39 = vadd.f32 %v4170_v55, %v4140_v16  ;;  %v5881_v16 = vld [vmem:[%s6895_s2 + $0x14] sm:$0x1] }
 0x6d1   : > { %v4188_v14 = vadd.f32 %v4183_v11, %v4141_v28  ;;  %v5083_v28 = vpack.c.bf16 %v5078_v4, %v5077_v12  ;;  %v5890_v11 = vld [vmem:[%s6895_s2 + $0x17] sm:$0x1] }
 0x6d7   : > { %v4172_v0 = vpop.f32.mrf.mxu2 }
 0x6d8   : > { %v4185_v60 = vpop.f32.mrf.mxu3 }
 0x6d9   : > { %v4217_v52 = vpop.f32.mrf.mxu0  ;;  %v4230_v23 = vpop.f32.mrf.mxu1 }
 0x6da   : > { %v4234_v15 = vadd.f32 %v4217_v52, %v4187_v39  ;;  %v4235_v2 = vadd.f32 %v4230_v23, %v4188_v14 }
 0x6dc   : > { %5879 = vmatmul.msk.bf16.vlgmr.msrb.gmra.mxu0 %vm2583_vm5, %v5878_v42  ;;  %5880 = vmatmul.msk.bf16.vlgmr.msrb.gmra.mxu1 %vm2583_vm5, %v5878_v42 }
 0x6dd   : > { %5882 = vmatmul.msk.bf16.vlgmr.msrb.gmra.mxu2 %vm2583_vm5, %v5881_v16  ;;  %5883 = vmatmul.msk.bf16.vlgmr.msrb.gmra.mxu3 %vm2583_vm5, %v5881_v16 }
 0x6de   : > { %5095 = vmatpush.bf16.msrb.mxu0 %v5083_v28  ;;  %5108 = vmatpush.bf16.msrb.mxu1 %v5084_v3 }
 0x6df   : > { %5142 = vmatpush.bf16.msrb.mxu2 %v5130_v20  ;;  %5155 = vmatpush.bf16.msrb.mxu3 %v5131_v7 }
 0x6e0   : > { %v4264_v27 = vpop.f32.mrf.mxu2  ;;  %v4277_v22 = vpop.f32.mrf.mxu3 }
 0x6e1   : > { %v4281_v9 = vadd.f32 %v4264_v27, %v4234_v15  ;;  %v4282_v33 = vadd.f32 %v4277_v22, %v4235_v2  ;;  %v4219_v24 = vpop.f32.mrf.mxu0  ;;  %v4232_v10 = vpop.f32.mrf.mxu1  ;;  %v8662_v22 = vstv %s5165_s1 }
 0x6e2   : > { %6713 = vrcp.f32 %v8662_v22  ;;  %vm5172_vm1 = vweird.f32 %v8662_v22 }
 0x6e8   : > { %v4266_v53 = vpop.f32.mrf.mxu2  ;;  %v4279_v49 = vpop.f32.mrf.mxu3 }
 0x6e9   : > { %v4311_v51 = vpop.f32.mrf.mxu0  ;;  %v4324_v18 = vpop.f32.mrf.mxu1 }
 0x6ea   : > { %v4328_v17 = vadd.f32 %v4311_v51, %v4281_v9  ;;  %v4329_v61 = vadd.f32 %v4324_v18, %v4282_v33  ;;  %v6714_v24 = vpop.eup %6713 }
 0x6eb   : > { %v5168_v18 = vmul.f32 %v6714_v24, %v8662_v22  ;;  %vm5173_vm15 = vweird.f32 %v6714_v24 }
 0x6ec   : > { %5885 = vmatmul.msk.bf16.vlgmr.msra.gmra.mxu0 %vm2583_vm5, %v5884_v21  ;;  %5886 = vmatmul.msk.bf16.vlgmr.msra.gmra.mxu1 %vm2583_vm5, %v5884_v21 }
 0x6ed   : > { %5888 = vmatmul.msk.bf16.vlgmr.msra.gmra.mxu2 %vm2583_vm5, %v5887_v29  ;;  %5889 = vmatmul.msk.bf16.vlgmr.msra.gmra.mxu3 %vm2583_vm5, %v5887_v29  ;;  %v5169_v21 = vsub.f32 1.0, %v5168_v18  ;;  %v8862_v18 = vld [vmem:[#allocation11_spill] sm:$0xff] }
 0x6f0   : > { %v4358_v5 = vpop.f32.mrf.mxu2  ;;  %v4371_v26 = vpop.f32.mrf.mxu3 }
 0x6f1   : > { %v4375_v13 = vadd.f32 %v4358_v5, %v4328_v17  ;;  %v4376_v44 = vadd.f32 %v4371_v26, %v4329_v61  ;;  %v4313_v38 = vpop.f32.mrf.mxu0  ;;  %v4326_v58 = vpop.f32.mrf.mxu1  ;;  %v5170_v17 = vmul.f32 %v6714_v24, %v5169_v21  ;;  %v5178_v61 = vand.u32 2147483648, %v8662_v22  ;;  %v8863_v21 = vld [vmem:[#allocation12_spill] sm:$0xff] }
 0x6f3   : > { %v5171_v26 = vadd.f32 %v6714_v24, %v5170_v17  ;;  %v5179_v58 = vor.u32 1.1754944e-38, %v5178_v61 }
 0x6f8   : > { %v4360_v8 = vpop.f32.mrf.mxu2  ;;  %v4373_v48 = vpop.f32.mrf.mxu3 }
 0x6f9   : > { %v4405_v56 = vpop.f32.mrf.mxu0  ;;  %v4418_v55 = vpop.f32.mrf.mxu1 }
 0x6fa   : > { %v4422_v39 = vadd.f32 %v4405_v56, %v4375_v13  ;;  %v4423_v14 = vadd.f32 %v4418_v55, %v4376_v44  ;;  %v5176_v13 = vand.u32 2147483647, %v8662_v22 }
 0x6fc   : > { %5891 = vmatmul.msk.bf16.vlgmr.msrb.gmra.mxu0 %vm2583_vm5, %v5890_v11  ;;  %5892 = vmatmul.msk.bf16.vlgmr.msrb.gmra.mxu1 %vm2583_vm5, %v5890_v11  ;;  %vm5177_vm8 = vcmp.eq.f32.partialorder %v5176_v13, 8.507059e+37 }
 0x6fd   : > { %5894 = vmatmul.msk.bf16.vlgmr.msrb.gmra.mxu2 %vm2583_vm5, %v5893_v34  ;;  %5895 = vmatmul.msk.bf16.vlgmr.msrb.gmra.mxu3 %vm2583_vm5, %v5893_v34  ;;  %vm5174_vm5 = vmor %vm5172_vm1, %vm5173_vm15 }
 0x6fe   : > { %v5175_v8 = vsel %vm5174_vm5, %v6714_v24, %v5171_v26 }
 0x6ff   : > { %v5180_v48 = vsel %vm5177_vm8, %v5179_v58, %v5175_v8  ;;  %v8864_v58 = vld [vmem:[#allocation13_spill] sm:$0xff] }
 0x700   : > { %v4452_v1 = vpop.f32.mrf.mxu2  ;;  %v4465_v36 = vpop.f32.mrf.mxu3  ;;  %5955 = vpush %v5180_v48 }
 0x701   : > { %v4469_v54 = vadd.f32 %v4452_v1, %v4422_v39  ;;  %v4470_v37 = vadd.f32 %v4465_v36, %v4423_v14  ;;  %v4407_v35 = vpop.f32.mrf.mxu0  ;;  %v4420_v31 = vpop.f32.mrf.mxu1 }
 0x708   : > { %v4454_v45 = vpop.f32.mrf.mxu2  ;;  %v4467_v59 = vpop.f32.mrf.mxu3 }
 0x709   : > { %v4499_v57 = vpop.f32.mrf.mxu0  ;;  %v4512_v32 = vpop.f32.mrf.mxu1 }
 0x70a   : > { %v4516_v43 = vadd.f32 %v4499_v57, %v4469_v54  ;;  %v4517_v0 = vadd.f32 %v4512_v32, %v4470_v37 }
 0x710   : > { %v4534_v60 = vpop.f32.mrf.mxu2  ;;  %v4547_v12 = vpop.f32.mrf.mxu3 }
 0x711   : > { %v4551_v4 = vadd.f32 %v4534_v60, %v4516_v43  ;;  %v4552_v30 = vadd.f32 %v4547_v12, %v4517_v0  ;;  %v4501_v19 = vpop.f32.mrf.mxu0  ;;  %v4514_v52 = vpop.f32.mrf.mxu1 }
 0x718   : > { %v4536_v23 = vpop.f32.mrf.mxu2  ;;  %v4549_v42 = vpop.f32.mrf.mxu3 }
 0x719   : > { %v4569_v50 = vpop.f32.mrf.mxu0  ;;  %v4582_v25 = vpop.f32.mrf.mxu1 }
 0x71a   : > { %v4586_v15 = vadd.f32 %v4569_v50, %v4551_v4  ;;  %v4587_v2 = vadd.f32 %v4582_v25, %v4552_v30  ;;  %v570_v4 = vpop.permute.xlu2 %569 }
 0x71b   : > { %v684_v52 = vadd.f32 %v7249_v40, %v570_v4  ;;  %v685_v23 = vadd.f32 %v7251_v41, %v570_v4 }
 0x71d   : > { %v736_v25 = vadd.f32 %v7262_v46, %v684_v52 }
 0x720   : > { %v4604_v16 = vpop.f32.mrf.mxu2  ;;  %v4617_v28 = vpop.f32.mrf.mxu3 }
 0x721   : > { %v4621_v3 = vadd.f32 %v4604_v16, %v4586_v15  ;;  %v4622_v20 = vadd.f32 %v4617_v28, %v4587_v2  ;;  %v4571_v7 = vpop.f32.mrf.mxu0  ;;  %v4584_v27 = vpop.f32.mrf.mxu1  ;;  %v737_v15 = vadd.f32 %v7264_v47, %v685_v23  ;;  %v783_v28 = vadd.f32 %v7275_v62, %v736_v25  ;;  %v8871_v23 = vld [vmem:[#allocation20_spill] sm:$0xff] }
 0x723   : > { %v824_v27 = vadd.f32 %v7284_v6, %v783_v28 }
 0x725   : > { %v870_v47 = vadd.f32 %v8862_v18, %v824_v27 }
 0x727   : > { %v911_v8 = vadd.f32 %v8864_v58, %v870_v47 }
 0x728   : > { %v4606_v9 = vpop.f32.mrf.mxu2  ;;  %v4619_v33 = vpop.f32.mrf.mxu3 }
 0x729   : > { %v4639_v10 = vpop.f32.mrf.mxu0  ;;  %v4652_v53 = vpop.f32.mrf.mxu1  ;;  %v8861_v9 = vld [vmem:[#allocation10_spill] sm:$0xff] }
 0x72a   : > { %v4656_v49 = vadd.f32 %v4639_v10, %v4621_v3  ;;  %v4657_v51 = vadd.f32 %v4652_v53, %v4622_v20  ;;  %v784_v3 = vadd.f32 %v7277_v63, %v737_v15 }
 0x72c   : > { %v825_v40 = vadd.f32 %v8861_v9, %v784_v3 }
 0x72e   : > { %v871_v17 = vadd.f32 %v8863_v21, %v825_v40 }
 0x730   : > { %v4674_v29 = vpop.f32.mrf.mxu2  ;;  %v4687_v5 = vpop.f32.mrf.mxu3 }
 0x731   : > { %v4641_v44 = vpop.f32.mrf.mxu0  ;;  %v4654_v38 = vpop.f32.mrf.mxu1  ;;  %v4691_v33 = vadd.f32 %v4674_v29, %v4656_v49  ;;  %v4692_v41 = vadd.f32 %v4687_v5, %v4657_v51  ;;  %v8865_v49 = vld [vmem:[#allocation14_spill] sm:$0xff]  ;;  %s5956_s2 = spop %5955 }
 0x732   : > { %v912_v51 = vadd.f32 %v8865_v49, %v871_v17  ;;  %s5182_s17 = smul.f32 1e-06, %s5956_s2 }
 0x738   : > { %v4676_v56 = vpop.f32.mrf.mxu2  ;;  %v4689_v55 = vpop.f32.mrf.mxu3 }
 0x739   : > { %v4721_v11 = vpop.f32.mrf.mxu0  ;;  %v4734_v39 = vpop.f32.mrf.mxu1 }
 0x73a   : > { %v4738_v24 = vadd.f32 %v4721_v11, %v4691_v33  ;;  %v4739_v10 = vadd.f32 %v4734_v39, %v4692_v41 }
 0x740   : > { %v4768_v14 = vpop.f32.mrf.mxu2  ;;  %v4781_v34 = vpop.f32.mrf.mxu3 }
 0x741   : > { %v4723_v1 = vpop.f32.mrf.mxu0  ;;  %v4736_v36 = vpop.f32.mrf.mxu1  ;;  %v4785_v61 = vadd.f32 %v4768_v14, %v4738_v24  ;;  %v4786_v62 = vadd.f32 %v4781_v34, %v4739_v10  ;;  %v8866_v14 = vld [vmem:[#allocation15_spill] sm:$0xff] }
 0x742   : > { %v959_v34 = vadd.f32 %v8866_v14, %v911_v8  ;;  %v8867_v36 = vld [vmem:[#allocation16_spill] sm:$0xff] }
 0x748   : > { %v4770_v54 = vpop.f32.mrf.mxu2  ;;  %v4783_v37 = vpop.f32.mrf.mxu3 }
 0x749   : > { %v4815_v35 = vpop.f32.mrf.mxu0  ;;  %v4828_v31 = vpop.f32.mrf.mxu1  ;;  %v960_v54 = vadd.f32 %v8867_v36, %v912_v51 }
 0x74a   : > { %v4832_v13 = vadd.f32 %v4815_v35, %v4785_v61  ;;  %v4833_v44 = vadd.f32 %v4828_v31, %v4786_v62 }
 0x750   : > { %v4862_v45 = vpop.f32.mrf.mxu2  ;;  %v4875_v59 = vpop.f32.mrf.mxu3 }
 0x751   : > { %v4817_v57 = vpop.f32.mrf.mxu0  ;;  %v4830_v32 = vpop.f32.mrf.mxu1  ;;  %v4879_v38 = vadd.f32 %v4862_v45, %v4832_v13  ;;  %v4880_v6 = vadd.f32 %v4875_v59, %v4833_v44  ;;  %v8868_v59 = vld [vmem:[#allocation17_spill] sm:$0xff] }
 0x752   : > { %v1011_v57 = vadd.f32 %v8868_v59, %v959_v34  ;;  %v8869_v32 = vld [vmem:[#allocation18_spill] sm:$0xff] }
 0x758   : > { %v4864_v43 = vpop.f32.mrf.mxu2  ;;  %v4877_v0 = vpop.f32.mrf.mxu3 }
 0x759   : > { %v4909_v60 = vpop.f32.mrf.mxu0  ;;  %v4922_v12 = vpop.f32.mrf.mxu1  ;;  %v1012_v43 = vadd.f32 %v8869_v32, %v960_v54 }
 0x75a   : > { %v4926_v29 = vadd.f32 %v4909_v60, %v4879_v38  ;;  %v4927_v5 = vadd.f32 %v4922_v12, %v4880_v6 }
 0x760   : > { %v4956_v30 = vpop.f32.mrf.mxu2  ;;  %v4969_v19 = vpop.f32.mrf.mxu3 }
 0x761   : > { %v4911_v42 = vpop.f32.mrf.mxu0  ;;  %v4924_v50 = vpop.f32.mrf.mxu1  ;;  %v4973_v55 = vadd.f32 %v4956_v30, %v4926_v29  ;;  %v4974_v11 = vadd.f32 %v4969_v19, %v4927_v5  ;;  %v8870_v30 = vld [vmem:[#allocation19_spill] sm:$0xff] }
 0x762   : > { %v1058_v19 = vadd.f32 %v8870_v30, %v1011_v57  ;;  %v1059_v42 = vadd.f32 %v8871_v23, %v1012_v43 }
 0x768   : > { %v4958_v2 = vpop.f32.mrf.mxu2  ;;  %v4971_v16 = vpop.f32.mrf.mxu3 }
 0x769   : > { %v5003_v20 = vpop.f32.mrf.mxu0  ;;  %v5016_v7 = vpop.f32.mrf.mxu1  ;;  %v5183_v2 = vstv %s5182_s17 }
 0x76a   : > { %v5020_v37 = vadd.f32 %v5003_v20, %v4973_v55  ;;  %v5021_v35 = vadd.f32 %v5016_v7, %v4974_v11 }
 0x770   : > { %v5050_v53 = vpop.f32.mrf.mxu2  ;;  %v5063_v46 = vpop.f32.mrf.mxu3 }
 0x771   : > { %v5005_v26 = vpop.f32.mrf.mxu0  ;;  %v5018_v63 = vpop.f32.mrf.mxu1  ;;  %v5067_v31 = vadd.f32 %v5050_v53, %v5020_v37  ;;  %v5068_v45 = vadd.f32 %v5063_v46, %v5021_v35  ;;  %v8872_v53 = vld [vmem:[#allocation9_spill] sm:$0xff] }
 0x778   : > { %v5052_v48 = vpop.f32.mrf.mxu2  ;;  %v5065_v56 = vpop.f32.mrf.mxu3 }
 0x779   : > { %v5097_v39 = vpop.f32.mrf.mxu0  ;;  %v5110_v1 = vpop.f32.mrf.mxu1 }
 0x77a   : > { %v5114_v0 = vadd.f32 %v5097_v39, %v5067_v31  ;;  %v5115_v60 = vadd.f32 %v5110_v1, %v5068_v45 }
 0x780   : > { %v5144_v12 = vpop.f32.mrf.mxu2  ;;  %v5157_v4 = vpop.f32.mrf.mxu3 }
 0x781   : > { %v5161_v52 = vadd.f32 %v5144_v12, %v5114_v0  ;;  %v5162_v50 = vadd.f32 %v5157_v4, %v5115_v60  ;;  %v5112_v25 = vpop.f32.mrf.mxu1  ;;  %v5099_v15 = vpop.f32.mrf.mxu0 }
 0x783   : > { %v5163_v16 = vadd.f32 %v5161_v52, %v1058_v19  ;;  %v5164_v28 = vadd.f32 %v5162_v50, %v1059_v42 }
 0x785   : > { %v5184_v3 = vmul.f32 %v5183_v2, %v5163_v16  ;;  %v5185_v20 = vmul.f32 %v5183_v2, %v5164_v28 }
 0x787   : > { %6715 = vtanh.f32 %v5184_v3 }
 0x788   : > { %6717 = vtanh.f32 %v5185_v20  ;;  %v5159_v7 = vpop.f32.mrf.mxu3  ;;  %v5146_v27 = vpop.f32.mrf.mxu2 }
 0x78d   : > { %v6716_v9 = vpop.eup %6715 }
 0x78e   : > { %v6718_v40 = vpop.eup %6717  ;;  %v5189_v41 = vmul.f32 %v6716_v9, %v8662_v22 }
 0x78f   : > { %v5190_v33 = vmul.f32 %v6718_v40, %v8662_v22 }
 0x791   : > { %v5193_v24 = vrot.slane %v5190_v33, 6 }
 0x793   : > { %v5195_v10 = vsel %vm5194_vm9, %v5189_v41, %v5193_v24 }
 0x794   : > { %v5197_v46 = vadd.f32 %v5195_v10, %v8872_v53 }
 0x796   : > { %5198 = vst [vmem:[#allocation2] sm:$0xf] %v5197_v46 }
 0x797   : > { %5199 = vst [vmem:[%s6910_s11] sm:$0xf] %v5197_v46 }
 0x798 PF: > { %s8873_s30 = sld [smem:[#allocation6_spill]] }
 0x799   : > { %s8874_s15 = sld [smem:[#allocation4_spill]] }
 0x79a   : > { %s8875_s16 = sld [smem:[#allocation5_spill]] }
 0x79b   : > { %s8876_s17 = sld [smem:[#allocation7_spill]] }
 0x79c   : > { %s8877_s18 = sld [smem:[#allocation8_spill]] }
 0x79e   : > { %s21_s19 = sadd.s32 1, %s8873_s30  }
 0x79f   : > { %p18_p8 = scmp.ge.s32.totalorder %s21_s19, 8  }
 0x7a1   :  { %20 = sbr.rel (!%p18_p8) target bundleno = 8 (0x8), region = 198 }

</bundles_post_ra>
